<compile_context>
chip_gen: v6e
topology: v6e:2x2x1
jax: 0.10.0
libtpu: 0.0.40
codegen_flags: <defaults>
</compile_context>

<pallas_src>
import math
import functools

import jax
import jax.numpy as jnp
from jax.experimental import pallas as pl
from jax.experimental.pallas import tpu as pltpu

K_HOPS = 3  # cfg.skeleton_graph == 2


# ----------------------------------------------------------------------------
# The single fused Pallas kernel
# ----------------------------------------------------------------------------
def mmgcn_kernel(x_ref, wc_ref, adjoff_ref, dsum_ref, coef_ref,
                 bias_ref, gamma_ref, beta_ref, o_ref):
    """Whole-network forward.

    x_ref      : (B*J, F)            input, zero-padded to F = hid_dim
    wc_ref     : (NG, F, 2F)         [W0 | W1] per gconv, zero-padded
    adjoff_ref : (NG, K*B*J, B*J)    block-diag (over batch) off-diag adjacency,
                                     stacked over the K hops
    dsum_ref   : (NG, B*J, F)        sum_k coef_k * diag(adj_k)  (pre-folded)
    coef_ref   : (NG, K, B*J, F)     Lamda-cascade coefficients per hop
    bias_ref   : (NG, 1, F)
    gamma_ref  : (NG, 1, F)          BN weight (identity for the output gconv)
    beta_ref   : (NG, 1, F)          BN bias
    o_ref      : (B*J, F)
    """
    BJ, F = x_ref.shape
    NG = wc_ref.shape[0]
    K = coef_ref.shape[1]
    n_blocks = (NG - 2) // 2

    def gconv(h, g):
        # (1) fused feature matmul: [h @ W0 | h @ W1] -> one wide MXU push
        h01 = jnp.dot(h, wc_ref[g], preferred_element_type=jnp.float32)  # (BJ, 2F)
        h0 = h01[:, :F]
        h1 = h01[:, F:]
        # (2) ALL K hops x ALL batch elements in one matmul against the
        #     pre-packed block-diagonal off-diagonal adjacency
        wha_off = jnp.dot(adjoff_ref[g], h1,
                          preferred_element_type=jnp.float32)            # (K*BJ, F)
        # (3) diagonal term (adj*E @ h0) folded with the Lamda cascade into a
        #     single precomputed elementwise factor; K elementwise MACs on VPU
        out = dsum_ref[g] * h0
        cf = coef_ref[g]                                                  # (K, BJ, F)
        for k in range(K):                                                # static, unrolled
            out = out + cf[k] * wha_off[k * BJ:(k + 1) * BJ, :]
        return out + bias_ref[g]                                          # (1,F) broadcast

    def bn_relu(y, g):
        # BatchNorm1d training-mode batch stats over the B*J samples, one pass.
        inv_n = 1.0 / BJ
        mean = jnp.sum(y, axis=0, keepdims=True) * inv_n
        var = jnp.sum(y * y, axis=0, keepdims=True) * inv_n - mean * mean
        yn = (y - mean) * jax.lax.rsqrt(var + 1e-5)
        return jnp.maximum(yn * gamma_ref[g] + beta_ref[g], 0.0)

    h = x_ref[...]
    h = bn_relu(gconv(h, 0), 0)                      # gconv_input
    for blk in range(n_blocks):                      # _ResGraphConv blocks
        res = h
        g1, g2 = 1 + 2 * blk, 2 + 2 * blk
        h = bn_relu(gconv(h, g1), g1)
        h = bn_relu(gconv(h, g2), g2)
        h = res + h                                  # residual add (fused)
    o_ref[...] = gconv(h, NG - 1)                    # gconv_output (no BN/ReLU)


# ----------------------------------------------------------------------------
# pallas_call wrapper
# ----------------------------------------------------------------------------
def _full_spec(shape):
    n = len(shape)
    return pl.BlockSpec(shape, lambda i, n_=n: (0,) * n_)


def mmgcn_forward(x, packed, cout):
    """x: (B, J, Cin) -> (B, J, cout). Everything else is one fused kernel."""
    B, J, cin = x.shape
    fmax = packed["Wc"].shape[1]
    BJ = B * J
    # pad the tiny input feature dim up to the kernel's uniform lane width
    x2 = jnp.zeros((BJ, fmax), jnp.float32).at[:, :cin].set(
        x.reshape(BJ, cin).astype(jnp.float32))

    out = pl.pallas_call(
        mmgcn_kernel,
        out_shape=jax.ShapeDtypeStruct((BJ, fmax), jnp.float32),
        grid=(1,),   # whole problem is ~0.4 MiB -> single VMEM-resident step
        in_specs=[
            _full_spec((BJ, fmax)),
            _full_spec(packed["Wc"].shape),
            _full_spec(packed["adj_off"].shape),
            _full_spec(packed["dsum"].shape),
            _full_spec(packed["coef"].shape),
            _full_spec(packed["bias"].shape),
            _full_spec(packed["gamma"].shape),
            _full_spec(packed["beta"].shape),
        ],
        out_specs=_full_spec((BJ, fmax)),
        compiler_params=pltpu.CompilerParams(dimension_semantics=("arbitrary",)),
    )(x2, packed["Wc"], packed["adj_off"], packed["dsum"], packed["coef"],
      packed["bias"], packed["gamma"], packed["beta"])
    return out.reshape(B, J, fmax)[:, :, :cout]


# ----------------------------------------------------------------------------
# Parameter construction (deterministic synthetic, faithful to torch inits)
# ----------------------------------------------------------------------------
def make_gconv_params(key, fin, fout, J, with_bn):
    k_w, k_b = jax.random.split(key)
    # xavier_uniform(gain=1.414) on a (2, fin, fout) tensor
    fan_in = fin * fout
    fan_out = 2 * fout
    bound = 1.414 * math.sqrt(6.0 / (fan_in + fan_out))
    W = jax.random.uniform(k_w, (2, fin, fout), jnp.float32, -bound, bound)
    lam = jnp.ones((K_HOPS, J, fout), jnp.float32)            # Lamda_i init = 1
    adj_sub = jnp.full((K_HOPS, J, J), 1e-6, jnp.float32)     # affinity modulation
    stdv = 1.0 / math.sqrt(fout)
    bias = jax.random.uniform(k_b, (1, fout), jnp.float32, -stdv, stdv)
    p = dict(W=W, lam=lam, adj_sub=adj_sub, bias=bias)
    if with_bn:
        p["gamma"] = jnp.ones((1, fout), jnp.float32)
        p["beta"] = jnp.zeros((1, fout), jnp.float32)
    return p


def pack_params(params, adj_raw, B, J, fmax):
    """Precompute kernel-ready stacked parameters (pure function of params)."""
    gconvs = [params["input"]]
    for p1, p2 in params["layers"]:
        gconvs += [p1, p2]
    gconvs.append(params["output"])

    eye_j = jnp.eye(J, dtype=jnp.float32)
    eye_b = jnp.eye(B, dtype=jnp.float32)

    Wc_l, off_l, dsum_l, coef_l, bias_l, gamma_l, beta_l = ([] for _ in range(7))
    for p in gconvs:
        fin, fout = p["W"].shape[1], p["W"].shape[2]
        # [W0 | W1], zero-padded to (fmax, 2*fmax)
        Wc = jnp.zeros((fmax, 2 * fmax), jnp.float32)
        Wc = Wc.at[:fin, :fout].set(p["W"][0]).at[:fin, fmax:fmax + fout].set(p["W"][1])

        # symmetrized + modulated adjacencies (per hop)
        A = adj_raw + p["adj_sub"]
        A = 0.5 * (jnp.swapaxes(A, -1, -2) + A)                    # (K, J, J)
        diag = jnp.diagonal(A, axis1=-2, axis2=-1)                 # (K, J)
        A_off = A * (1.0 - eye_j)                                  # zero diagonal
        # block-diagonal over batch, stacked over hops -> (K*B*J, B*J)
        off_bd = jnp.einsum("kij,bc->kbicj", A_off, eye_b).reshape(
            K_HOPS * B * J, B * J)

        # Lamda cascade coefficients: coef_k = prod_{j<k}(1 - Lamda_j) * Lamda_k
        prefix = jnp.ones((J, fout), jnp.float32)
        coefs = []
        for k in range(K_HOPS):
            coefs.append(prefix * p["lam"][k])
            prefix = prefix * (1.0 - p["lam"][k])
        coef = jnp.zeros((K_HOPS, J, fmax), jnp.float32).at[:, :, :fout].set(
            jnp.stack(coefs))
        coef_b = jnp.tile(coef[:, None], (1, B, 1, 1)).reshape(K_HOPS, B * J, fmax)
        diag_b = jnp.tile(diag[:, None], (1, B, 1)).reshape(K_HOPS, B * J)
        dsum = jnp.sum(coef_b * diag_b[:, :, None], axis=0)        # (B*J, fmax)

        bias = jnp.zeros((1, fmax), jnp.float32).at[:, :fout].set(p["bias"])
        gamma = jnp.ones((1, fmax), jnp.float32)
        beta = jnp.zeros((1, fmax), jnp.float32)
        if "gamma" in p:
            gamma = gamma.at[:, :fout].set(p["gamma"])
            beta = beta.at[:, :fout].set(p["beta"])

        Wc_l.append(Wc); off_l.append(off_bd); dsum_l.append(dsum)
        coef_l.append(coef_b); bias_l.append(bias)
        gamma_l.append(gamma); beta_l.append(beta)

    return dict(
        Wc=jnp.stack(Wc_l), adj_off=jnp.stack(off_l), dsum=jnp.stack(dsum_l),
        coef=jnp.stack(coef_l), bias=jnp.stack(bias_l),
        gamma=jnp.stack(gamma_l), beta=jnp.stack(beta_l))


# ----------------------------------------------------------------------------
# Pure-JAX reference (mirrors the PyTorch forward), for validation
# ----------------------------------------------------------------------------
def _sym(adj_raw, adj_sub):
    A = adj_raw + adj_sub
    return 0.5 * (jnp.swapaxes(A, -1, -2) + A)


def _gconv_ref(x, p, adj_raw):
    adjs = _sym(adj_raw, p["adj_sub"])
    J = adjs.shape[-1]
    h0 = jnp.einsum("bjf,fo->bjo", x, p["W"][0])
    h1 = jnp.einsum("bjf,fo->bjo", x, p["W"][1])
    eye = jnp.eye(J, dtype=jnp.float32)
    out = jnp.zeros_like(h0)
    prefix = jnp.ones_like(p["lam"][0])
    for k in range(adjs.shape[0]):
        wha = (jnp.einsum("ij,bjo->bio", adjs[k] * eye, h0)
               + jnp.einsum("ij,bjo->bio", adjs[k] * (1.0 - eye), h1))
        out = out + prefix[None] * (p["lam"][k][None] * wha)
        prefix = prefix * (1.0 - p["lam"][k])
    return out + p["bias"][None]


def _bn_relu_ref(x, p):
    B, J, F = x.shape
    x2 = x.reshape(B * J, F)
    mean = x2.mean(axis=0)
    var = ((x2 - mean) ** 2).mean(axis=0)
    y = (x2 - mean) * jax.lax.rsqrt(var + 1e-5)
    y = y * p["gamma"].reshape(-1) + p["beta"].reshape(-1)
    return jnp.maximum(y, 0.0).reshape(B, J, F)


def mmgcn_ref(x, params, adj_raw):
    def block(h, p):
        return _bn_relu_ref(_gconv_ref(h, p, adj_raw), p)
    out = block(x, params["input"])
    for p1, p2 in params["layers"]:
        res = out
        out = block(block(out, p1), p2)
        out = res + out
    return _gconv_ref(out, params["output"], adj_raw)


# ----------------------------------------------------------------------------
if __name__ == "__main__":
    B, J = 2, 16
    hid_dim = 32
    coords_dim = (2, 3)
    num_layers = 4

    key = jax.random.PRNGKey(0)
    keys = jax.random.split(key, 2 + 2 * num_layers + 2)

    adj_raw = jax.random.uniform(keys[0], (K_HOPS, J, J), jnp.float32, 0.0, 1.0)
    params = {
        "input": make_gconv_params(keys[1], coords_dim[0], hid_dim, J, with_bn=True),
        "layers": [
            (make_gconv_params(keys[2 + 2 * i], hid_dim, hid_dim, J, with_bn=True),
             make_gconv_params(keys[3 + 2 * i], hid_dim, hid_dim, J, with_bn=True))
            for i in range(num_layers)
        ],
        "output": make_gconv_params(keys[2 + 2 * num_layers], hid_dim,
                                    coords_dim[1], J, with_bn=False),
    }
    x = jax.random.normal(keys[3 + 2 * num_layers], (B, J, coords_dim[0]), jnp.float32)

    # Pack once outside the per-forward path (pure function of the parameters).
    packed = pack_params(params, adj_raw, B, J, hid_dim)

    fwd = jax.jit(functools.partial(mmgcn_forward, packed=packed, cout=coords_dim[1]))
    out = jax.block_until_ready(fwd(x))

    # correctness checks against the pure-JAX reference
    ref = jax.block_until_ready(mmgcn_ref(x, params, adj_raw))
    assert out.shape == (B, J, coords_dim[1]), out.shape
    assert bool(jnp.all(jnp.isfinite(out)))
    scale = float(jnp.max(jnp.abs(ref))) + 1e-6
    rel_err = float(jnp.max(jnp.abs(out - ref))) / scale
    assert rel_err < 5e-2, f"relative error vs reference too large: {rel_err}"

    print("KERNEL_OK")
</pallas_src>

<mosaic_0001>
module attributes {stable_mosaic.version = 11 : i64} {
  func.func @mmgcn_kernel(%arg0: i32, %arg1: memref<32x32xf32, #tpu.memory_space<vmem>>, %arg2: memref<10x32x64xf32, #tpu.memory_space<vmem>>, %arg3: memref<10x96x32xf32, #tpu.memory_space<vmem>>, %arg4: memref<10x32x32xf32, #tpu.memory_space<vmem>>, %arg5: memref<10x3x32x32xf32, #tpu.memory_space<vmem>>, %arg6: memref<10x1x32xf32, #tpu.memory_space<vmem>>, %arg7: memref<10x1x32xf32, #tpu.memory_space<vmem>>, %arg8: memref<10x1x32xf32, #tpu.memory_space<vmem>>, %arg9: memref<32x32xf32, #tpu.memory_space<vmem>>) attributes {dimension_semantics = [#tpu.dimension_semantics<arbitrary>], iteration_bounds = array<i64: 1>, scalar_prefetch = 0 : i64, scratch_operands = 0 : i64, tpu.core_type = #tpu.core_type<tc>, window_params = [{pipeline_mode = #tpu.pipeline_mode<synchronous>, transform_indices = @transform_0, window_bounds = array<i64: 32, 32>}, {pipeline_mode = #tpu.pipeline_mode<synchronous>, transform_indices = @transform_1, window_bounds = array<i64: 10, 32, 64>}, {pipeline_mode = #tpu.pipeline_mode<synchronous>, transform_indices = @transform_2, window_bounds = array<i64: 10, 96, 32>}, {pipeline_mode = #tpu.pipeline_mode<synchronous>, transform_indices = @transform_3, window_bounds = array<i64: 10, 32, 32>}, {pipeline_mode = #tpu.pipeline_mode<synchronous>, transform_indices = @transform_4, window_bounds = array<i64: 10, 3, 32, 32>}, {pipeline_mode = #tpu.pipeline_mode<synchronous>, transform_indices = @transform_5, window_bounds = array<i64: 10, 1, 32>}, {pipeline_mode = #tpu.pipeline_mode<synchronous>, transform_indices = @transform_6, window_bounds = array<i64: 10, 1, 32>}, {pipeline_mode = #tpu.pipeline_mode<synchronous>, transform_indices = @transform_7, window_bounds = array<i64: 10, 1, 32>}, {pipeline_mode = #tpu.pipeline_mode<synchronous>, transform_indices = @transform_8, window_bounds = array<i64: 32, 32>}]} {
    %c0 = arith.constant 0 : index
    %c0_0 = arith.constant 0 : index
    %0 = vector.load %arg1[%c0, %c0_0] : memref<32x32xf32, #tpu.memory_space<vmem>>, vector<32x32xf32>
    %c0_1 = arith.constant 0 : index
    %c0_2 = arith.constant 0 : index
    %c0_3 = arith.constant 0 : index
    %1 = vector.load %arg2[%c0_1, %c0_2, %c0_3] : memref<10x32x64xf32, #tpu.memory_space<vmem>>, vector<1x32x64xf32>
    %2 = vector.shape_cast %1 : vector<1x32x64xf32> to vector<32x64xf32>
    %cst = arith.constant dense<0.000000e+00> : vector<32x64xf32>
    %3 = tpu.matmul %0, %2, %cst {dimension_numbers = #tpu.dot_dimension_numbers<[1], [0], [0], [1], [0, 0, 1, 1], [], []>} : vector<32x32xf32>, vector<32x64xf32>, vector<32x64xf32> -> vector<32x64xf32>
    %4 = vector.extract_strided_slice %3 {offsets = [0, 0], sizes = [32, 32], strides = [1, 1]} : vector<32x64xf32> to vector<32x32xf32>
    %5 = vector.extract_strided_slice %3 {offsets = [0, 32], sizes = [32, 32], strides = [1, 1]} : vector<32x64xf32> to vector<32x32xf32>
    %c0_4 = arith.constant 0 : index
    %c0_5 = arith.constant 0 : index
    %c0_6 = arith.constant 0 : index
    %6 = vector.load %arg3[%c0_4, %c0_5, %c0_6] : memref<10x96x32xf32, #tpu.memory_space<vmem>>, vector<1x96x32xf32>
    %7 = vector.shape_cast %6 : vector<1x96x32xf32> to vector<96x32xf32>
    %cst_7 = arith.constant dense<0.000000e+00> : vector<96x32xf32>
    %8 = tpu.matmul %7, %5, %cst_7 {dimension_numbers = #tpu.dot_dimension_numbers<[1], [0], [0], [1], [0, 0, 1, 1], [], []>} : vector<96x32xf32>, vector<32x32xf32>, vector<96x32xf32> -> vector<96x32xf32>
    %c0_8 = arith.constant 0 : index
    %c0_9 = arith.constant 0 : index
    %c0_10 = arith.constant 0 : index
    %9 = vector.load %arg4[%c0_8, %c0_9, %c0_10] : memref<10x32x32xf32, #tpu.memory_space<vmem>>, vector<1x32x32xf32>
    %10 = vector.shape_cast %9 : vector<1x32x32xf32> to vector<32x32xf32>
    %11 = arith.mulf %10, %4 : vector<32x32xf32>
    %c0_11 = arith.constant 0 : index
    %c0_12 = arith.constant 0 : index
    %c0_13 = arith.constant 0 : index
    %c0_14 = arith.constant 0 : index
    %12 = vector.load %arg5[%c0_11, %c0_12, %c0_13, %c0_14] : memref<10x3x32x32xf32, #tpu.memory_space<vmem>>, vector<1x3x32x32xf32>
    %13 = vector.shape_cast %12 : vector<1x3x32x32xf32> to vector<3x32x32xf32>
    %14 = vector.extract_strided_slice %13 {offsets = [0, 0, 0], sizes = [1, 32, 32], strides = [1, 1, 1]} : vector<3x32x32xf32> to vector<1x32x32xf32>
    %15 = vector.shape_cast %14 : vector<1x32x32xf32> to vector<32x32xf32>
    %16 = vector.extract_strided_slice %8 {offsets = [0, 0], sizes = [32, 32], strides = [1, 1]} : vector<96x32xf32> to vector<32x32xf32>
    %17 = arith.mulf %15, %16 : vector<32x32xf32>
    %18 = arith.addf %11, %17 : vector<32x32xf32>
    %19 = vector.extract_strided_slice %13 {offsets = [1, 0, 0], sizes = [1, 32, 32], strides = [1, 1, 1]} : vector<3x32x32xf32> to vector<1x32x32xf32>
    %20 = vector.shape_cast %19 : vector<1x32x32xf32> to vector<32x32xf32>
    %21 = vector.extract_strided_slice %8 {offsets = [32, 0], sizes = [32, 32], strides = [1, 1]} : vector<96x32xf32> to vector<32x32xf32>
    %22 = arith.mulf %20, %21 : vector<32x32xf32>
    %23 = arith.addf %18, %22 : vector<32x32xf32>
    %24 = vector.extract_strided_slice %13 {offsets = [2, 0, 0], sizes = [1, 32, 32], strides = [1, 1, 1]} : vector<3x32x32xf32> to vector<1x32x32xf32>
    %25 = vector.shape_cast %24 : vector<1x32x32xf32> to vector<32x32xf32>
    %26 = vector.extract_strided_slice %8 {offsets = [64, 0], sizes = [32, 32], strides = [1, 1]} : vector<96x32xf32> to vector<32x32xf32>
    %27 = arith.mulf %25, %26 : vector<32x32xf32>
    %28 = arith.addf %23, %27 : vector<32x32xf32>
    %c0_15 = arith.constant 0 : index
    %c0_16 = arith.constant 0 : index
    %c0_17 = arith.constant 0 : index
    %29 = vector.load %arg6[%c0_15, %c0_16, %c0_17] : memref<10x1x32xf32, #tpu.memory_space<vmem>>, vector<1x1x32xf32>
    %30 = vector.shape_cast %29 : vector<1x1x32xf32> to vector<1x32xf32>
    %31 = vector.broadcast %30 : vector<1x32xf32> to vector<32x32xf32>
    %32 = arith.addf %28, %31 : vector<32x32xf32>
    %cst_18 = arith.constant dense<0.000000e+00> : vector<32xf32>
    %33 = vector.multi_reduction <add>, %32, %cst_18 [0] : vector<32x32xf32> to vector<32xf32>
    %34 = vector.shape_cast %33 : vector<32xf32> to vector<1x32xf32>
    %cst_19 = arith.constant 3.125000e-02 : f32
    %35 = vector.broadcast %cst_19 : f32 to vector<1x32xf32>
    %36 = arith.mulf %34, %35 : vector<1x32xf32>
    %37 = arith.mulf %32, %32 : vector<32x32xf32>
    %cst_20 = arith.constant dense<0.000000e+00> : vector<32xf32>
    %38 = vector.multi_reduction <add>, %37, %cst_20 [0] : vector<32x32xf32> to vector<32xf32>
    %39 = vector.shape_cast %38 : vector<32xf32> to vector<1x32xf32>
    %cst_21 = arith.constant 3.125000e-02 : f32
    %40 = vector.broadcast %cst_21 : f32 to vector<1x32xf32>
    %41 = arith.mulf %39, %40 : vector<1x32xf32>
    %42 = arith.mulf %36, %36 : vector<1x32xf32>
    %43 = arith.subf %41, %42 : vector<1x32xf32>
    %44 = vector.broadcast %36 : vector<1x32xf32> to vector<32x32xf32>
    %45 = arith.subf %32, %44 : vector<32x32xf32>
    %cst_22 = arith.constant 9.99999974E-6 : f32
    %46 = vector.broadcast %cst_22 : f32 to vector<1x32xf32>
    %47 = arith.addf %43, %46 : vector<1x32xf32>
    %48 = math.rsqrt %47 : vector<1x32xf32>
    %49 = vector.broadcast %48 : vector<1x32xf32> to vector<32x32xf32>
    %50 = arith.mulf %45, %49 : vector<32x32xf32>
    %c0_23 = arith.constant 0 : index
    %c0_24 = arith.constant 0 : index
    %c0_25 = arith.constant 0 : index
    %51 = vector.load %arg7[%c0_23, %c0_24, %c0_25] : memref<10x1x32xf32, #tpu.memory_space<vmem>>, vector<1x1x32xf32>
    %52 = vector.shape_cast %51 : vector<1x1x32xf32> to vector<1x32xf32>
    %53 = vector.broadcast %52 : vector<1x32xf32> to vector<32x32xf32>
    %54 = arith.mulf %50, %53 : vector<32x32xf32>
    %c0_26 = arith.constant 0 : index
    %c0_27 = arith.constant 0 : index
    %c0_28 = arith.constant 0 : index
    %55 = vector.load %arg8[%c0_26, %c0_27, %c0_28] : memref<10x1x32xf32, #tpu.memory_space<vmem>>, vector<1x1x32xf32>
    %56 = vector.shape_cast %55 : vector<1x1x32xf32> to vector<1x32xf32>
    %57 = vector.broadcast %56 : vector<1x32xf32> to vector<32x32xf32>
    %58 = arith.addf %54, %57 : vector<32x32xf32>
    %cst_29 = arith.constant 0.000000e+00 : f32
    %59 = vector.broadcast %cst_29 : f32 to vector<32x32xf32>
    %60 = arith.maximumf %58, %59 : vector<32x32xf32>
    %c1 = arith.constant 1 : index
    %c0_30 = arith.constant 0 : index
    %c0_31 = arith.constant 0 : index
    %61 = vector.load %arg2[%c1, %c0_30, %c0_31] : memref<10x32x64xf32, #tpu.memory_space<vmem>>, vector<1x32x64xf32>
    %62 = vector.shape_cast %61 : vector<1x32x64xf32> to vector<32x64xf32>
    %cst_32 = arith.constant dense<0.000000e+00> : vector<32x64xf32>
    %63 = tpu.matmul %60, %62, %cst_32 {dimension_numbers = #tpu.dot_dimension_numbers<[1], [0], [0], [1], [0, 0, 1, 1], [], []>} : vector<32x32xf32>, vector<32x64xf32>, vector<32x64xf32> -> vector<32x64xf32>
    %64 = vector.extract_strided_slice %63 {offsets = [0, 0], sizes = [32, 32], strides = [1, 1]} : vector<32x64xf32> to vector<32x32xf32>
    %65 = vector.extract_strided_slice %63 {offsets = [0, 32], sizes = [32, 32], strides = [1, 1]} : vector<32x64xf32> to vector<32x32xf32>
    %c1_33 = arith.constant 1 : index
    %c0_34 = arith.constant 0 : index
    %c0_35 = arith.constant 0 : index
    %66 = vector.load %arg3[%c1_33, %c0_34, %c0_35] : memref<10x96x32xf32, #tpu.memory_space<vmem>>, vector<1x96x32xf32>
    %67 = vector.shape_cast %66 : vector<1x96x32xf32> to vector<96x32xf32>
    %cst_36 = arith.constant dense<0.000000e+00> : vector<96x32xf32>
    %68 = tpu.matmul %67, %65, %cst_36 {dimension_numbers = #tpu.dot_dimension_numbers<[1], [0], [0], [1], [0, 0, 1, 1], [], []>} : vector<96x32xf32>, vector<32x32xf32>, vector<96x32xf32> -> vector<96x32xf32>
    %c1_37 = arith.constant 1 : index
    %c0_38 = arith.constant 0 : index
    %c0_39 = arith.constant 0 : index
    %69 = vector.load %arg4[%c1_37, %c0_38, %c0_39] : memref<10x32x32xf32, #tpu.memory_space<vmem>>, vector<1x32x32xf32>
    %70 = vector.shape_cast %69 : vector<1x32x32xf32> to vector<32x32xf32>
    %71 = arith.mulf %70, %64 : vector<32x32xf32>
    %c1_40 = arith.constant 1 : index
    %c0_41 = arith.constant 0 : index
    %c0_42 = arith.constant 0 : index
    %c0_43 = arith.constant 0 : index
    %72 = vector.load %arg5[%c1_40, %c0_41, %c0_42, %c0_43] : memref<10x3x32x32xf32, #tpu.memory_space<vmem>>, vector<1x3x32x32xf32>
    %73 = vector.shape_cast %72 : vector<1x3x32x32xf32> to vector<3x32x32xf32>
    %74 = vector.extract_strided_slice %73 {offsets = [0, 0, 0], sizes = [1, 32, 32], strides = [1, 1, 1]} : vector<3x32x32xf32> to vector<1x32x32xf32>
    %75 = vector.shape_cast %74 : vector<1x32x32xf32> to vector<32x32xf32>
    %76 = vector.extract_strided_slice %68 {offsets = [0, 0], sizes = [32, 32], strides = [1, 1]} : vector<96x32xf32> to vector<32x32xf32>
    %77 = arith.mulf %75, %76 : vector<32x32xf32>
    %78 = arith.addf %71, %77 : vector<32x32xf32>
    %79 = vector.extract_strided_slice %73 {offsets = [1, 0, 0], sizes = [1, 32, 32], strides = [1, 1, 1]} : vector<3x32x32xf32> to vector<1x32x32xf32>
    %80 = vector.shape_cast %79 : vector<1x32x32xf32> to vector<32x32xf32>
    %81 = vector.extract_strided_slice %68 {offsets = [32, 0], sizes = [32, 32], strides = [1, 1]} : vector<96x32xf32> to vector<32x32xf32>
    %82 = arith.mulf %80, %81 : vector<32x32xf32>
    %83 = arith.addf %78, %82 : vector<32x32xf32>
    %84 = vector.extract_strided_slice %73 {offsets = [2, 0, 0], sizes = [1, 32, 32], strides = [1, 1, 1]} : vector<3x32x32xf32> to vector<1x32x32xf32>
    %85 = vector.shape_cast %84 : vector<1x32x32xf32> to vector<32x32xf32>
    %86 = vector.extract_strided_slice %68 {offsets = [64, 0], sizes = [32, 32], strides = [1, 1]} : vector<96x32xf32> to vector<32x32xf32>
    %87 = arith.mulf %85, %86 : vector<32x32xf32>
    %88 = arith.addf %83, %87 : vector<32x32xf32>
    %c1_44 = arith.constant 1 : index
    %c0_45 = arith.constant 0 : index
    %c0_46 = arith.constant 0 : index
    %89 = vector.load %arg6[%c1_44, %c0_45, %c0_46] : memref<10x1x32xf32, #tpu.memory_space<vmem>>, vector<1x1x32xf32>
    %90 = vector.shape_cast %89 : vector<1x1x32xf32> to vector<1x32xf32>
    %91 = vector.broadcast %90 : vector<1x32xf32> to vector<32x32xf32>
    %92 = arith.addf %88, %91 : vector<32x32xf32>
    %cst_47 = arith.constant dense<0.000000e+00> : vector<32xf32>
    %93 = vector.multi_reduction <add>, %92, %cst_47 [0] : vector<32x32xf32> to vector<32xf32>
    %94 = vector.shape_cast %93 : vector<32xf32> to vector<1x32xf32>
    %cst_48 = arith.constant 3.125000e-02 : f32
    %95 = vector.broadcast %cst_48 : f32 to vector<1x32xf32>
    %96 = arith.mulf %94, %95 : vector<1x32xf32>
    %97 = arith.mulf %92, %92 : vector<32x32xf32>
    %cst_49 = arith.constant dense<0.000000e+00> : vector<32xf32>
    %98 = vector.multi_reduction <add>, %97, %cst_49 [0] : vector<32x32xf32> to vector<32xf32>
    %99 = vector.shape_cast %98 : vector<32xf32> to vector<1x32xf32>
    %cst_50 = arith.constant 3.125000e-02 : f32
    %100 = vector.broadcast %cst_50 : f32 to vector<1x32xf32>
    %101 = arith.mulf %99, %100 : vector<1x32xf32>
    %102 = arith.mulf %96, %96 : vector<1x32xf32>
    %103 = arith.subf %101, %102 : vector<1x32xf32>
    %104 = vector.broadcast %96 : vector<1x32xf32> to vector<32x32xf32>
    %105 = arith.subf %92, %104 : vector<32x32xf32>
    %cst_51 = arith.constant 9.99999974E-6 : f32
    %106 = vector.broadcast %cst_51 : f32 to vector<1x32xf32>
    %107 = arith.addf %103, %106 : vector<1x32xf32>
    %108 = math.rsqrt %107 : vector<1x32xf32>
    %109 = vector.broadcast %108 : vector<1x32xf32> to vector<32x32xf32>
    %110 = arith.mulf %105, %109 : vector<32x32xf32>
    %c1_52 = arith.constant 1 : index
    %c0_53 = arith.constant 0 : index
    %c0_54 = arith.constant 0 : index
    %111 = vector.load %arg7[%c1_52, %c0_53, %c0_54] : memref<10x1x32xf32, #tpu.memory_space<vmem>>, vector<1x1x32xf32>
    %112 = vector.shape_cast %111 : vector<1x1x32xf32> to vector<1x32xf32>
    %113 = vector.broadcast %112 : vector<1x32xf32> to vector<32x32xf32>
    %114 = arith.mulf %110, %113 : vector<32x32xf32>
    %c1_55 = arith.constant 1 : index
    %c0_56 = arith.constant 0 : index
    %c0_57 = arith.constant 0 : index
    %115 = vector.load %arg8[%c1_55, %c0_56, %c0_57] : memref<10x1x32xf32, #tpu.memory_space<vmem>>, vector<1x1x32xf32>
    %116 = vector.shape_cast %115 : vector<1x1x32xf32> to vector<1x32xf32>
    %117 = vector.broadcast %116 : vector<1x32xf32> to vector<32x32xf32>
    %118 = arith.addf %114, %117 : vector<32x32xf32>
    %cst_58 = arith.constant 0.000000e+00 : f32
    %119 = vector.broadcast %cst_58 : f32 to vector<32x32xf32>
    %120 = arith.maximumf %118, %119 : vector<32x32xf32>
    %c2 = arith.constant 2 : index
    %c0_59 = arith.constant 0 : index
    %c0_60 = arith.constant 0 : index
    %121 = vector.load %arg2[%c2, %c0_59, %c0_60] : memref<10x32x64xf32, #tpu.memory_space<vmem>>, vector<1x32x64xf32>
    %122 = vector.shape_cast %121 : vector<1x32x64xf32> to vector<32x64xf32>
    %cst_61 = arith.constant dense<0.000000e+00> : vector<32x64xf32>
    %123 = tpu.matmul %120, %122, %cst_61 {dimension_numbers = #tpu.dot_dimension_numbers<[1], [0], [0], [1], [0, 0, 1, 1], [], []>} : vector<32x32xf32>, vector<32x64xf32>, vector<32x64xf32> -> vector<32x64xf32>
    %124 = vector.extract_strided_slice %123 {offsets = [0, 0], sizes = [32, 32], strides = [1, 1]} : vector<32x64xf32> to vector<32x32xf32>
    %125 = vector.extract_strided_slice %123 {offsets = [0, 32], sizes = [32, 32], strides = [1, 1]} : vector<32x64xf32> to vector<32x32xf32>
    %c2_62 = arith.constant 2 : index
    %c0_63 = arith.constant 0 : index
    %c0_64 = arith.constant 0 : index
    %126 = vector.load %arg3[%c2_62, %c0_63, %c0_64] : memref<10x96x32xf32, #tpu.memory_space<vmem>>, vector<1x96x32xf32>
    %127 = vector.shape_cast %126 : vector<1x96x32xf32> to vector<96x32xf32>
    %cst_65 = arith.constant dense<0.000000e+00> : vector<96x32xf32>
    %128 = tpu.matmul %127, %125, %cst_65 {dimension_numbers = #tpu.dot_dimension_numbers<[1], [0], [0], [1], [0, 0, 1, 1], [], []>} : vector<96x32xf32>, vector<32x32xf32>, vector<96x32xf32> -> vector<96x32xf32>
    %c2_66 = arith.constant 2 : index
    %c0_67 = arith.constant 0 : index
    %c0_68 = arith.constant 0 : index
    %129 = vector.load %arg4[%c2_66, %c0_67, %c0_68] : memref<10x32x32xf32, #tpu.memory_space<vmem>>, vector<1x32x32xf32>
    %130 = vector.shape_cast %129 : vector<1x32x32xf32> to vector<32x32xf32>
    %131 = arith.mulf %130, %124 : vector<32x32xf32>
    %c2_69 = arith.constant 2 : index
    %c0_70 = arith.constant 0 : index
    %c0_71 = arith.constant 0 : index
    %c0_72 = arith.constant 0 : index
    %132 = vector.load %arg5[%c2_69, %c0_70, %c0_71, %c0_72] : memref<10x3x32x32xf32, #tpu.memory_space<vmem>>, vector<1x3x32x32xf32>
    %133 = vector.shape_cast %132 : vector<1x3x32x32xf32> to vector<3x32x32xf32>
    %134 = vector.extract_strided_slice %133 {offsets = [0, 0, 0], sizes = [1, 32, 32], strides = [1, 1, 1]} : vector<3x32x32xf32> to vector<1x32x32xf32>
    %135 = vector.shape_cast %134 : vector<1x32x32xf32> to vector<32x32xf32>
    %136 = vector.extract_strided_slice %128 {offsets = [0, 0], sizes = [32, 32], strides = [1, 1]} : vector<96x32xf32> to vector<32x32xf32>
    %137 = arith.mulf %135, %136 : vector<32x32xf32>
    %138 = arith.addf %131, %137 : vector<32x32xf32>
    %139 = vector.extract_strided_slice %133 {offsets = [1, 0, 0], sizes = [1, 32, 32], strides = [1, 1, 1]} : vector<3x32x32xf32> to vector<1x32x32xf32>
    %140 = vector.shape_cast %139 : vector<1x32x32xf32> to vector<32x32xf32>
    %141 = vector.extract_strided_slice %128 {offsets = [32, 0], sizes = [32, 32], strides = [1, 1]} : vector<96x32xf32> to vector<32x32xf32>
    %142 = arith.mulf %140, %141 : vector<32x32xf32>
    %143 = arith.addf %138, %142 : vector<32x32xf32>
    %144 = vector.extract_strided_slice %133 {offsets = [2, 0, 0], sizes = [1, 32, 32], strides = [1, 1, 1]} : vector<3x32x32xf32> to vector<1x32x32xf32>
    %145 = vector.shape_cast %144 : vector<1x32x32xf32> to vector<32x32xf32>
    %146 = vector.extract_strided_slice %128 {offsets = [64, 0], sizes = [32, 32], strides = [1, 1]} : vector<96x32xf32> to vector<32x32xf32>
    %147 = arith.mulf %145, %146 : vector<32x32xf32>
    %148 = arith.addf %143, %147 : vector<32x32xf32>
    %c2_73 = arith.constant 2 : index
    %c0_74 = arith.constant 0 : index
    %c0_75 = arith.constant 0 : index
    %149 = vector.load %arg6[%c2_73, %c0_74, %c0_75] : memref<10x1x32xf32, #tpu.memory_space<vmem>>, vector<1x1x32xf32>
    %150 = vector.shape_cast %149 : vector<1x1x32xf32> to vector<1x32xf32>
    %151 = vector.broadcast %150 : vector<1x32xf32> to vector<32x32xf32>
    %152 = arith.addf %148, %151 : vector<32x32xf32>
    %cst_76 = arith.constant dense<0.000000e+00> : vector<32xf32>
    %153 = vector.multi_reduction <add>, %152, %cst_76 [0] : vector<32x32xf32> to vector<32xf32>
    %154 = vector.shape_cast %153 : vector<32xf32> to vector<1x32xf32>
    %cst_77 = arith.constant 3.125000e-02 : f32
    %155 = vector.broadcast %cst_77 : f32 to vector<1x32xf32>
    %156 = arith.mulf %154, %155 : vector<1x32xf32>
    %157 = arith.mulf %152, %152 : vector<32x32xf32>
    %cst_78 = arith.constant dense<0.000000e+00> : vector<32xf32>
    %158 = vector.multi_reduction <add>, %157, %cst_78 [0] : vector<32x32xf32> to vector<32xf32>
    %159 = vector.shape_cast %158 : vector<32xf32> to vector<1x32xf32>
    %cst_79 = arith.constant 3.125000e-02 : f32
    %160 = vector.broadcast %cst_79 : f32 to vector<1x32xf32>
    %161 = arith.mulf %159, %160 : vector<1x32xf32>
    %162 = arith.mulf %156, %156 : vector<1x32xf32>
    %163 = arith.subf %161, %162 : vector<1x32xf32>
    %164 = vector.broadcast %156 : vector<1x32xf32> to vector<32x32xf32>
    %165 = arith.subf %152, %164 : vector<32x32xf32>
    %cst_80 = arith.constant 9.99999974E-6 : f32
    %166 = vector.broadcast %cst_80 : f32 to vector<1x32xf32>
    %167 = arith.addf %163, %166 : vector<1x32xf32>
    %168 = math.rsqrt %167 : vector<1x32xf32>
    %169 = vector.broadcast %168 : vector<1x32xf32> to vector<32x32xf32>
    %170 = arith.mulf %165, %169 : vector<32x32xf32>
    %c2_81 = arith.constant 2 : index
    %c0_82 = arith.constant 0 : index
    %c0_83 = arith.constant 0 : index
    %171 = vector.load %arg7[%c2_81, %c0_82, %c0_83] : memref<10x1x32xf32, #tpu.memory_space<vmem>>, vector<1x1x32xf32>
    %172 = vector.shape_cast %171 : vector<1x1x32xf32> to vector<1x32xf32>
    %173 = vector.broadcast %172 : vector<1x32xf32> to vector<32x32xf32>
    %174 = arith.mulf %170, %173 : vector<32x32xf32>
    %c2_84 = arith.constant 2 : index
    %c0_85 = arith.constant 0 : index
    %c0_86 = arith.constant 0 : index
    %175 = vector.load %arg8[%c2_84, %c0_85, %c0_86] : memref<10x1x32xf32, #tpu.memory_space<vmem>>, vector<1x1x32xf32>
    %176 = vector.shape_cast %175 : vector<1x1x32xf32> to vector<1x32xf32>
    %177 = vector.broadcast %176 : vector<1x32xf32> to vector<32x32xf32>
    %178 = arith.addf %174, %177 : vector<32x32xf32>
    %cst_87 = arith.constant 0.000000e+00 : f32
    %179 = vector.broadcast %cst_87 : f32 to vector<32x32xf32>
    %180 = arith.maximumf %178, %179 : vector<32x32xf32>
    %181 = arith.addf %60, %180 : vector<32x32xf32>
    %c3 = arith.constant 3 : index
    %c0_88 = arith.constant 0 : index
    %c0_89 = arith.constant 0 : index
    %182 = vector.load %arg2[%c3, %c0_88, %c0_89] : memref<10x32x64xf32, #tpu.memory_space<vmem>>, vector<1x32x64xf32>
    %183 = vector.shape_cast %182 : vector<1x32x64xf32> to vector<32x64xf32>
    %cst_90 = arith.constant dense<0.000000e+00> : vector<32x64xf32>
    %184 = tpu.matmul %181, %183, %cst_90 {dimension_numbers = #tpu.dot_dimension_numbers<[1], [0], [0], [1], [0, 0, 1, 1], [], []>} : vector<32x32xf32>, vector<32x64xf32>, vector<32x64xf32> -> vector<32x64xf32>
    %185 = vector.extract_strided_slice %184 {offsets = [0, 0], sizes = [32, 32], strides = [1, 1]} : vector<32x64xf32> to vector<32x32xf32>
    %186 = vector.extract_strided_slice %184 {offsets = [0, 32], sizes = [32, 32], strides = [1, 1]} : vector<32x64xf32> to vector<32x32xf32>
    %c3_91 = arith.constant 3 : index
    %c0_92 = arith.constant 0 : index
    %c0_93 = arith.constant 0 : index
    %187 = vector.load %arg3[%c3_91, %c0_92, %c0_93] : memref<10x96x32xf32, #tpu.memory_space<vmem>>, vector<1x96x32xf32>
    %188 = vector.shape_cast %187 : vector<1x96x32xf32> to vector<96x32xf32>
    %cst_94 = arith.constant dense<0.000000e+00> : vector<96x32xf32>
    %189 = tpu.matmul %188, %186, %cst_94 {dimension_numbers = #tpu.dot_dimension_numbers<[1], [0], [0], [1], [0, 0, 1, 1], [], []>} : vector<96x32xf32>, vector<32x32xf32>, vector<96x32xf32> -> vector<96x32xf32>
    %c3_95 = arith.constant 3 : index
    %c0_96 = arith.constant 0 : index
    %c0_97 = arith.constant 0 : index
    %190 = vector.load %arg4[%c3_95, %c0_96, %c0_97] : memref<10x32x32xf32, #tpu.memory_space<vmem>>, vector<1x32x32xf32>
    %191 = vector.shape_cast %190 : vector<1x32x32xf32> to vector<32x32xf32>
    %192 = arith.mulf %191, %185 : vector<32x32xf32>
    %c3_98 = arith.constant 3 : index
    %c0_99 = arith.constant 0 : index
    %c0_100 = arith.constant 0 : index
    %c0_101 = arith.constant 0 : index
    %193 = vector.load %arg5[%c3_98, %c0_99, %c0_100, %c0_101] : memref<10x3x32x32xf32, #tpu.memory_space<vmem>>, vector<1x3x32x32xf32>
    %194 = vector.shape_cast %193 : vector<1x3x32x32xf32> to vector<3x32x32xf32>
    %195 = vector.extract_strided_slice %194 {offsets = [0, 0, 0], sizes = [1, 32, 32], strides = [1, 1, 1]} : vector<3x32x32xf32> to vector<1x32x32xf32>
    %196 = vector.shape_cast %195 : vector<1x32x32xf32> to vector<32x32xf32>
    %197 = vector.extract_strided_slice %189 {offsets = [0, 0], sizes = [32, 32], strides = [1, 1]} : vector<96x32xf32> to vector<32x32xf32>
    %198 = arith.mulf %196, %197 : vector<32x32xf32>
    %199 = arith.addf %192, %198 : vector<32x32xf32>
    %200 = vector.extract_strided_slice %194 {offsets = [1, 0, 0], sizes = [1, 32, 32], strides = [1, 1, 1]} : vector<3x32x32xf32> to vector<1x32x32xf32>
    %201 = vector.shape_cast %200 : vector<1x32x32xf32> to vector<32x32xf32>
    %202 = vector.extract_strided_slice %189 {offsets = [32, 0], sizes = [32, 32], strides = [1, 1]} : vector<96x32xf32> to vector<32x32xf32>
    %203 = arith.mulf %201, %202 : vector<32x32xf32>
    %204 = arith.addf %199, %203 : vector<32x32xf32>
    %205 = vector.extract_strided_slice %194 {offsets = [2, 0, 0], sizes = [1, 32, 32], strides = [1, 1, 1]} : vector<3x32x32xf32> to vector<1x32x32xf32>
    %206 = vector.shape_cast %205 : vector<1x32x32xf32> to vector<32x32xf32>
    %207 = vector.extract_strided_slice %189 {offsets = [64, 0], sizes = [32, 32], strides = [1, 1]} : vector<96x32xf32> to vector<32x32xf32>
    %208 = arith.mulf %206, %207 : vector<32x32xf32>
    %209 = arith.addf %204, %208 : vector<32x32xf32>
    %c3_102 = arith.constant 3 : index
    %c0_103 = arith.constant 0 : index
    %c0_104 = arith.constant 0 : index
    %210 = vector.load %arg6[%c3_102, %c0_103, %c0_104] : memref<10x1x32xf32, #tpu.memory_space<vmem>>, vector<1x1x32xf32>
    %211 = vector.shape_cast %210 : vector<1x1x32xf32> to vector<1x32xf32>
    %212 = vector.broadcast %211 : vector<1x32xf32> to vector<32x32xf32>
    %213 = arith.addf %209, %212 : vector<32x32xf32>
    %cst_105 = arith.constant dense<0.000000e+00> : vector<32xf32>
    %214 = vector.multi_reduction <add>, %213, %cst_105 [0] : vector<32x32xf32> to vector<32xf32>
    %215 = vector.shape_cast %214 : vector<32xf32> to vector<1x32xf32>
    %cst_106 = arith.constant 3.125000e-02 : f32
    %216 = vector.broadcast %cst_106 : f32 to vector<1x32xf32>
    %217 = arith.mulf %215, %216 : vector<1x32xf32>
    %218 = arith.mulf %213, %213 : vector<32x32xf32>
    %cst_107 = arith.constant dense<0.000000e+00> : vector<32xf32>
    %219 = vector.multi_reduction <add>, %218, %cst_107 [0] : vector<32x32xf32> to vector<32xf32>
    %220 = vector.shape_cast %219 : vector<32xf32> to vector<1x32xf32>
    %cst_108 = arith.constant 3.125000e-02 : f32
    %221 = vector.broadcast %cst_108 : f32 to vector<1x32xf32>
    %222 = arith.mulf %220, %221 : vector<1x32xf32>
    %223 = arith.mulf %217, %217 : vector<1x32xf32>
    %224 = arith.subf %222, %223 : vector<1x32xf32>
    %225 = vector.broadcast %217 : vector<1x32xf32> to vector<32x32xf32>
    %226 = arith.subf %213, %225 : vector<32x32xf32>
    %cst_109 = arith.constant 9.99999974E-6 : f32
    %227 = vector.broadcast %cst_109 : f32 to vector<1x32xf32>
    %228 = arith.addf %224, %227 : vector<1x32xf32>
    %229 = math.rsqrt %228 : vector<1x32xf32>
    %230 = vector.broadcast %229 : vector<1x32xf32> to vector<32x32xf32>
    %231 = arith.mulf %226, %230 : vector<32x32xf32>
    %c3_110 = arith.constant 3 : index
    %c0_111 = arith.constant 0 : index
    %c0_112 = arith.constant 0 : index
    %232 = vector.load %arg7[%c3_110, %c0_111, %c0_112] : memref<10x1x32xf32, #tpu.memory_space<vmem>>, vector<1x1x32xf32>
    %233 = vector.shape_cast %232 : vector<1x1x32xf32> to vector<1x32xf32>
    %234 = vector.broadcast %233 : vector<1x32xf32> to vector<32x32xf32>
    %235 = arith.mulf %231, %234 : vector<32x32xf32>
    %c3_113 = arith.constant 3 : index
    %c0_114 = arith.constant 0 : index
    %c0_115 = arith.constant 0 : index
    %236 = vector.load %arg8[%c3_113, %c0_114, %c0_115] : memref<10x1x32xf32, #tpu.memory_space<vmem>>, vector<1x1x32xf32>
    %237 = vector.shape_cast %236 : vector<1x1x32xf32> to vector<1x32xf32>
    %238 = vector.broadcast %237 : vector<1x32xf32> to vector<32x32xf32>
    %239 = arith.addf %235, %238 : vector<32x32xf32>
    %cst_116 = arith.constant 0.000000e+00 : f32
    %240 = vector.broadcast %cst_116 : f32 to vector<32x32xf32>
    %241 = arith.maximumf %239, %240 : vector<32x32xf32>
    %c4 = arith.constant 4 : index
    %c0_117 = arith.constant 0 : index
    %c0_118 = arith.constant 0 : index
    %242 = vector.load %arg2[%c4, %c0_117, %c0_118] : memref<10x32x64xf32, #tpu.memory_space<vmem>>, vector<1x32x64xf32>
    %243 = vector.shape_cast %242 : vector<1x32x64xf32> to vector<32x64xf32>
    %cst_119 = arith.constant dense<0.000000e+00> : vector<32x64xf32>
    %244 = tpu.matmul %241, %243, %cst_119 {dimension_numbers = #tpu.dot_dimension_numbers<[1], [0], [0], [1], [0, 0, 1, 1], [], []>} : vector<32x32xf32>, vector<32x64xf32>, vector<32x64xf32> -> vector<32x64xf32>
    %245 = vector.extract_strided_slice %244 {offsets = [0, 0], sizes = [32, 32], strides = [1, 1]} : vector<32x64xf32> to vector<32x32xf32>
    %246 = vector.extract_strided_slice %244 {offsets = [0, 32], sizes = [32, 32], strides = [1, 1]} : vector<32x64xf32> to vector<32x32xf32>
    %c4_120 = arith.constant 4 : index
    %c0_121 = arith.constant 0 : index
    %c0_122 = arith.constant 0 : index
    %247 = vector.load %arg3[%c4_120, %c0_121, %c0_122] : memref<10x96x32xf32, #tpu.memory_space<vmem>>, vector<1x96x32xf32>
    %248 = vector.shape_cast %247 : vector<1x96x32xf32> to vector<96x32xf32>
    %cst_123 = arith.constant dense<0.000000e+00> : vector<96x32xf32>
    %249 = tpu.matmul %248, %246, %cst_123 {dimension_numbers = #tpu.dot_dimension_numbers<[1], [0], [0], [1], [0, 0, 1, 1], [], []>} : vector<96x32xf32>, vector<32x32xf32>, vector<96x32xf32> -> vector<96x32xf32>
    %c4_124 = arith.constant 4 : index
    %c0_125 = arith.constant 0 : index
    %c0_126 = arith.constant 0 : index
    %250 = vector.load %arg4[%c4_124, %c0_125, %c0_126] : memref<10x32x32xf32, #tpu.memory_space<vmem>>, vector<1x32x32xf32>
    %251 = vector.shape_cast %250 : vector<1x32x32xf32> to vector<32x32xf32>
    %252 = arith.mulf %251, %245 : vector<32x32xf32>
    %c4_127 = arith.constant 4 : index
    %c0_128 = arith.constant 0 : index
    %c0_129 = arith.constant 0 : index
    %c0_130 = arith.constant 0 : index
    %253 = vector.load %arg5[%c4_127, %c0_128, %c0_129, %c0_130] : memref<10x3x32x32xf32, #tpu.memory_space<vmem>>, vector<1x3x32x32xf32>
    %254 = vector.shape_cast %253 : vector<1x3x32x32xf32> to vector<3x32x32xf32>
    %255 = vector.extract_strided_slice %254 {offsets = [0, 0, 0], sizes = [1, 32, 32], strides = [1, 1, 1]} : vector<3x32x32xf32> to vector<1x32x32xf32>
    %256 = vector.shape_cast %255 : vector<1x32x32xf32> to vector<32x32xf32>
    %257 = vector.extract_strided_slice %249 {offsets = [0, 0], sizes = [32, 32], strides = [1, 1]} : vector<96x32xf32> to vector<32x32xf32>
    %258 = arith.mulf %256, %257 : vector<32x32xf32>
    %259 = arith.addf %252, %258 : vector<32x32xf32>
    %260 = vector.extract_strided_slice %254 {offsets = [1, 0, 0], sizes = [1, 32, 32], strides = [1, 1, 1]} : vector<3x32x32xf32> to vector<1x32x32xf32>
    %261 = vector.shape_cast %260 : vector<1x32x32xf32> to vector<32x32xf32>
    %262 = vector.extract_strided_slice %249 {offsets = [32, 0], sizes = [32, 32], strides = [1, 1]} : vector<96x32xf32> to vector<32x32xf32>
    %263 = arith.mulf %261, %262 : vector<32x32xf32>
    %264 = arith.addf %259, %263 : vector<32x32xf32>
    %265 = vector.extract_strided_slice %254 {offsets = [2, 0, 0], sizes = [1, 32, 32], strides = [1, 1, 1]} : vector<3x32x32xf32> to vector<1x32x32xf32>
    %266 = vector.shape_cast %265 : vector<1x32x32xf32> to vector<32x32xf32>
    %267 = vector.extract_strided_slice %249 {offsets = [64, 0], sizes = [32, 32], strides = [1, 1]} : vector<96x32xf32> to vector<32x32xf32>
    %268 = arith.mulf %266, %267 : vector<32x32xf32>
    %269 = arith.addf %264, %268 : vector<32x32xf32>
    %c4_131 = arith.constant 4 : index
    %c0_132 = arith.constant 0 : index
    %c0_133 = arith.constant 0 : index
    %270 = vector.load %arg6[%c4_131, %c0_132, %c0_133] : memref<10x1x32xf32, #tpu.memory_space<vmem>>, vector<1x1x32xf32>
    %271 = vector.shape_cast %270 : vector<1x1x32xf32> to vector<1x32xf32>
    %272 = vector.broadcast %271 : vector<1x32xf32> to vector<32x32xf32>
    %273 = arith.addf %269, %272 : vector<32x32xf32>
    %cst_134 = arith.constant dense<0.000000e+00> : vector<32xf32>
    %274 = vector.multi_reduction <add>, %273, %cst_134 [0] : vector<32x32xf32> to vector<32xf32>
    %275 = vector.shape_cast %274 : vector<32xf32> to vector<1x32xf32>
    %cst_135 = arith.constant 3.125000e-02 : f32
    %276 = vector.broadcast %cst_135 : f32 to vector<1x32xf32>
    %277 = arith.mulf %275, %276 : vector<1x32xf32>
    %278 = arith.mulf %273, %273 : vector<32x32xf32>
    %cst_136 = arith.constant dense<0.000000e+00> : vector<32xf32>
    %279 = vector.multi_reduction <add>, %278, %cst_136 [0] : vector<32x32xf32> to vector<32xf32>
    %280 = vector.shape_cast %279 : vector<32xf32> to vector<1x32xf32>
    %cst_137 = arith.constant 3.125000e-02 : f32
    %281 = vector.broadcast %cst_137 : f32 to vector<1x32xf32>
    %282 = arith.mulf %280, %281 : vector<1x32xf32>
    %283 = arith.mulf %277, %277 : vector<1x32xf32>
    %284 = arith.subf %282, %283 : vector<1x32xf32>
    %285 = vector.broadcast %277 : vector<1x32xf32> to vector<32x32xf32>
    %286 = arith.subf %273, %285 : vector<32x32xf32>
    %cst_138 = arith.constant 9.99999974E-6 : f32
    %287 = vector.broadcast %cst_138 : f32 to vector<1x32xf32>
    %288 = arith.addf %284, %287 : vector<1x32xf32>
    %289 = math.rsqrt %288 : vector<1x32xf32>
    %290 = vector.broadcast %289 : vector<1x32xf32> to vector<32x32xf32>
    %291 = arith.mulf %286, %290 : vector<32x32xf32>
    %c4_139 = arith.constant 4 : index
    %c0_140 = arith.constant 0 : index
    %c0_141 = arith.constant 0 : index
    %292 = vector.load %arg7[%c4_139, %c0_140, %c0_141] : memref<10x1x32xf32, #tpu.memory_space<vmem>>, vector<1x1x32xf32>
    %293 = vector.shape_cast %292 : vector<1x1x32xf32> to vector<1x32xf32>
    %294 = vector.broadcast %293 : vector<1x32xf32> to vector<32x32xf32>
    %295 = arith.mulf %291, %294 : vector<32x32xf32>
    %c4_142 = arith.constant 4 : index
    %c0_143 = arith.constant 0 : index
    %c0_144 = arith.constant 0 : index
    %296 = vector.load %arg8[%c4_142, %c0_143, %c0_144] : memref<10x1x32xf32, #tpu.memory_space<vmem>>, vector<1x1x32xf32>
    %297 = vector.shape_cast %296 : vector<1x1x32xf32> to vector<1x32xf32>
    %298 = vector.broadcast %297 : vector<1x32xf32> to vector<32x32xf32>
    %299 = arith.addf %295, %298 : vector<32x32xf32>
    %cst_145 = arith.constant 0.000000e+00 : f32
    %300 = vector.broadcast %cst_145 : f32 to vector<32x32xf32>
    %301 = arith.maximumf %299, %300 : vector<32x32xf32>
    %302 = arith.addf %181, %301 : vector<32x32xf32>
    %c5 = arith.constant 5 : index
    %c0_146 = arith.constant 0 : index
    %c0_147 = arith.constant 0 : index
    %303 = vector.load %arg2[%c5, %c0_146, %c0_147] : memref<10x32x64xf32, #tpu.memory_space<vmem>>, vector<1x32x64xf32>
    %304 = vector.shape_cast %303 : vector<1x32x64xf32> to vector<32x64xf32>
    %cst_148 = arith.constant dense<0.000000e+00> : vector<32x64xf32>
    %305 = tpu.matmul %302, %304, %cst_148 {dimension_numbers = #tpu.dot_dimension_numbers<[1], [0], [0], [1], [0, 0, 1, 1], [], []>} : vector<32x32xf32>, vector<32x64xf32>, vector<32x64xf32> -> vector<32x64xf32>
    %306 = vector.extract_strided_slice %305 {offsets = [0, 0], sizes = [32, 32], strides = [1, 1]} : vector<32x64xf32> to vector<32x32xf32>
    %307 = vector.extract_strided_slice %305 {offsets = [0, 32], sizes = [32, 32], strides = [1, 1]} : vector<32x64xf32> to vector<32x32xf32>
    %c5_149 = arith.constant 5 : index
    %c0_150 = arith.constant 0 : index
    %c0_151 = arith.constant 0 : index
    %308 = vector.load %arg3[%c5_149, %c0_150, %c0_151] : memref<10x96x32xf32, #tpu.memory_space<vmem>>, vector<1x96x32xf32>
    %309 = vector.shape_cast %308 : vector<1x96x32xf32> to vector<96x32xf32>
    %cst_152 = arith.constant dense<0.000000e+00> : vector<96x32xf32>
    %310 = tpu.matmul %309, %307, %cst_152 {dimension_numbers = #tpu.dot_dimension_numbers<[1], [0], [0], [1], [0, 0, 1, 1], [], []>} : vector<96x32xf32>, vector<32x32xf32>, vector<96x32xf32> -> vector<96x32xf32>
    %c5_153 = arith.constant 5 : index
    %c0_154 = arith.constant 0 : index
    %c0_155 = arith.constant 0 : index
    %311 = vector.load %arg4[%c5_153, %c0_154, %c0_155] : memref<10x32x32xf32, #tpu.memory_space<vmem>>, vector<1x32x32xf32>
    %312 = vector.shape_cast %311 : vector<1x32x32xf32> to vector<32x32xf32>
    %313 = arith.mulf %312, %306 : vector<32x32xf32>
    %c5_156 = arith.constant 5 : index
    %c0_157 = arith.constant 0 : index
    %c0_158 = arith.constant 0 : index
    %c0_159 = arith.constant 0 : index
    %314 = vector.load %arg5[%c5_156, %c0_157, %c0_158, %c0_159] : memref<10x3x32x32xf32, #tpu.memory_space<vmem>>, vector<1x3x32x32xf32>
    %315 = vector.shape_cast %314 : vector<1x3x32x32xf32> to vector<3x32x32xf32>
    %316 = vector.extract_strided_slice %315 {offsets = [0, 0, 0], sizes = [1, 32, 32], strides = [1, 1, 1]} : vector<3x32x32xf32> to vector<1x32x32xf32>
    %317 = vector.shape_cast %316 : vector<1x32x32xf32> to vector<32x32xf32>
    %318 = vector.extract_strided_slice %310 {offsets = [0, 0], sizes = [32, 32], strides = [1, 1]} : vector<96x32xf32> to vector<32x32xf32>
    %319 = arith.mulf %317, %318 : vector<32x32xf32>
    %320 = arith.addf %313, %319 : vector<32x32xf32>
    %321 = vector.extract_strided_slice %315 {offsets = [1, 0, 0], sizes = [1, 32, 32], strides = [1, 1, 1]} : vector<3x32x32xf32> to vector<1x32x32xf32>
    %322 = vector.shape_cast %321 : vector<1x32x32xf32> to vector<32x32xf32>
    %323 = vector.extract_strided_slice %310 {offsets = [32, 0], sizes = [32, 32], strides = [1, 1]} : vector<96x32xf32> to vector<32x32xf32>
    %324 = arith.mulf %322, %323 : vector<32x32xf32>
    %325 = arith.addf %320, %324 : vector<32x32xf32>
    %326 = vector.extract_strided_slice %315 {offsets = [2, 0, 0], sizes = [1, 32, 32], strides = [1, 1, 1]} : vector<3x32x32xf32> to vector<1x32x32xf32>
    %327 = vector.shape_cast %326 : vector<1x32x32xf32> to vector<32x32xf32>
    %328 = vector.extract_strided_slice %310 {offsets = [64, 0], sizes = [32, 32], strides = [1, 1]} : vector<96x32xf32> to vector<32x32xf32>
    %329 = arith.mulf %327, %328 : vector<32x32xf32>
    %330 = arith.addf %325, %329 : vector<32x32xf32>
    %c5_160 = arith.constant 5 : index
    %c0_161 = arith.constant 0 : index
    %c0_162 = arith.constant 0 : index
    %331 = vector.load %arg6[%c5_160, %c0_161, %c0_162] : memref<10x1x32xf32, #tpu.memory_space<vmem>>, vector<1x1x32xf32>
    %332 = vector.shape_cast %331 : vector<1x1x32xf32> to vector<1x32xf32>
    %333 = vector.broadcast %332 : vector<1x32xf32> to vector<32x32xf32>
    %334 = arith.addf %330, %333 : vector<32x32xf32>
    %cst_163 = arith.constant dense<0.000000e+00> : vector<32xf32>
    %335 = vector.multi_reduction <add>, %334, %cst_163 [0] : vector<32x32xf32> to vector<32xf32>
    %336 = vector.shape_cast %335 : vector<32xf32> to vector<1x32xf32>
    %cst_164 = arith.constant 3.125000e-02 : f32
    %337 = vector.broadcast %cst_164 : f32 to vector<1x32xf32>
    %338 = arith.mulf %336, %337 : vector<1x32xf32>
    %339 = arith.mulf %334, %334 : vector<32x32xf32>
    %cst_165 = arith.constant dense<0.000000e+00> : vector<32xf32>
    %340 = vector.multi_reduction <add>, %339, %cst_165 [0] : vector<32x32xf32> to vector<32xf32>
    %341 = vector.shape_cast %340 : vector<32xf32> to vector<1x32xf32>
    %cst_166 = arith.constant 3.125000e-02 : f32
    %342 = vector.broadcast %cst_166 : f32 to vector<1x32xf32>
    %343 = arith.mulf %341, %342 : vector<1x32xf32>
    %344 = arith.mulf %338, %338 : vector<1x32xf32>
    %345 = arith.subf %343, %344 : vector<1x32xf32>
    %346 = vector.broadcast %338 : vector<1x32xf32> to vector<32x32xf32>
    %347 = arith.subf %334, %346 : vector<32x32xf32>
    %cst_167 = arith.constant 9.99999974E-6 : f32
    %348 = vector.broadcast %cst_167 : f32 to vector<1x32xf32>
    %349 = arith.addf %345, %348 : vector<1x32xf32>
    %350 = math.rsqrt %349 : vector<1x32xf32>
    %351 = vector.broadcast %350 : vector<1x32xf32> to vector<32x32xf32>
    %352 = arith.mulf %347, %351 : vector<32x32xf32>
    %c5_168 = arith.constant 5 : index
    %c0_169 = arith.constant 0 : index
    %c0_170 = arith.constant 0 : index
    %353 = vector.load %arg7[%c5_168, %c0_169, %c0_170] : memref<10x1x32xf32, #tpu.memory_space<vmem>>, vector<1x1x32xf32>
    %354 = vector.shape_cast %353 : vector<1x1x32xf32> to vector<1x32xf32>
    %355 = vector.broadcast %354 : vector<1x32xf32> to vector<32x32xf32>
    %356 = arith.mulf %352, %355 : vector<32x32xf32>
    %c5_171 = arith.constant 5 : index
    %c0_172 = arith.constant 0 : index
    %c0_173 = arith.constant 0 : index
    %357 = vector.load %arg8[%c5_171, %c0_172, %c0_173] : memref<10x1x32xf32, #tpu.memory_space<vmem>>, vector<1x1x32xf32>
    %358 = vector.shape_cast %357 : vector<1x1x32xf32> to vector<1x32xf32>
    %359 = vector.broadcast %358 : vector<1x32xf32> to vector<32x32xf32>
    %360 = arith.addf %356, %359 : vector<32x32xf32>
    %cst_174 = arith.constant 0.000000e+00 : f32
    %361 = vector.broadcast %cst_174 : f32 to vector<32x32xf32>
    %362 = arith.maximumf %360, %361 : vector<32x32xf32>
    %c6 = arith.constant 6 : index
    %c0_175 = arith.constant 0 : index
    %c0_176 = arith.constant 0 : index
    %363 = vector.load %arg2[%c6, %c0_175, %c0_176] : memref<10x32x64xf32, #tpu.memory_space<vmem>>, vector<1x32x64xf32>
    %364 = vector.shape_cast %363 : vector<1x32x64xf32> to vector<32x64xf32>
    %cst_177 = arith.constant dense<0.000000e+00> : vector<32x64xf32>
    %365 = tpu.matmul %362, %364, %cst_177 {dimension_numbers = #tpu.dot_dimension_numbers<[1], [0], [0], [1], [0, 0, 1, 1], [], []>} : vector<32x32xf32>, vector<32x64xf32>, vector<32x64xf32> -> vector<32x64xf32>
    %366 = vector.extract_strided_slice %365 {offsets = [0, 0], sizes = [32, 32], strides = [1, 1]} : vector<32x64xf32> to vector<32x32xf32>
    %367 = vector.extract_strided_slice %365 {offsets = [0, 32], sizes = [32, 32], strides = [1, 1]} : vector<32x64xf32> to vector<32x32xf32>
    %c6_178 = arith.constant 6 : index
    %c0_179 = arith.constant 0 : index
    %c0_180 = arith.constant 0 : index
    %368 = vector.load %arg3[%c6_178, %c0_179, %c0_180] : memref<10x96x32xf32, #tpu.memory_space<vmem>>, vector<1x96x32xf32>
    %369 = vector.shape_cast %368 : vector<1x96x32xf32> to vector<96x32xf32>
    %cst_181 = arith.constant dense<0.000000e+00> : vector<96x32xf32>
    %370 = tpu.matmul %369, %367, %cst_181 {dimension_numbers = #tpu.dot_dimension_numbers<[1], [0], [0], [1], [0, 0, 1, 1], [], []>} : vector<96x32xf32>, vector<32x32xf32>, vector<96x32xf32> -> vector<96x32xf32>
    %c6_182 = arith.constant 6 : index
    %c0_183 = arith.constant 0 : index
    %c0_184 = arith.constant 0 : index
    %371 = vector.load %arg4[%c6_182, %c0_183, %c0_184] : memref<10x32x32xf32, #tpu.memory_space<vmem>>, vector<1x32x32xf32>
    %372 = vector.shape_cast %371 : vector<1x32x32xf32> to vector<32x32xf32>
    %373 = arith.mulf %372, %366 : vector<32x32xf32>
    %c6_185 = arith.constant 6 : index
    %c0_186 = arith.constant 0 : index
    %c0_187 = arith.constant 0 : index
    %c0_188 = arith.constant 0 : index
    %374 = vector.load %arg5[%c6_185, %c0_186, %c0_187, %c0_188] : memref<10x3x32x32xf32, #tpu.memory_space<vmem>>, vector<1x3x32x32xf32>
    %375 = vector.shape_cast %374 : vector<1x3x32x32xf32> to vector<3x32x32xf32>
    %376 = vector.extract_strided_slice %375 {offsets = [0, 0, 0], sizes = [1, 32, 32], strides = [1, 1, 1]} : vector<3x32x32xf32> to vector<1x32x32xf32>
    %377 = vector.shape_cast %376 : vector<1x32x32xf32> to vector<32x32xf32>
    %378 = vector.extract_strided_slice %370 {offsets = [0, 0], sizes = [32, 32], strides = [1, 1]} : vector<96x32xf32> to vector<32x32xf32>
    %379 = arith.mulf %377, %378 : vector<32x32xf32>
    %380 = arith.addf %373, %379 : vector<32x32xf32>
    %381 = vector.extract_strided_slice %375 {offsets = [1, 0, 0], sizes = [1, 32, 32], strides = [1, 1, 1]} : vector<3x32x32xf32> to vector<1x32x32xf32>
    %382 = vector.shape_cast %381 : vector<1x32x32xf32> to vector<32x32xf32>
    %383 = vector.extract_strided_slice %370 {offsets = [32, 0], sizes = [32, 32], strides = [1, 1]} : vector<96x32xf32> to vector<32x32xf32>
    %384 = arith.mulf %382, %383 : vector<32x32xf32>
    %385 = arith.addf %380, %384 : vector<32x32xf32>
    %386 = vector.extract_strided_slice %375 {offsets = [2, 0, 0], sizes = [1, 32, 32], strides = [1, 1, 1]} : vector<3x32x32xf32> to vector<1x32x32xf32>
    %387 = vector.shape_cast %386 : vector<1x32x32xf32> to vector<32x32xf32>
    %388 = vector.extract_strided_slice %370 {offsets = [64, 0], sizes = [32, 32], strides = [1, 1]} : vector<96x32xf32> to vector<32x32xf32>
    %389 = arith.mulf %387, %388 : vector<32x32xf32>
    %390 = arith.addf %385, %389 : vector<32x32xf32>
    %c6_189 = arith.constant 6 : index
    %c0_190 = arith.constant 0 : index
    %c0_191 = arith.constant 0 : index
    %391 = vector.load %arg6[%c6_189, %c0_190, %c0_191] : memref<10x1x32xf32, #tpu.memory_space<vmem>>, vector<1x1x32xf32>
    %392 = vector.shape_cast %391 : vector<1x1x32xf32> to vector<1x32xf32>
    %393 = vector.broadcast %392 : vector<1x32xf32> to vector<32x32xf32>
    %394 = arith.addf %390, %393 : vector<32x32xf32>
    %cst_192 = arith.constant dense<0.000000e+00> : vector<32xf32>
    %395 = vector.multi_reduction <add>, %394, %cst_192 [0] : vector<32x32xf32> to vector<32xf32>
    %396 = vector.shape_cast %395 : vector<32xf32> to vector<1x32xf32>
    %cst_193 = arith.constant 3.125000e-02 : f32
    %397 = vector.broadcast %cst_193 : f32 to vector<1x32xf32>
    %398 = arith.mulf %396, %397 : vector<1x32xf32>
    %399 = arith.mulf %394, %394 : vector<32x32xf32>
    %cst_194 = arith.constant dense<0.000000e+00> : vector<32xf32>
    %400 = vector.multi_reduction <add>, %399, %cst_194 [0] : vector<32x32xf32> to vector<32xf32>
    %401 = vector.shape_cast %400 : vector<32xf32> to vector<1x32xf32>
    %cst_195 = arith.constant 3.125000e-02 : f32
    %402 = vector.broadcast %cst_195 : f32 to vector<1x32xf32>
    %403 = arith.mulf %401, %402 : vector<1x32xf32>
    %404 = arith.mulf %398, %398 : vector<1x32xf32>
    %405 = arith.subf %403, %404 : vector<1x32xf32>
    %406 = vector.broadcast %398 : vector<1x32xf32> to vector<32x32xf32>
    %407 = arith.subf %394, %406 : vector<32x32xf32>
    %cst_196 = arith.constant 9.99999974E-6 : f32
    %408 = vector.broadcast %cst_196 : f32 to vector<1x32xf32>
    %409 = arith.addf %405, %408 : vector<1x32xf32>
    %410 = math.rsqrt %409 : vector<1x32xf32>
    %411 = vector.broadcast %410 : vector<1x32xf32> to vector<32x32xf32>
    %412 = arith.mulf %407, %411 : vector<32x32xf32>
    %c6_197 = arith.constant 6 : index
    %c0_198 = arith.constant 0 : index
    %c0_199 = arith.constant 0 : index
    %413 = vector.load %arg7[%c6_197, %c0_198, %c0_199] : memref<10x1x32xf32, #tpu.memory_space<vmem>>, vector<1x1x32xf32>
    %414 = vector.shape_cast %413 : vector<1x1x32xf32> to vector<1x32xf32>
    %415 = vector.broadcast %414 : vector<1x32xf32> to vector<32x32xf32>
    %416 = arith.mulf %412, %415 : vector<32x32xf32>
    %c6_200 = arith.constant 6 : index
    %c0_201 = arith.constant 0 : index
    %c0_202 = arith.constant 0 : index
    %417 = vector.load %arg8[%c6_200, %c0_201, %c0_202] : memref<10x1x32xf32, #tpu.memory_space<vmem>>, vector<1x1x32xf32>
    %418 = vector.shape_cast %417 : vector<1x1x32xf32> to vector<1x32xf32>
    %419 = vector.broadcast %418 : vector<1x32xf32> to vector<32x32xf32>
    %420 = arith.addf %416, %419 : vector<32x32xf32>
    %cst_203 = arith.constant 0.000000e+00 : f32
    %421 = vector.broadcast %cst_203 : f32 to vector<32x32xf32>
    %422 = arith.maximumf %420, %421 : vector<32x32xf32>
    %423 = arith.addf %302, %422 : vector<32x32xf32>
    %c7 = arith.constant 7 : index
    %c0_204 = arith.constant 0 : index
    %c0_205 = arith.constant 0 : index
    %424 = vector.load %arg2[%c7, %c0_204, %c0_205] : memref<10x32x64xf32, #tpu.memory_space<vmem>>, vector<1x32x64xf32>
    %425 = vector.shape_cast %424 : vector<1x32x64xf32> to vector<32x64xf32>
    %cst_206 = arith.constant dense<0.000000e+00> : vector<32x64xf32>
    %426 = tpu.matmul %423, %425, %cst_206 {dimension_numbers = #tpu.dot_dimension_numbers<[1], [0], [0], [1], [0, 0, 1, 1], [], []>} : vector<32x32xf32>, vector<32x64xf32>, vector<32x64xf32> -> vector<32x64xf32>
    %427 = vector.extract_strided_slice %426 {offsets = [0, 0], sizes = [32, 32], strides = [1, 1]} : vector<32x64xf32> to vector<32x32xf32>
    %428 = vector.extract_strided_slice %426 {offsets = [0, 32], sizes = [32, 32], strides = [1, 1]} : vector<32x64xf32> to vector<32x32xf32>
    %c7_207 = arith.constant 7 : index
    %c0_208 = arith.constant 0 : index
    %c0_209 = arith.constant 0 : index
    %429 = vector.load %arg3[%c7_207, %c0_208, %c0_209] : memref<10x96x32xf32, #tpu.memory_space<vmem>>, vector<1x96x32xf32>
    %430 = vector.shape_cast %429 : vector<1x96x32xf32> to vector<96x32xf32>
    %cst_210 = arith.constant dense<0.000000e+00> : vector<96x32xf32>
    %431 = tpu.matmul %430, %428, %cst_210 {dimension_numbers = #tpu.dot_dimension_numbers<[1], [0], [0], [1], [0, 0, 1, 1], [], []>} : vector<96x32xf32>, vector<32x32xf32>, vector<96x32xf32> -> vector<96x32xf32>
    %c7_211 = arith.constant 7 : index
    %c0_212 = arith.constant 0 : index
    %c0_213 = arith.constant 0 : index
    %432 = vector.load %arg4[%c7_211, %c0_212, %c0_213] : memref<10x32x32xf32, #tpu.memory_space<vmem>>, vector<1x32x32xf32>
    %433 = vector.shape_cast %432 : vector<1x32x32xf32> to vector<32x32xf32>
    %434 = arith.mulf %433, %427 : vector<32x32xf32>
    %c7_214 = arith.constant 7 : index
    %c0_215 = arith.constant 0 : index
    %c0_216 = arith.constant 0 : index
    %c0_217 = arith.constant 0 : index
    %435 = vector.load %arg5[%c7_214, %c0_215, %c0_216, %c0_217] : memref<10x3x32x32xf32, #tpu.memory_space<vmem>>, vector<1x3x32x32xf32>
    %436 = vector.shape_cast %435 : vector<1x3x32x32xf32> to vector<3x32x32xf32>
    %437 = vector.extract_strided_slice %436 {offsets = [0, 0, 0], sizes = [1, 32, 32], strides = [1, 1, 1]} : vector<3x32x32xf32> to vector<1x32x32xf32>
    %438 = vector.shape_cast %437 : vector<1x32x32xf32> to vector<32x32xf32>
    %439 = vector.extract_strided_slice %431 {offsets = [0, 0], sizes = [32, 32], strides = [1, 1]} : vector<96x32xf32> to vector<32x32xf32>
    %440 = arith.mulf %438, %439 : vector<32x32xf32>
    %441 = arith.addf %434, %440 : vector<32x32xf32>
    %442 = vector.extract_strided_slice %436 {offsets = [1, 0, 0], sizes = [1, 32, 32], strides = [1, 1, 1]} : vector<3x32x32xf32> to vector<1x32x32xf32>
    %443 = vector.shape_cast %442 : vector<1x32x32xf32> to vector<32x32xf32>
    %444 = vector.extract_strided_slice %431 {offsets = [32, 0], sizes = [32, 32], strides = [1, 1]} : vector<96x32xf32> to vector<32x32xf32>
    %445 = arith.mulf %443, %444 : vector<32x32xf32>
    %446 = arith.addf %441, %445 : vector<32x32xf32>
    %447 = vector.extract_strided_slice %436 {offsets = [2, 0, 0], sizes = [1, 32, 32], strides = [1, 1, 1]} : vector<3x32x32xf32> to vector<1x32x32xf32>
    %448 = vector.shape_cast %447 : vector<1x32x32xf32> to vector<32x32xf32>
    %449 = vector.extract_strided_slice %431 {offsets = [64, 0], sizes = [32, 32], strides = [1, 1]} : vector<96x32xf32> to vector<32x32xf32>
    %450 = arith.mulf %448, %449 : vector<32x32xf32>
    %451 = arith.addf %446, %450 : vector<32x32xf32>
    %c7_218 = arith.constant 7 : index
    %c0_219 = arith.constant 0 : index
    %c0_220 = arith.constant 0 : index
    %452 = vector.load %arg6[%c7_218, %c0_219, %c0_220] : memref<10x1x32xf32, #tpu.memory_space<vmem>>, vector<1x1x32xf32>
    %453 = vector.shape_cast %452 : vector<1x1x32xf32> to vector<1x32xf32>
    %454 = vector.broadcast %453 : vector<1x32xf32> to vector<32x32xf32>
    %455 = arith.addf %451, %454 : vector<32x32xf32>
    %cst_221 = arith.constant dense<0.000000e+00> : vector<32xf32>
    %456 = vector.multi_reduction <add>, %455, %cst_221 [0] : vector<32x32xf32> to vector<32xf32>
    %457 = vector.shape_cast %456 : vector<32xf32> to vector<1x32xf32>
    %cst_222 = arith.constant 3.125000e-02 : f32
    %458 = vector.broadcast %cst_222 : f32 to vector<1x32xf32>
    %459 = arith.mulf %457, %458 : vector<1x32xf32>
    %460 = arith.mulf %455, %455 : vector<32x32xf32>
    %cst_223 = arith.constant dense<0.000000e+00> : vector<32xf32>
    %461 = vector.multi_reduction <add>, %460, %cst_223 [0] : vector<32x32xf32> to vector<32xf32>
    %462 = vector.shape_cast %461 : vector<32xf32> to vector<1x32xf32>
    %cst_224 = arith.constant 3.125000e-02 : f32
    %463 = vector.broadcast %cst_224 : f32 to vector<1x32xf32>
    %464 = arith.mulf %462, %463 : vector<1x32xf32>
    %465 = arith.mulf %459, %459 : vector<1x32xf32>
    %466 = arith.subf %464, %465 : vector<1x32xf32>
    %467 = vector.broadcast %459 : vector<1x32xf32> to vector<32x32xf32>
    %468 = arith.subf %455, %467 : vector<32x32xf32>
    %cst_225 = arith.constant 9.99999974E-6 : f32
    %469 = vector.broadcast %cst_225 : f32 to vector<1x32xf32>
    %470 = arith.addf %466, %469 : vector<1x32xf32>
    %471 = math.rsqrt %470 : vector<1x32xf32>
    %472 = vector.broadcast %471 : vector<1x32xf32> to vector<32x32xf32>
    %473 = arith.mulf %468, %472 : vector<32x32xf32>
    %c7_226 = arith.constant 7 : index
    %c0_227 = arith.constant 0 : index
    %c0_228 = arith.constant 0 : index
    %474 = vector.load %arg7[%c7_226, %c0_227, %c0_228] : memref<10x1x32xf32, #tpu.memory_space<vmem>>, vector<1x1x32xf32>
    %475 = vector.shape_cast %474 : vector<1x1x32xf32> to vector<1x32xf32>
    %476 = vector.broadcast %475 : vector<1x32xf32> to vector<32x32xf32>
    %477 = arith.mulf %473, %476 : vector<32x32xf32>
    %c7_229 = arith.constant 7 : index
    %c0_230 = arith.constant 0 : index
    %c0_231 = arith.constant 0 : index
    %478 = vector.load %arg8[%c7_229, %c0_230, %c0_231] : memref<10x1x32xf32, #tpu.memory_space<vmem>>, vector<1x1x32xf32>
    %479 = vector.shape_cast %478 : vector<1x1x32xf32> to vector<1x32xf32>
    %480 = vector.broadcast %479 : vector<1x32xf32> to vector<32x32xf32>
    %481 = arith.addf %477, %480 : vector<32x32xf32>
    %cst_232 = arith.constant 0.000000e+00 : f32
    %482 = vector.broadcast %cst_232 : f32 to vector<32x32xf32>
    %483 = arith.maximumf %481, %482 : vector<32x32xf32>
    %c8 = arith.constant 8 : index
    %c0_233 = arith.constant 0 : index
    %c0_234 = arith.constant 0 : index
    %484 = vector.load %arg2[%c8, %c0_233, %c0_234] : memref<10x32x64xf32, #tpu.memory_space<vmem>>, vector<1x32x64xf32>
    %485 = vector.shape_cast %484 : vector<1x32x64xf32> to vector<32x64xf32>
    %cst_235 = arith.constant dense<0.000000e+00> : vector<32x64xf32>
    %486 = tpu.matmul %483, %485, %cst_235 {dimension_numbers = #tpu.dot_dimension_numbers<[1], [0], [0], [1], [0, 0, 1, 1], [], []>} : vector<32x32xf32>, vector<32x64xf32>, vector<32x64xf32> -> vector<32x64xf32>
    %487 = vector.extract_strided_slice %486 {offsets = [0, 0], sizes = [32, 32], strides = [1, 1]} : vector<32x64xf32> to vector<32x32xf32>
    %488 = vector.extract_strided_slice %486 {offsets = [0, 32], sizes = [32, 32], strides = [1, 1]} : vector<32x64xf32> to vector<32x32xf32>
    %c8_236 = arith.constant 8 : index
    %c0_237 = arith.constant 0 : index
    %c0_238 = arith.constant 0 : index
    %489 = vector.load %arg3[%c8_236, %c0_237, %c0_238] : memref<10x96x32xf32, #tpu.memory_space<vmem>>, vector<1x96x32xf32>
    %490 = vector.shape_cast %489 : vector<1x96x32xf32> to vector<96x32xf32>
    %cst_239 = arith.constant dense<0.000000e+00> : vector<96x32xf32>
    %491 = tpu.matmul %490, %488, %cst_239 {dimension_numbers = #tpu.dot_dimension_numbers<[1], [0], [0], [1], [0, 0, 1, 1], [], []>} : vector<96x32xf32>, vector<32x32xf32>, vector<96x32xf32> -> vector<96x32xf32>
    %c8_240 = arith.constant 8 : index
    %c0_241 = arith.constant 0 : index
    %c0_242 = arith.constant 0 : index
    %492 = vector.load %arg4[%c8_240, %c0_241, %c0_242] : memref<10x32x32xf32, #tpu.memory_space<vmem>>, vector<1x32x32xf32>
    %493 = vector.shape_cast %492 : vector<1x32x32xf32> to vector<32x32xf32>
    %494 = arith.mulf %493, %487 : vector<32x32xf32>
    %c8_243 = arith.constant 8 : index
    %c0_244 = arith.constant 0 : index
    %c0_245 = arith.constant 0 : index
    %c0_246 = arith.constant 0 : index
    %495 = vector.load %arg5[%c8_243, %c0_244, %c0_245, %c0_246] : memref<10x3x32x32xf32, #tpu.memory_space<vmem>>, vector<1x3x32x32xf32>
    %496 = vector.shape_cast %495 : vector<1x3x32x32xf32> to vector<3x32x32xf32>
    %497 = vector.extract_strided_slice %496 {offsets = [0, 0, 0], sizes = [1, 32, 32], strides = [1, 1, 1]} : vector<3x32x32xf32> to vector<1x32x32xf32>
    %498 = vector.shape_cast %497 : vector<1x32x32xf32> to vector<32x32xf32>
    %499 = vector.extract_strided_slice %491 {offsets = [0, 0], sizes = [32, 32], strides = [1, 1]} : vector<96x32xf32> to vector<32x32xf32>
    %500 = arith.mulf %498, %499 : vector<32x32xf32>
    %501 = arith.addf %494, %500 : vector<32x32xf32>
    %502 = vector.extract_strided_slice %496 {offsets = [1, 0, 0], sizes = [1, 32, 32], strides = [1, 1, 1]} : vector<3x32x32xf32> to vector<1x32x32xf32>
    %503 = vector.shape_cast %502 : vector<1x32x32xf32> to vector<32x32xf32>
    %504 = vector.extract_strided_slice %491 {offsets = [32, 0], sizes = [32, 32], strides = [1, 1]} : vector<96x32xf32> to vector<32x32xf32>
    %505 = arith.mulf %503, %504 : vector<32x32xf32>
    %506 = arith.addf %501, %505 : vector<32x32xf32>
    %507 = vector.extract_strided_slice %496 {offsets = [2, 0, 0], sizes = [1, 32, 32], strides = [1, 1, 1]} : vector<3x32x32xf32> to vector<1x32x32xf32>
    %508 = vector.shape_cast %507 : vector<1x32x32xf32> to vector<32x32xf32>
    %509 = vector.extract_strided_slice %491 {offsets = [64, 0], sizes = [32, 32], strides = [1, 1]} : vector<96x32xf32> to vector<32x32xf32>
    %510 = arith.mulf %508, %509 : vector<32x32xf32>
    %511 = arith.addf %506, %510 : vector<32x32xf32>
    %c8_247 = arith.constant 8 : index
    %c0_248 = arith.constant 0 : index
    %c0_249 = arith.constant 0 : index
    %512 = vector.load %arg6[%c8_247, %c0_248, %c0_249] : memref<10x1x32xf32, #tpu.memory_space<vmem>>, vector<1x1x32xf32>
    %513 = vector.shape_cast %512 : vector<1x1x32xf32> to vector<1x32xf32>
    %514 = vector.broadcast %513 : vector<1x32xf32> to vector<32x32xf32>
    %515 = arith.addf %511, %514 : vector<32x32xf32>
    %cst_250 = arith.constant dense<0.000000e+00> : vector<32xf32>
    %516 = vector.multi_reduction <add>, %515, %cst_250 [0] : vector<32x32xf32> to vector<32xf32>
    %517 = vector.shape_cast %516 : vector<32xf32> to vector<1x32xf32>
    %cst_251 = arith.constant 3.125000e-02 : f32
    %518 = vector.broadcast %cst_251 : f32 to vector<1x32xf32>
    %519 = arith.mulf %517, %518 : vector<1x32xf32>
    %520 = arith.mulf %515, %515 : vector<32x32xf32>
    %cst_252 = arith.constant dense<0.000000e+00> : vector<32xf32>
    %521 = vector.multi_reduction <add>, %520, %cst_252 [0] : vector<32x32xf32> to vector<32xf32>
    %522 = vector.shape_cast %521 : vector<32xf32> to vector<1x32xf32>
    %cst_253 = arith.constant 3.125000e-02 : f32
    %523 = vector.broadcast %cst_253 : f32 to vector<1x32xf32>
    %524 = arith.mulf %522, %523 : vector<1x32xf32>
    %525 = arith.mulf %519, %519 : vector<1x32xf32>
    %526 = arith.subf %524, %525 : vector<1x32xf32>
    %527 = vector.broadcast %519 : vector<1x32xf32> to vector<32x32xf32>
    %528 = arith.subf %515, %527 : vector<32x32xf32>
    %cst_254 = arith.constant 9.99999974E-6 : f32
    %529 = vector.broadcast %cst_254 : f32 to vector<1x32xf32>
    %530 = arith.addf %526, %529 : vector<1x32xf32>
    %531 = math.rsqrt %530 : vector<1x32xf32>
    %532 = vector.broadcast %531 : vector<1x32xf32> to vector<32x32xf32>
    %533 = arith.mulf %528, %532 : vector<32x32xf32>
    %c8_255 = arith.constant 8 : index
    %c0_256 = arith.constant 0 : index
    %c0_257 = arith.constant 0 : index
    %534 = vector.load %arg7[%c8_255, %c0_256, %c0_257] : memref<10x1x32xf32, #tpu.memory_space<vmem>>, vector<1x1x32xf32>
    %535 = vector.shape_cast %534 : vector<1x1x32xf32> to vector<1x32xf32>
    %536 = vector.broadcast %535 : vector<1x32xf32> to vector<32x32xf32>
    %537 = arith.mulf %533, %536 : vector<32x32xf32>
    %c8_258 = arith.constant 8 : index
    %c0_259 = arith.constant 0 : index
    %c0_260 = arith.constant 0 : index
    %538 = vector.load %arg8[%c8_258, %c0_259, %c0_260] : memref<10x1x32xf32, #tpu.memory_space<vmem>>, vector<1x1x32xf32>
    %539 = vector.shape_cast %538 : vector<1x1x32xf32> to vector<1x32xf32>
    %540 = vector.broadcast %539 : vector<1x32xf32> to vector<32x32xf32>
    %541 = arith.addf %537, %540 : vector<32x32xf32>
    %cst_261 = arith.constant 0.000000e+00 : f32
    %542 = vector.broadcast %cst_261 : f32 to vector<32x32xf32>
    %543 = arith.maximumf %541, %542 : vector<32x32xf32>
    %544 = arith.addf %423, %543 : vector<32x32xf32>
    %c9 = arith.constant 9 : index
    %c0_262 = arith.constant 0 : index
    %c0_263 = arith.constant 0 : index
    %545 = vector.load %arg2[%c9, %c0_262, %c0_263] : memref<10x32x64xf32, #tpu.memory_space<vmem>>, vector<1x32x64xf32>
    %546 = vector.shape_cast %545 : vector<1x32x64xf32> to vector<32x64xf32>
    %cst_264 = arith.constant dense<0.000000e+00> : vector<32x64xf32>
    %547 = tpu.matmul %544, %546, %cst_264 {dimension_numbers = #tpu.dot_dimension_numbers<[1], [0], [0], [1], [0, 0, 1, 1], [], []>} : vector<32x32xf32>, vector<32x64xf32>, vector<32x64xf32> -> vector<32x64xf32>
    %548 = vector.extract_strided_slice %547 {offsets = [0, 0], sizes = [32, 32], strides = [1, 1]} : vector<32x64xf32> to vector<32x32xf32>
    %549 = vector.extract_strided_slice %547 {offsets = [0, 32], sizes = [32, 32], strides = [1, 1]} : vector<32x64xf32> to vector<32x32xf32>
    %c9_265 = arith.constant 9 : index
    %c0_266 = arith.constant 0 : index
    %c0_267 = arith.constant 0 : index
    %550 = vector.load %arg3[%c9_265, %c0_266, %c0_267] : memref<10x96x32xf32, #tpu.memory_space<vmem>>, vector<1x96x32xf32>
    %551 = vector.shape_cast %550 : vector<1x96x32xf32> to vector<96x32xf32>
    %cst_268 = arith.constant dense<0.000000e+00> : vector<96x32xf32>
    %552 = tpu.matmul %551, %549, %cst_268 {dimension_numbers = #tpu.dot_dimension_numbers<[1], [0], [0], [1], [0, 0, 1, 1], [], []>} : vector<96x32xf32>, vector<32x32xf32>, vector<96x32xf32> -> vector<96x32xf32>
    %c9_269 = arith.constant 9 : index
    %c0_270 = arith.constant 0 : index
    %c0_271 = arith.constant 0 : index
    %553 = vector.load %arg4[%c9_269, %c0_270, %c0_271] : memref<10x32x32xf32, #tpu.memory_space<vmem>>, vector<1x32x32xf32>
    %554 = vector.shape_cast %553 : vector<1x32x32xf32> to vector<32x32xf32>
    %555 = arith.mulf %554, %548 : vector<32x32xf32>
    %c9_272 = arith.constant 9 : index
    %c0_273 = arith.constant 0 : index
    %c0_274 = arith.constant 0 : index
    %c0_275 = arith.constant 0 : index
    %556 = vector.load %arg5[%c9_272, %c0_273, %c0_274, %c0_275] : memref<10x3x32x32xf32, #tpu.memory_space<vmem>>, vector<1x3x32x32xf32>
    %557 = vector.shape_cast %556 : vector<1x3x32x32xf32> to vector<3x32x32xf32>
    %558 = vector.extract_strided_slice %557 {offsets = [0, 0, 0], sizes = [1, 32, 32], strides = [1, 1, 1]} : vector<3x32x32xf32> to vector<1x32x32xf32>
    %559 = vector.shape_cast %558 : vector<1x32x32xf32> to vector<32x32xf32>
    %560 = vector.extract_strided_slice %552 {offsets = [0, 0], sizes = [32, 32], strides = [1, 1]} : vector<96x32xf32> to vector<32x32xf32>
    %561 = arith.mulf %559, %560 : vector<32x32xf32>
    %562 = arith.addf %555, %561 : vector<32x32xf32>
    %563 = vector.extract_strided_slice %557 {offsets = [1, 0, 0], sizes = [1, 32, 32], strides = [1, 1, 1]} : vector<3x32x32xf32> to vector<1x32x32xf32>
    %564 = vector.shape_cast %563 : vector<1x32x32xf32> to vector<32x32xf32>
    %565 = vector.extract_strided_slice %552 {offsets = [32, 0], sizes = [32, 32], strides = [1, 1]} : vector<96x32xf32> to vector<32x32xf32>
    %566 = arith.mulf %564, %565 : vector<32x32xf32>
    %567 = arith.addf %562, %566 : vector<32x32xf32>
    %568 = vector.extract_strided_slice %557 {offsets = [2, 0, 0], sizes = [1, 32, 32], strides = [1, 1, 1]} : vector<3x32x32xf32> to vector<1x32x32xf32>
    %569 = vector.shape_cast %568 : vector<1x32x32xf32> to vector<32x32xf32>
    %570 = vector.extract_strided_slice %552 {offsets = [64, 0], sizes = [32, 32], strides = [1, 1]} : vector<96x32xf32> to vector<32x32xf32>
    %571 = arith.mulf %569, %570 : vector<32x32xf32>
    %572 = arith.addf %567, %571 : vector<32x32xf32>
    %c9_276 = arith.constant 9 : index
    %c0_277 = arith.constant 0 : index
    %c0_278 = arith.constant 0 : index
    %573 = vector.load %arg6[%c9_276, %c0_277, %c0_278] : memref<10x1x32xf32, #tpu.memory_space<vmem>>, vector<1x1x32xf32>
    %574 = vector.shape_cast %573 : vector<1x1x32xf32> to vector<1x32xf32>
    %575 = vector.broadcast %574 : vector<1x32xf32> to vector<32x32xf32>
    %576 = arith.addf %572, %575 : vector<32x32xf32>
    %c0_279 = arith.constant 0 : index
    %c0_280 = arith.constant 0 : index
    %577 = vector.load %arg9[%c0_279, %c0_280] : memref<32x32xf32, #tpu.memory_space<vmem>>, vector<32x32xf32>
    tpu.vector_store %arg9[%c0_279, %c0_280], %576 {strides = array<i32>} : memref<32x32xf32, #tpu.memory_space<vmem>>, vector<32x32xf32>,
    return
  }
  func.func @transform_0(%arg0: i32) -> (i32, i32) {
    %c0_i32 = arith.constant 0 : i32
    %c0_i32_0 = arith.constant 0 : i32
    %c0_i32_1 = arith.constant 0 : i32
    return %c0_i32, %c0_i32_0 : i32, i32
  }
  func.func @transform_1(%arg0: i32) -> (i32, i32, i32) {
    %c0_i32 = arith.constant 0 : i32
    %c0_i32_0 = arith.constant 0 : i32
    %c0_i32_1 = arith.constant 0 : i32
    %c0_i32_2 = arith.constant 0 : i32
    return %c0_i32, %c0_i32_0, %c0_i32_1 : i32, i32, i32
  }
  func.func @transform_2(%arg0: i32) -> (i32, i32, i32) {
    %c0_i32 = arith.constant 0 : i32
    %c0_i32_0 = arith.constant 0 : i32
    %c0_i32_1 = arith.constant 0 : i32
    %c0_i32_2 = arith.constant 0 : i32
    return %c0_i32, %c0_i32_0, %c0_i32_1 : i32, i32, i32
  }
  func.func @transform_3(%arg0: i32) -> (i32, i32, i32) {
    %c0_i32 = arith.constant 0 : i32
    %c0_i32_0 = arith.constant 0 : i32
    %c0_i32_1 = arith.constant 0 : i32
    %c0_i32_2 = arith.constant 0 : i32
    return %c0_i32, %c0_i32_0, %c0_i32_1 : i32, i32, i32
  }
  func.func @transform_4(%arg0: i32) -> (i32, i32, i32, i32) {
    %c0_i32 = arith.constant 0 : i32
    %c0_i32_0 = arith.constant 0 : i32
    %c0_i32_1 = arith.constant 0 : i32
    %c0_i32_2 = arith.constant 0 : i32
    %c0_i32_3 = arith.constant 0 : i32
    return %c0_i32, %c0_i32_0, %c0_i32_1, %c0_i32_2 : i32, i32, i32, i32
  }
  func.func @transform_5(%arg0: i32) -> (i32, i32, i32) {
    %c0_i32 = arith.constant 0 : i32
    %c0_i32_0 = arith.constant 0 : i32
    %c0_i32_1 = arith.constant 0 : i32
    %c0_i32_2 = arith.constant 0 : i32
    return %c0_i32, %c0_i32_0, %c0_i32_1 : i32, i32, i32
  }
  func.func @transform_6(%arg0: i32) -> (i32, i32, i32) {
    %c0_i32 = arith.constant 0 : i32
    %c0_i32_0 = arith.constant 0 : i32
    %c0_i32_1 = arith.constant 0 : i32
    %c0_i32_2 = arith.constant 0 : i32
    return %c0_i32, %c0_i32_0, %c0_i32_1 : i32, i32, i32
  }
  func.func @transform_7(%arg0: i32) -> (i32, i32, i32) {
    %c0_i32 = arith.constant 0 : i32
    %c0_i32_0 = arith.constant 0 : i32
    %c0_i32_1 = arith.constant 0 : i32
    %c0_i32_2 = arith.constant 0 : i32
    return %c0_i32, %c0_i32_0, %c0_i32_1 : i32, i32, i32
  }
  func.func @transform_8(%arg0: i32) -> (i32, i32) {
    %c0_i32 = arith.constant 0 : i32
    %c0_i32_0 = arith.constant 0 : i32
    %c0_i32_1 = arith.constant 0 : i32
    return %c0_i32, %c0_i32_0 : i32, i32
  }
}

</mosaic_0001>

<bundles_post_ra>
// kernel: mmgcn_forward.1
= control target key start
LH: loop header
LB: loop body
LE: loop exit
PB: predicated region body
PF: predicated region fallthrough
CT: control target
= control target key end

     0   :  { %13 = vsyncpa [#allocation3], 0  ;;  %s5913_s0 = inlined_call_operand.vmem [shape: f32[32,32], index: 0, kind: input, shape index: {}]   ;;  %s5914_s1 = inlined_call_operand.hbm [shape: f32[10,32,64], index: 1, kind: input, shape index: {}]   ;;  %s5915_s2 = inlined_call_operand.hbm [shape: f32[10,96,32], index: 2, kind: input, shape index: {}]   ;;  %s5916_s3 = inlined_call_operand.hbm [shape: f32[10,32,32], index: 3, kind: input, shape index: {}]   ;;  %s5917_s4 = inlined_call_operand.hbm [shape: f32[10,3,32,32], index: 4, kind: input, shape index: {}]   ;;  %s5918_s5 = inlined_call_operand.vmem [shape: f32[10,1,32], index: 5, kind: input, shape index: {}]   ;;  %s5919_s6 = inlined_call_operand.vmem [shape: f32[10,1,32], index: 6, kind: input, shape index: {}]   ;;  %s5920_s7 = inlined_call_operand.vmem [shape: f32[10,1,32], index: 7, kind: input, shape index: {}]   ;;  %s5921_s8 = inlined_call_operand.vmem [shape: f32[32,32], index: 8, kind: output, shape index: {}]  }
   0x1   :  { %14 = vsyncpa [#allocation5], 0 }
   0x2   :  { %15 = vsyncpa [#allocation8], 0  ;;  %s5221_s27 = smov [#allocation4]   ;;  %s5222_s29 = smov [#allocation2]  }
   0x3   :  { %s35_s28 = sshll.u32 %s5221_s27, 4  ;;  %s23_s30 = sshll.u32 %s5222_s29, 4  ;;  %s36_s28 = int_to_ptr.vmem [resolvable:$true] %s35_s28  ;;  %s24_s30 = int_to_ptr.vmem [resolvable:$true] %s23_s30 }
   0x4   :  { %s5143_s9 = scalar_lea.vmem %s36_s28, 15360  ;;  %p5148_p1 = scmp.lt.s32.totalorder %s36_s28, %s36_s28 }
   0x5   :  { %p5144_p0 = scmp.ne.s32.totalorder %s36_s28, %s5143_s9  ;;  %p5149_p2 = scmp.lt.s32.totalorder %s5143_s9, %s5143_s9 }
   0x7   :  { %p5150_p3 = por %p5149_p2, %p5148_p1 }
   0x9   :  { %p5151_p4 = pnand %p5150_p3, %p5144_p0 }
   0xb   :  { %5154 = shalt.err (!%p5151_p4)
}
   0xc   :  { %s5223_s10 = smov 128   ;;  %s5224_s11 = smov 8  }
   0xd   :  { %41 = dma.hbm_to_vmem [thread:$0]  %s5915_s2, 15360, %s36_s28, [#allocation5], %s5223_s10, %s5223_s10, %s5224_s11  }
   0xe   :  { %s5163_s14 = scalar_lea.vmem %s24_s30, 5120  ;;  %p5168_p6 = scmp.lt.s32.totalorder %s24_s30, %s24_s30 }
   0xf   :  { %p5164_p5 = scmp.ne.s32.totalorder %s24_s30, %s5163_s14  ;;  %p5169_p7 = scmp.lt.s32.totalorder %s5163_s14, %s5163_s14 }
  0x11   :  { %p5170_p8 = por %p5169_p7, %p5168_p6 }
  0x13   :  { %p5171_p9 = pnand %p5170_p8, %p5164_p5 }
  0x15   :  { %5174 = shalt.err (!%p5171_p9)
}
  0x16   :  { %29 = dma.hbm_to_vmem [thread:$0]  %s5914_s1, 5120, %s24_s30, [#allocation3], %s5223_s10, %s5223_s10, %s5224_s11  }
  0x17   :  { %s5225_s17 = smov [#allocation6]   ;;  %s5226_s19 = smov [#allocation7]  }
  0x18   :  { %s47_s18 = sshll.u32 %s5225_s17, 4  ;;  %s59_s20 = sshll.u32 %s5226_s19, 4  ;;  %s48_s18 = int_to_ptr.vmem [resolvable:$true] %s47_s18  ;;  %s60_s20 = int_to_ptr.vmem [resolvable:$true] %s59_s20 }
  0x19   :  { %s5183_s2 = scalar_lea.vmem %s48_s18, 5120  ;;  %p5188_p11 = scmp.lt.s32.totalorder %s48_s18, %s48_s18 }
  0x1a   :  { %p5184_p10 = scmp.ne.s32.totalorder %s48_s18, %s5183_s2  ;;  %p5189_p12 = scmp.lt.s32.totalorder %s5183_s2, %s5183_s2 }
  0x1c   :  { %p5190_p13 = por %p5189_p12, %p5188_p11 }
  0x1e   :  { %p5191_p0 = pnand %p5190_p13, %p5184_p10 }
  0x20   :  { %5194 = shalt.err (!%p5191_p0)
}
  0x21   :  { %53 = dma.hbm_to_vmem [thread:$0]  %s5916_s3, 5120, %s48_s18, [#allocation5], %s5223_s10, %s5223_s10, %s5224_s11  }
  0x22   :  { %s5203_s1 = scalar_lea.vmem %s60_s20, 15360  ;;  %p5208_p2 = scmp.lt.s32.totalorder %s60_s20, %s60_s20 }
  0x23   :  { %p5204_p1 = scmp.ne.s32.totalorder %s60_s20, %s5203_s1  ;;  %p5209_p3 = scmp.lt.s32.totalorder %s5203_s1, %s5203_s1 }
  0x25   :  { %p5210_p4 = por %p5209_p3, %p5208_p2 }
  0x27   :  { %p5211_p5 = pnand %p5210_p4, %p5204_p1 }
  0x29   :  { %5214 = shalt.err (!%p5211_p5)
}
  0x2a   :  { %65 = dma.hbm_to_vmem [thread:$0]  %s5917_s4, 15360, %s60_s20, [#allocation8], %s5223_s10, %s5223_s10, %s5224_s11  }
  0x2b   :  { %5215 = dma.done.wait [#allocation3], 5120  }
  0x2c   :  { %5216 = vsyncadd [#allocation3], 4294962176 }
  0x2d   :  { %5217 = dma.done.wait [#allocation5], 20480  }
  0x2e   :  { %5218 = vsyncadd [#allocation5], 4294946816 }
  0x2f   :  { %5219 = dma.done.wait [#allocation8], 15360  }
  0x30   :  { %5220 = vsyncadd [#allocation8], 4294951936  ;;  %vm92_vm0 = vcmask 261120   ;;  %v91_v0 = vld [vmem:[#allocation2 + $0x18] sm:$0xff]  ;;  %v90_v1 = vld [vmem:[#allocation2 + $0x10] sm:$0xff]  ;;  %s5227_s9 = smov 96  }
  0x31   :  { %4710 = vmatprep.subr.mxu1 %v91_v0  ;;  %v84_v2 = vld [vmem:[%s5913_s0] sm:$0xff]  ;;  %v89_v3 = vld [vmem:[#allocation2 + $0x8] sm:$0xff]  ;;  %v86_v6 = vld [vmem:[%s5913_s0 + $0x10] sm:$0xff] }
  0x32   :  { %4711 = vmatpush3.msra.mxu1 %v91_v0  ;;  %4718 = vmatprep.mubr.msk.f32.mxu1 %vm92_vm0, %v84_v2  ;;  %v88_v4 = vld [vmem:[#allocation2] sm:$0xff]  ;;  %v85_v5 = vld [vmem:[%s5913_s0 + $0x8] sm:$0xff]  ;;  %v87_v7 = vld [vmem:[%s5913_s0 + $0x18] sm:$0xff] }
  0x33   :  { %4712 = vmatprep.subr.mxu1 %v90_v1  ;;  %v190_v9 = vld [vmem:[#allocation4] sm:$0xff]  ;;  %v191_v17 = vld [vmem:[#allocation4 + $0x8] sm:$0xff]  ;;  %v192_v18 = vld [vmem:[#allocation4 + $0x10] sm:$0xff] }
  0x34   :  { %4713 = vmatpush3.msra.mxu1 %v90_v1  ;;  %v193_v19 = vld [vmem:[#allocation4 + $0x18] sm:$0xff]  ;;  %v194_v20 = vld [vmem:[#allocation4 + $0x20] sm:$0xff]  ;;  %v195_v21 = vld [vmem:[#allocation4 + $0x28] sm:$0xff] }
  0x35   :  { %4714 = vmatprep.subr.mxu1 %v89_v3  ;;  %v196_v22 = vld [vmem:[#allocation4 + $0x30] sm:$0xff]  ;;  %v197_v23 = vld [vmem:[#allocation4 + $0x38] sm:$0xff]  ;;  %v198_v24 = vld [vmem:[#allocation4 + $0x40] sm:$0xff] }
  0x36   :  { %4715 = vmatpush3.msra.mxu1 %v89_v3  ;;  %v199_v25 = vld [vmem:[#allocation4 + $0x48] sm:$0xff]  ;;  %v200_v26 = vld [vmem:[#allocation4 + $0x50] sm:$0xff]  ;;  %v201_v27 = vld [vmem:[#allocation4 + $0x58] sm:$0xff] }
  0x37   :  { %4716 = vmatprep.subr.mxu1 %v88_v4  ;;  %v508_v28 = vld [vmem:[#allocation2 + $0x38] sm:$0xff]  ;;  %v507_v29 = vld [vmem:[#allocation2 + $0x30] sm:$0xff]  ;;  %v506_v30 = vld [vmem:[#allocation2 + $0x28] sm:$0xff] }
  0x38   :  { %4717 = vmatpush3.msra.mxu1 %v88_v4  ;;  %4750 = vmatprep.subr.mxu0 %v508_v28  ;;  %v505_v31 = vld [vmem:[#allocation2 + $0x20] sm:$0xff]  ;;  %v388_v36 = vld [vmem:[#allocation7 + $0x8] sm:$0xff]  ;;  %v390_v44 = vld [vmem:[#allocation7 + $0x18] sm:$0xff] }
  0x39   :  { %4719 = vmatmul.mubr.msk.f32.vlgmr.msra.gmra.mxu1 %vm92_vm0, %v85_v5  ;;  %4751 = vmatpush3.msra.mxu0 %v508_v28  ;;  %v380_v38 = vld [vmem:[#allocation6 + $0x8] sm:$0xff]  ;;  %v387_v39 = vld [vmem:[#allocation7] sm:$0xff]  ;;  %v382_v48 = vld [vmem:[#allocation6 + $0x18] sm:$0xff] }
  0x3a   :  { %4721 = vmatprep.mubr.msk.f32.mxu1 %vm92_vm0, %v86_v6  ;;  %4752 = vmatprep.subr.mxu0 %v507_v29  ;;  %v392_v40 = vld [vmem:[#allocation7 + $0x28] sm:$0xff]  ;;  %v379_v43 = vld [vmem:[#allocation6] sm:$0xff]  ;;  %v394_v51 = vld [vmem:[#allocation7 + $0x38] sm:$0xff] }
  0x3b   :  { %4753 = vmatpush3.msra.mxu0 %v507_v29  ;;  %v391_v45 = vld [vmem:[#allocation7 + $0x20] sm:$0xff]  ;;  %v396_v53 = vld [vmem:[#allocation7 + $0x48] sm:$0xff]  ;;  %v389_v57 = vld [vmem:[#allocation7 + $0x10] sm:$0xff] }
  0x3c   :  { %4754 = vmatprep.subr.mxu0 %v506_v30  ;;  %v395_v61 = vld [vmem:[#allocation7 + $0x40] sm:$0xff]  ;;  %v381_v62 = vld [vmem:[#allocation6 + $0x10] sm:$0xff] }
  0x3d   :  { %4722 = vmatmul.mubr.msk.f32.gmra.mxu1 %vm92_vm0, %v87_v7  ;;  %4755 = vmatpush3.msra.mxu0 %v506_v30  ;;  %v393_v2 = vld [vmem:[#allocation7 + $0x30] sm:$0xff]  ;;  %v4273_v5 = vld [vmem:[%s5918_s5] ss:$0 sm:$0xff]  ;;  %v398_v7 = vld [vmem:[#allocation7 + $0x58] sm:$0xff] }
  0x3e   :  { %4732 = vmatprep.mubr.msk.f32.mxu1 %vm92_vm0, %v190_v9  ;;  %4756 = vmatprep.subr.mxu0 %v505_v31 }
  0x3f   :  { %4757 = vmatpush3.msra.mxu0 %v505_v31 }
  0xf9   :  { %v5313_v8 = vpop.f32.mrf.mxu1 }
  0xfa   :  { %208 = vrot.lane.b32.xlu1 %v5313_v8, %s5227_s9  ;;  %v384_v47 = vmul.f32 %v5313_v8, %v380_v38 }
  0xfb   :  { %v5318_v10 = vpop.f32.mrf.mxu1 }
  0xfc   :  { %v383_v54 = vmul.f32 %v379_v43, %v5318_v10 }
  0xfd   :  { %v5320_v11 = vpop.f32.mrf.mxu1 }
  0xfe   :  { %206 = vrot.lane.b32.xlu1 %v5318_v10, %s5227_s9  ;;  %212 = vrot.lane.b32.xlu0 %v5320_v11, %s5227_s9  ;;  %v386_v59 = vmul.f32 %v5320_v11, %v382_v48 }
  0xff   :  { %v5326_v12 = vpop.f32.mrf.mxu1 }
 0x100   :  { %v385_v11 = vmul.f32 %v381_v62, %v5326_v12 }
 0x102   :  { %210 = vrot.lane.b32.xlu0 %v5326_v12, %s5227_s9 }
 0x16c   :  { %v209_v14 = vpop.permute.xlu1 %208 }
 0x170   :  { %v213_v13 = vpop.permute.xlu0 %212  ;;  %v207_v16 = vpop.permute.xlu1 %206 }
 0x171   :  { %4724 = vmatprep.subr.mxu1 %v213_v13 }
 0x172   :  { %4725 = vmatpush3.msra.mxu1 %v213_v13 }
 0x174   :  { %v211_v15 = vpop.permute.xlu0 %210 }
 0x175   :  { %4726 = vmatprep.subr.mxu1 %v211_v15 }
 0x176   :  { %4727 = vmatpush3.msra.mxu1 %v211_v15 }
 0x177   :  { %4728 = vmatprep.subr.mxu1 %v209_v14 }
 0x178   :  { %4729 = vmatpush3.msra.mxu1 %v209_v14 }
 0x179   :  { %4730 = vmatprep.subr.mxu1 %v207_v16 }
 0x17a   :  { %4731 = vmatpush3.msra.mxu1 %v207_v16 }
 0x17b   :  { %4733 = vmatmul.mubr.msk.f32.vlgmr.msra.gmra.mxu1 %vm92_vm0, %v191_v17 }
 0x17c   :  { %4735 = vmatprep.mubr.msk.f32.mxu1 %vm92_vm0, %v192_v18 }
 0x17f   :  { %4736 = vmatmul.mubr.msk.f32.gmra.mxu1 %vm92_vm0, %v193_v19 }
 0x180   :  { %4738 = vmatprep.mubr.msk.f32.mxu1 %vm92_vm0, %v194_v20  ;;  %v397_v20 = vld [vmem:[#allocation7 + $0x50] sm:$0xff] }
 0x183   :  { %4739 = vmatmul.mubr.msk.f32.gmra.mxu1 %vm92_vm0, %v195_v21 }
 0x184   :  { %4741 = vmatprep.mubr.msk.f32.mxu1 %vm92_vm0, %v196_v22 }
 0x187   :  { %4742 = vmatmul.mubr.msk.f32.gmra.mxu1 %vm92_vm0, %v197_v23 }
 0x188   :  { %4744 = vmatprep.mubr.msk.f32.mxu1 %vm92_vm0, %v198_v24 }
 0x18b   :  { %4745 = vmatmul.mubr.msk.f32.gmra.mxu1 %vm92_vm0, %v199_v25 }
 0x18c   :  { %4747 = vmatprep.mubr.msk.f32.mxu1 %vm92_vm0, %v200_v26 }
 0x18f   :  { %4748 = vmatmul.mubr.msk.f32.gmra.mxu1 %vm92_vm0, %v201_v27 }
 0x23b   :  { %v4734_v32 = vpop.f32.mrf.mxu1 }
 0x23c   :  { %v400_v42 = vmul.f32 %v4734_v32, %v388_v36 }
 0x23d   :  { %v320_v33 = vpop.f32.mrf.mxu1 }
 0x23e   :  { %v399_v49 = vmul.f32 %v387_v39, %v320_v33  ;;  %v404_v55 = vadd.f32 %v400_v42, %v384_v47 }
 0x23f   :  { %v4737_v34 = vpop.f32.mrf.mxu1 }
 0x240   :  { %v402_v56 = vmul.f32 %v4737_v34, %v390_v44  ;;  %v403_v63 = vadd.f32 %v399_v49, %v383_v54 }
 0x241   :  { %v330_v35 = vpop.f32.mrf.mxu1 }
 0x242   :  { %v401_v4 = vmul.f32 %v389_v57, %v330_v35  ;;  %v406_v8 = vadd.f32 %v402_v56, %v386_v59 }
 0x243   :  { %v4740_v37 = vpop.f32.mrf.mxu1 }
 0x244   :  { %v408_v50 = vmul.f32 %v4740_v37, %v392_v40  ;;  %v405_v21 = vadd.f32 %v401_v4, %v385_v11 }
 0x245   :  { %v340_v41 = vpop.f32.mrf.mxu1 }
 0x246   :  { %v407_v58 = vmul.f32 %v391_v45, %v340_v41  ;;  %v412_v0 = vadd.f32 %v408_v50, %v404_v55 }
 0x247   :  { %v4743_v46 = vpop.f32.mrf.mxu1 }
 0x248   :  { %v410_v1 = vmul.f32 %v4743_v46, %v394_v51  ;;  %v411_v9 = vadd.f32 %v407_v58, %v403_v63 }
 0x249   :  { %v350_v52 = vpop.f32.mrf.mxu1 }
 0x24a   :  { %v409_v14 = vmul.f32 %v393_v2, %v350_v52  ;;  %v414_v16 = vadd.f32 %v410_v1, %v406_v8 }
 0x24b   :  { %v4746_v60 = vpop.f32.mrf.mxu1 }
 0x24c   :  { %v416_v3 = vmul.f32 %v4746_v60, %v396_v53  ;;  %v413_v26 = vadd.f32 %v409_v14, %v405_v21 }
 0x24d   :  { %v360_v6 = vpop.f32.mrf.mxu1 }
 0x24e   :  { %v420_v10 = vadd.f32 %v416_v3, %v412_v0  ;;  %v415_v13 = vmul.f32 %v395_v61, %v360_v6 }
 0x24f   :  { %v4749_v15 = vpop.f32.mrf.mxu1 }
 0x250   :  { %v431_v17 = vadd.f32 %v4273_v5, %v420_v10  ;;  %v419_v18 = vadd.f32 %v415_v13, %v411_v9  ;;  %v418_v19 = vmul.f32 %v4749_v15, %v398_v7  ;;  %v4275_v10 = vld [vmem:[%s5920_s7] ss:$0 sm:$0xff] }
 0x251   :  { %v370_v22 = vpop.f32.mrf.mxu1 }
 0x252   :  { %v449_v23 = vmul.f32 %v431_v17, %v431_v17  ;;  %v430_v24 = vadd.f32 %v4273_v5, %v419_v18  ;;  %v422_v25 = vadd.f32 %v418_v19, %v414_v16  ;;  %v417_v27 = vmul.f32 %v397_v20, %v370_v22 }
 0x253   :  { %v435_v28 = vsel %vm92_vm0, %v431_v17, 0.0 }
 0x254   :  { %v434_v29 = vsel %vm92_vm0, %v430_v24, 0.0  ;;  %v448_v30 = vmul.f32 %v430_v24, %v430_v24  ;;  %v433_v31 = vadd.f32 %v4273_v5, %v422_v25  ;;  %v421_v32 = vadd.f32 %v417_v27, %v413_v26 }
 0x255   :  { %v436_v12 = vadd.f32 %v435_v28, %v434_v29  ;;  %v453_v33 = vsel %vm92_vm0, %v449_v23, 0.0 }
 0x256   :  { %v452_v34 = vsel %vm92_vm0, %v448_v30, 0.0  ;;  %v432_v36 = vadd.f32 %v4273_v5, %v421_v32  ;;  %v451_v37 = vmul.f32 %v433_v31, %v433_v31  ;;  %v439_v41 = vsel %vm92_vm0, %v433_v31, 0.0  ;;  %v4274_v5 = vld [vmem:[%s5919_s6] ss:$0 sm:$0xff]  ;;  %v608_v32 = vld [vmem:[#allocation4 + $0x68] sm:$0xff] }
 0x257   :  { %v454_v35 = vadd.f32 %v453_v33, %v452_v34  ;;  %v609_v33 = vld [vmem:[#allocation4 + $0x70] sm:$0xff]  ;;  %v610_v34 = vld [vmem:[#allocation4 + $0x78] sm:$0xff] }
 0x258   :  { %v437_v38 = vsel %vm92_vm0, %v432_v36, 0.0  ;;  %v450_v39 = vmul.f32 %v432_v36, %v432_v36  ;;  %v457_v45 = vsel %vm92_vm0, %v451_v37, 0.0  ;;  %v613_v37 = vld [vmem:[#allocation4 + $0x90] sm:$0xff] }
 0x259   :  { %v438_v40 = vadd.f32 %v437_v38, %v436_v12  ;;  %v614_v38 = vld [vmem:[#allocation4 + $0x98] sm:$0xff] }
 0x25a   :  { %v455_v42 = vsel %vm92_vm0, %v450_v39, 0.0  ;;  %v615_v39 = vld [vmem:[#allocation4 + $0xa0] sm:$0xff] }
 0x25b   :  { %v440_v43 = vadd.f32 %v439_v41, %v438_v40  ;;  %v456_v44 = vadd.f32 %v455_v42, %v454_v35  ;;  %v611_v35 = vld [vmem:[#allocation4 + $0x80] sm:$0xff]  ;;  %v616_v40 = vld [vmem:[#allocation4 + $0xa8] sm:$0xff]  ;;  %v617_v41 = vld [vmem:[#allocation4 + $0xb0] sm:$0xff] }
 0x25c   :  { %v618_v42 = vld [vmem:[#allocation4 + $0xb8] sm:$0xff] }
 0x25d   :  { %v441_v46 = vrot.slane %v440_v43, 4  ;;  %v458_v47 = vadd.f32 %v457_v45, %v456_v44  ;;  %v929_v44 = vld [vmem:[#allocation2 + $0x50] sm:$0xff]  ;;  %v928_v45 = vld [vmem:[#allocation2 + $0x48] sm:$0xff] }
 0x25f   :  { %v442_v48 = vadd.f32 %v441_v46, %v440_v43  ;;  %v459_v49 = vrot.slane %v458_v47, 4  ;;  %v930_v43 = vld [vmem:[#allocation2 + $0x58] sm:$0xff]  ;;  %v927_v46 = vld [vmem:[#allocation2 + $0x40] sm:$0xff] }
 0x260   :  { %4790 = vmatprep.subr.mxu1 %v930_v43 }
 0x261   :  { %v443_v50 = vrot.slane %v442_v48, 2  ;;  %v460_v51 = vadd.f32 %v459_v49, %v458_v47  ;;  %4791 = vmatpush3.msra.mxu1 %v930_v43  ;;  %v816_v43 = vld [vmem:[#allocation7 + $0xb0] sm:$0xff] }
 0x262   :  { %4792 = vmatprep.subr.mxu1 %v929_v44 }
 0x263   :  { %v444_v52 = vadd.f32 %v443_v50, %v442_v48  ;;  %v461_v53 = vrot.slane %v460_v51, 2  ;;  %4793 = vmatpush3.msra.mxu1 %v929_v44 }
 0x264   :  { %4794 = vmatprep.subr.mxu1 %v928_v45 }
 0x265   :  { %v445_v54 = vrot.slane %v444_v52, 1  ;;  %v462_v55 = vadd.f32 %v461_v53, %v460_v51  ;;  %4795 = vmatpush3.msra.mxu1 %v928_v45  ;;  %v807_v51 = vld [vmem:[#allocation7 + $0x68] sm:$0xff] }
 0x266   :  { %4796 = vmatprep.subr.mxu1 %v927_v46  ;;  %v798_v53 = vld [vmem:[#allocation6 + $0x28] sm:$0xff] }
 0x267   :  { %v446_v56 = vadd.f32 %v445_v54, %v444_v52  ;;  %v463_v57 = vrot.slane %v462_v55, 1  ;;  %4797 = vmatpush3.msra.mxu1 %v927_v46  ;;  %v806_v54 = vld [vmem:[#allocation7 + $0x60] sm:$0xff] }
 0x269   :  { %v447_v58 = vmul.f32 0.03125, %v446_v56  ;;  %v464_v59 = vadd.f32 %v463_v57, %v462_v55  ;;  %v811_v55 = vld [vmem:[#allocation7 + $0x88] sm:$0xff] }
 0x26b   :  { %v465_v60 = vmul.f32 0.03125, %v464_v59  ;;  %v466_v61 = vmul.f32 %v447_v58, %v447_v58  ;;  %v468_v62 = vsub.f32 %v430_v24, %v447_v58  ;;  %v469_v63 = vsub.f32 %v431_v17, %v447_v58  ;;  %v607_v24 = vld [vmem:[#allocation4 + $0x60] sm:$0xff]  ;;  %v809_v59 = vld [vmem:[#allocation7 + $0x78] sm:$0xff] }
 0x26c   :  { %v471_v0 = vsub.f32 %v433_v31, %v447_v58  ;;  %v470_v3 = vsub.f32 %v432_v36, %v447_v58  ;;  %v612_v36 = vld [vmem:[#allocation4 + $0x88] sm:$0xff]  ;;  %v797_v58 = vld [vmem:[#allocation6 + $0x20] sm:$0xff] }
 0x26d   :  { %v467_v1 = vsub.f32 %v465_v60, %v466_v61  ;;  %v810_v60 = vld [vmem:[#allocation7 + $0x80] sm:$0xff] }
 0x26f   :  { %v472_v2 = vadd.f32 1e-05, %v467_v1 }
 0x271   :  { %5117 = vrsqrt.f32 %v472_v2  ;;  %v813_v2 = vld [vmem:[#allocation7 + $0x98] sm:$0xff] }
 0x27e   :  { %v5118_v4 = vpop.eup %5117 }
 0x27f   :  { %v476_v6 = vmul.f32 %v5118_v4, %v470_v3  ;;  %v474_v7 = vmul.f32 %v5118_v4, %v468_v62  ;;  %v475_v8 = vmul.f32 %v5118_v4, %v469_v63  ;;  %v477_v9 = vmul.f32 %v5118_v4, %v471_v0  ;;  %v800_v63 = vld [vmem:[#allocation6 + $0x38] sm:$0xff]  ;;  %v815_v4 = vld [vmem:[#allocation7 + $0xa8] sm:$0xff] }
 0x281   :  { %v485_v13 = vmul.f32 %v4274_v5, %v474_v7  ;;  %v486_v11 = vmul.f32 %v4274_v5, %v475_v8  ;;  %v487_v14 = vmul.f32 %v4274_v5, %v476_v6  ;;  %v488_v15 = vmul.f32 %v4274_v5, %v477_v9  ;;  %v808_v8 = vld [vmem:[#allocation7 + $0x70] sm:$0xff] }
 0x283   :  { %v5362_v16 = vadd.f32 %v4275_v10, %v485_v13  ;;  %v5364_v17 = vadd.f32 %v4275_v10, %v486_v11  ;;  %v5366_v18 = vadd.f32 %v4275_v10, %v487_v14  ;;  %v5370_v21 = vadd.f32 %v4275_v10, %v488_v15  ;;  %v814_v11 = vld [vmem:[#allocation7 + $0xa0] sm:$0xff]  ;;  %v799_v14 = vld [vmem:[#allocation6 + $0x30] sm:$0xff] }
 0x285   :  { %v500_v19 = vmax.f32 %v5362_v16, 0.0  ;;  %v501_v20 = vmax.f32 %v5364_v17, 0.0  ;;  %v502_v22 = vmax.f32 %v5366_v18, 0.0  ;;  %v503_v23 = vmax.f32 %v5370_v21, 0.0  ;;  %v1455_v17 = vld [vmem:[#allocation4 + $0x120] sm:$0xff] }
 0x287   :  { %4758 = vmatprep.mubr.msk.f32.mxu0 %vm92_vm0, %v500_v19 }
 0x288   :  { %4759 = vmatmul.mubr.msk.f32.vlgmr.msra.gmra.mxu0 %vm92_vm0, %v501_v20 }
 0x289   :  { %4761 = vmatprep.mubr.msk.f32.mxu0 %vm92_vm0, %v502_v22 }
 0x28c   :  { %4762 = vmatmul.mubr.msk.f32.gmra.mxu0 %vm92_vm0, %v503_v23 }
 0x28d   :  { %4772 = vmatprep.mubr.msk.f32.mxu0 %vm92_vm0, %v607_v24 }
 0x348   :  { %v5386_v25 = vpop.f32.mrf.mxu0 }
 0x349   :  { %v802_v62 = vmul.f32 %v5386_v25, %v798_v53 }
 0x34a   :  { %v5389_v26 = vpop.f32.mrf.mxu0 }
 0x34b   :  { %v801_v5 = vmul.f32 %v797_v58, %v5389_v26 }
 0x34c   :  { %v5391_v27 = vpop.f32.mrf.mxu0 }
 0x34d   :  { %629 = vrot.lane.b32.xlu0 %v5391_v27, %s5227_s9  ;;  %v804_v10 = vmul.f32 %v5391_v27, %v800_v63 }
 0x34e   :  { %v5395_v28 = vpop.f32.mrf.mxu0 }
 0x34f   :  { %627 = vrot.lane.b32.xlu1 %v5395_v28, %s5227_s9  ;;  %v803_v27 = vmul.f32 %v799_v14, %v5395_v28 }
 0x351   :  { %625 = vrot.lane.b32.xlu0 %v5386_v25, %s5227_s9 }
 0x353   :  { %623 = vrot.lane.b32.xlu1 %v5389_v26, %s5227_s9 }
 0x3bf   :  { %v630_v29 = vpop.permute.xlu0 %629 }
 0x3c0   :  { %4764 = vmatprep.subr.mxu0 %v630_v29 }
 0x3c1   :  { %4765 = vmatpush3.msra.mxu0 %v630_v29  ;;  %v628_v30 = vpop.permute.xlu1 %627  ;;  %v812_v29 = vld [vmem:[#allocation7 + $0x90] sm:$0xff] }
 0x3c2   :  { %4766 = vmatprep.subr.mxu0 %v628_v30 }
 0x3c3   :  { %v626_v12 = vpop.permute.xlu0 %625  ;;  %4767 = vmatpush3.msra.mxu0 %v628_v30 }
 0x3c4   :  { %4768 = vmatprep.subr.mxu0 %v626_v12 }
 0x3c5   :  { %4769 = vmatpush3.msra.mxu0 %v626_v12  ;;  %v624_v31 = vpop.permute.xlu1 %623 }
 0x3c6   :  { %4770 = vmatprep.subr.mxu0 %v624_v31 }
 0x3c7   :  { %4771 = vmatpush3.msra.mxu0 %v624_v31  ;;  %v4293_v31 = vld [vmem:[%s5918_s5 + $0x1] ss:$0 sm:$0xff] }
 0x3c8   :  { %4773 = vmatmul.mubr.msk.f32.vlgmr.msra.gmra.mxu0 %vm92_vm0, %v608_v32  ;;  %v817_v32 = vld [vmem:[#allocation7 + $0xb8] sm:$0xff] }
 0x3c9   :  { %4775 = vmatprep.mubr.msk.f32.mxu0 %vm92_vm0, %v609_v33 }
 0x3cc   :  { %4776 = vmatmul.mubr.msk.f32.gmra.mxu0 %vm92_vm0, %v610_v34 }
 0x3cd   :  { %4778 = vmatprep.mubr.msk.f32.mxu0 %vm92_vm0, %v611_v35 }
 0x3d0   :  { %4779 = vmatmul.mubr.msk.f32.gmra.mxu0 %vm92_vm0, %v612_v36 }
 0x3d1   :  { %4781 = vmatprep.mubr.msk.f32.mxu0 %vm92_vm0, %v613_v37 }
 0x3d4   :  { %4782 = vmatmul.mubr.msk.f32.gmra.mxu0 %vm92_vm0, %v614_v38 }
 0x3d5   :  { %4784 = vmatprep.mubr.msk.f32.mxu0 %vm92_vm0, %v615_v39 }
 0x3d8   :  { %4785 = vmatmul.mubr.msk.f32.gmra.mxu0 %vm92_vm0, %v616_v40 }
 0x3d9   :  { %4787 = vmatprep.mubr.msk.f32.mxu0 %vm92_vm0, %v617_v41 }
 0x3dc   :  { %4788 = vmatmul.mubr.msk.f32.gmra.mxu0 %vm92_vm0, %v618_v42 }
 0x488   :  { %v4774_v47 = vpop.f32.mrf.mxu0 }
 0x489   :  { %v819_v57 = vmul.f32 %v4774_v47, %v807_v51 }
 0x48a   :  { %v737_v48 = vpop.f32.mrf.mxu0 }
 0x48b   :  { %v818_v0 = vmul.f32 %v806_v54, %v737_v48  ;;  %v823_v6 = vadd.f32 %v819_v57, %v802_v62 }
 0x48c   :  { %v4777_v49 = vpop.f32.mrf.mxu0 }
 0x48d   :  { %v821_v7 = vmul.f32 %v4777_v49, %v809_v59  ;;  %v822_v15 = vadd.f32 %v818_v0, %v801_v5 }
 0x48e   :  { %v747_v50 = vpop.f32.mrf.mxu0 }
 0x48f   :  { %v820_v12 = vmul.f32 %v808_v8, %v747_v50  ;;  %v825_v33 = vadd.f32 %v821_v7, %v804_v10 }
 0x490   :  { %v4780_v52 = vpop.f32.mrf.mxu0 }
 0x491   :  { %v827_v1 = vmul.f32 %v4780_v52, %v811_v55  ;;  %v824_v44 = vadd.f32 %v820_v12, %v803_v27 }
 0x492   :  { %v757_v56 = vpop.f32.mrf.mxu0 }
 0x493   :  { %v826_v9 = vmul.f32 %v810_v60, %v757_v56  ;;  %v831_v24 = vadd.f32 %v827_v1, %v823_v6 }
 0x494   :  { %v4783_v61 = vpop.f32.mrf.mxu0 }
 0x495   :  { %v829_v25 = vmul.f32 %v4783_v61, %v813_v2  ;;  %v830_v34 = vadd.f32 %v826_v9, %v822_v15 }
 0x496   :  { %v767_v3 = vpop.f32.mrf.mxu0 }
 0x497   :  { %v828_v37 = vmul.f32 %v812_v29, %v767_v3  ;;  %v833_v39 = vadd.f32 %v829_v25, %v825_v33 }
 0x498   :  { %v4786_v13 = vpop.f32.mrf.mxu0 }
 0x499   :  { %v835_v30 = vmul.f32 %v4786_v13, %v815_v4  ;;  %v832_v49 = vadd.f32 %v828_v37, %v824_v44  ;;  %v4295_v37 = vld [vmem:[%s5919_s6 + $0x1] ss:$0 sm:$0xff] }
 0x49a   :  { %v777_v26 = vpop.f32.mrf.mxu0 }
 0x49b   :  { %v839_v35 = vadd.f32 %v835_v30, %v831_v24  ;;  %v834_v36 = vmul.f32 %v814_v11, %v777_v26 }
 0x49c   :  { %v4789_v38 = vpop.f32.mrf.mxu0 }
 0x49d   :  { %v851_v40 = vadd.f32 %v4293_v31, %v839_v35  ;;  %v838_v41 = vadd.f32 %v834_v36, %v830_v34  ;;  %v837_v42 = vmul.f32 %v4789_v38, %v817_v32 }
 0x49e   :  { %v787_v45 = vpop.f32.mrf.mxu0 }
 0x49f   :  { %v869_v46 = vmul.f32 %v851_v40, %v851_v40  ;;  %v850_v47 = vadd.f32 %v4293_v31, %v838_v41  ;;  %v841_v48 = vadd.f32 %v837_v42, %v833_v39  ;;  %v836_v50 = vmul.f32 %v816_v43, %v787_v45  ;;  %v4297_v43 = vld [vmem:[%s5920_s7 + $0x1] ss:$0 sm:$0xff] }
 0x4a0   :  { %v855_v51 = vsel %vm92_vm0, %v851_v40, 0.0 }
 0x4a1   :  { %v854_v52 = vsel %vm92_vm0, %v850_v47, 0.0  ;;  %v868_v53 = vmul.f32 %v850_v47, %v850_v47  ;;  %v853_v54 = vadd.f32 %v4293_v31, %v841_v48  ;;  %v840_v55 = vadd.f32 %v836_v50, %v832_v49 }
 0x4a2   :  { %v856_v28 = vadd.f32 %v855_v51, %v854_v52  ;;  %v873_v56 = vsel %vm92_vm0, %v869_v46, 0.0 }
 0x4a3   :  { %v872_v57 = vsel %vm92_vm0, %v868_v53, 0.0  ;;  %v852_v59 = vadd.f32 %v4293_v31, %v840_v55  ;;  %v871_v60 = vmul.f32 %v853_v54, %v853_v54  ;;  %v859_v0 = vsel %vm92_vm0, %v853_v54, 0.0 }
 0x4a4   :  { %v874_v58 = vadd.f32 %v873_v56, %v872_v57 }
 0x4a5   :  { %v857_v61 = vsel %vm92_vm0, %v852_v59, 0.0  ;;  %v870_v62 = vmul.f32 %v852_v59, %v852_v59  ;;  %v877_v4 = vsel %vm92_vm0, %v871_v60, 0.0 }
 0x4a6   :  { %v858_v63 = vadd.f32 %v857_v61, %v856_v28 }
 0x4a7   :  { %v875_v1 = vsel %vm92_vm0, %v870_v62, 0.0 }
 0x4a8   :  { %v860_v2 = vadd.f32 %v859_v0, %v858_v63  ;;  %v876_v3 = vadd.f32 %v875_v1, %v874_v58  ;;  %v1030_v63 = vld [vmem:[#allocation4 + $0xc8] sm:$0xff]  ;;  %v1031_v0 = vld [vmem:[#allocation4 + $0xd0] sm:$0xff]  ;;  %v1032_v1 = vld [vmem:[#allocation4 + $0xd8] sm:$0xff] }
 0x4aa   :  { %v861_v5 = vrot.slane %v860_v2, 4  ;;  %v878_v6 = vadd.f32 %v877_v4, %v876_v3  ;;  %v1034_v3 = vld [vmem:[#allocation4 + $0xe8] sm:$0xff]  ;;  %v1035_v4 = vld [vmem:[#allocation4 + $0xf0] sm:$0xff] }
 0x4ac   :  { %v862_v7 = vadd.f32 %v861_v5, %v860_v2  ;;  %v879_v8 = vrot.slane %v878_v6, 4  ;;  %v1033_v2 = vld [vmem:[#allocation4 + $0xe0] sm:$0xff]  ;;  %v1036_v5 = vld [vmem:[#allocation4 + $0xf8] sm:$0xff] }
 0x4ae   :  { %v863_v9 = vrot.slane %v862_v7, 2  ;;  %v880_v10 = vadd.f32 %v879_v8, %v878_v6  ;;  %v1037_v6 = vld [vmem:[#allocation4 + $0x100] sm:$0xff]  ;;  %v1039_v8 = vld [vmem:[#allocation4 + $0x110] sm:$0xff] }
 0x4b0   :  { %v864_v13 = vadd.f32 %v863_v9, %v862_v7  ;;  %v881_v11 = vrot.slane %v880_v10, 2  ;;  %v1038_v7 = vld [vmem:[#allocation4 + $0x108] sm:$0xff]  ;;  %v1040_v9 = vld [vmem:[#allocation4 + $0x118] sm:$0xff] }
 0x4b2   :  { %v865_v14 = vrot.slane %v864_v13, 1  ;;  %v882_v15 = vadd.f32 %v881_v11, %v880_v10  ;;  %v1356_v10 = vld [vmem:[#allocation2 + $0x78] sm:$0xff]  ;;  %v1354_v11 = vld [vmem:[#allocation2 + $0x68] sm:$0xff] }
 0x4b3   :  { %4830 = vmatprep.subr.mxu0 %v1356_v10 }
 0x4b4   :  { %v866_v24 = vadd.f32 %v865_v14, %v864_v13  ;;  %v883_v25 = vrot.slane %v882_v15, 1  ;;  %v1355_v13 = vld [vmem:[#allocation2 + $0x70] sm:$0xff]  ;;  %4831 = vmatpush3.msra.mxu0 %v1356_v10  ;;  %v1353_v14 = vld [vmem:[#allocation2 + $0x60] sm:$0xff] }
 0x4b5   :  { %4832 = vmatprep.subr.mxu0 %v1355_v13  ;;  %v1238_v10 = vld [vmem:[#allocation7 + $0x110] sm:$0xff] }
 0x4b6   :  { %v867_v29 = vmul.f32 0.03125, %v866_v24  ;;  %v884_v30 = vadd.f32 %v883_v25, %v882_v15  ;;  %4833 = vmatpush3.msra.mxu0 %v1355_v13 }
 0x4b7   :  { %4834 = vmatprep.subr.mxu0 %v1354_v11 }
 0x4b8   :  { %v885_v12 = vmul.f32 0.03125, %v884_v30  ;;  %v886_v31 = vmul.f32 %v867_v29, %v867_v29  ;;  %v888_v26 = vsub.f32 %v850_v47, %v867_v29  ;;  %v889_v32 = vsub.f32 %v851_v40, %v867_v29  ;;  %4835 = vmatpush3.msra.mxu0 %v1354_v11  ;;  %v1229_v30 = vld [vmem:[#allocation7 + $0xc8] sm:$0xff] }
 0x4b9   :  { %v891_v33 = vsub.f32 %v853_v54, %v867_v29  ;;  %v890_v36 = vsub.f32 %v852_v59, %v867_v29  ;;  %v1029_v54 = vld [vmem:[#allocation4 + $0xc0] sm:$0xff]  ;;  %4836 = vmatprep.subr.mxu0 %v1353_v14 }
 0x4ba   :  { %v887_v34 = vsub.f32 %v885_v12, %v886_v31  ;;  %4837 = vmatpush3.msra.mxu0 %v1353_v14  ;;  %v1220_v31 = vld [vmem:[#allocation6 + $0x48] sm:$0xff] }
 0x4bc   :  { %v892_v35 = vadd.f32 1e-05, %v887_v34 }
 0x4be   :  { %5119 = vrsqrt.f32 %v892_v35  ;;  %v1219_v35 = vld [vmem:[#allocation6 + $0x40] sm:$0xff] }
 0x4cb   :  { %v5120_v27 = vpop.eup %5119 }
 0x4cc   :  { %v896_v38 = vmul.f32 %v5120_v27, %v890_v36  ;;  %v894_v39 = vmul.f32 %v5120_v27, %v888_v26  ;;  %v895_v41 = vmul.f32 %v5120_v27, %v889_v32  ;;  %v897_v42 = vmul.f32 %v5120_v27, %v891_v33  ;;  %v1228_v26 = vld [vmem:[#allocation7 + $0xc0] sm:$0xff]  ;;  %v1233_v32 = vld [vmem:[#allocation7 + $0xe8] sm:$0xff]  ;;  %v1231_v36 = vld [vmem:[#allocation7 + $0xd8] sm:$0xff] }
 0x4cd   :  { %v1232_v27 = vld [vmem:[#allocation7 + $0xe0] sm:$0xff] }
 0x4ce   :  { %v906_v44 = vmul.f32 %v4295_v37, %v894_v39  ;;  %v907_v40 = vmul.f32 %v4295_v37, %v895_v41  ;;  %v908_v45 = vmul.f32 %v4295_v37, %v896_v38  ;;  %v909_v46 = vmul.f32 %v4295_v37, %v897_v42  ;;  %v1222_v39 = vld [vmem:[#allocation6 + $0x58] sm:$0xff] }
 0x4d0   :  { %v918_v47 = vadd.f32 %v4297_v43, %v906_v44  ;;  %v919_v48 = vadd.f32 %v4297_v43, %v907_v40  ;;  %v920_v49 = vadd.f32 %v4297_v43, %v908_v45  ;;  %v921_v52 = vadd.f32 %v4297_v43, %v909_v46  ;;  %v1235_v43 = vld [vmem:[#allocation7 + $0xf8] sm:$0xff]  ;;  %v1237_v40 = vld [vmem:[#allocation7 + $0x108] sm:$0xff] }
 0x4d2   :  { %v922_v50 = vmax.f32 %v918_v47, 0.0  ;;  %v923_v51 = vmax.f32 %v919_v48, 0.0  ;;  %v924_v53 = vmax.f32 %v920_v49, 0.0  ;;  %v925_v28 = vmax.f32 %v921_v52, 0.0  ;;  %v1230_v48 = vld [vmem:[#allocation7 + $0xd0] sm:$0xff]  ;;  %v1236_v52 = vld [vmem:[#allocation7 + $0x100] sm:$0xff] }
 0x4d4   :  { %4798 = vmatprep.mubr.msk.f32.mxu1 %vm92_vm0, %v922_v50 }
 0x4d5   :  { %4799 = vmatmul.mubr.msk.f32.vlgmr.msra.gmra.mxu1 %vm92_vm0, %v923_v51 }
 0x4d6   :  { %4801 = vmatprep.mubr.msk.f32.mxu1 %vm92_vm0, %v924_v53  ;;  %v1221_v53 = vld [vmem:[#allocation6 + $0x50] sm:$0xff] }
 0x4d9   :  { %4802 = vmatmul.mubr.msk.f32.gmra.mxu1 %vm92_vm0, %v925_v28 }
 0x4da   :  { %4812 = vmatprep.mubr.msk.f32.mxu1 %vm92_vm0, %v1029_v54 }
 0x595   :  { %v5439_v55 = vpop.f32.mrf.mxu1 }
 0x596   :  { %v1224_v38 = vmul.f32 %v5439_v55, %v1220_v31 }
 0x597   :  { %v5442_v56 = vpop.f32.mrf.mxu1 }
 0x598   :  { %v1223_v45 = vmul.f32 %v1219_v35, %v5442_v56 }
 0x599   :  { %v5444_v57 = vpop.f32.mrf.mxu1 }
 0x59a   :  { %1051 = vrot.lane.b32.xlu0 %v5444_v57, %s5227_s9  ;;  %v1226_v50 = vmul.f32 %v5444_v57, %v1222_v39 }
 0x59b   :  { %v5448_v58 = vpop.f32.mrf.mxu1 }
 0x59c   :  { %1049 = vrot.lane.b32.xlu1 %v5448_v58, %s5227_s9  ;;  %v1225_v57 = vmul.f32 %v1221_v53, %v5448_v58 }
 0x59e   :  { %1047 = vrot.lane.b32.xlu0 %v5439_v55, %s5227_s9 }
 0x5a0   :  { %1045 = vrot.lane.b32.xlu1 %v5442_v56, %s5227_s9 }
 0x60c   :  { %v1052_v59 = vpop.permute.xlu0 %1051 }
 0x60d   :  { %4804 = vmatprep.subr.mxu1 %v1052_v59 }
 0x60e   :  { %4805 = vmatpush3.msra.mxu1 %v1052_v59  ;;  %v1050_v60 = vpop.permute.xlu1 %1049  ;;  %v1234_v59 = vld [vmem:[#allocation7 + $0xf0] sm:$0xff] }
 0x60f   :  { %4806 = vmatprep.subr.mxu1 %v1050_v60 }
 0x610   :  { %v1048_v61 = vpop.permute.xlu0 %1047  ;;  %4807 = vmatpush3.msra.mxu1 %v1050_v60 }
 0x611   :  { %4808 = vmatprep.subr.mxu1 %v1048_v61 }
 0x612   :  { %4809 = vmatpush3.msra.mxu1 %v1048_v61  ;;  %v1046_v62 = vpop.permute.xlu1 %1045 }
 0x613   :  { %4810 = vmatprep.subr.mxu1 %v1046_v62 }
 0x614   :  { %4811 = vmatpush3.msra.mxu1 %v1046_v62  ;;  %v4315_v62 = vld [vmem:[%s5918_s5 + $0x2] ss:$0 sm:$0xff] }
 0x615   :  { %4813 = vmatmul.mubr.msk.f32.vlgmr.msra.gmra.mxu1 %vm92_vm0, %v1030_v63  ;;  %v1239_v63 = vld [vmem:[#allocation7 + $0x118] sm:$0xff] }
 0x616   :  { %4815 = vmatprep.mubr.msk.f32.mxu1 %vm92_vm0, %v1031_v0 }
 0x619   :  { %4816 = vmatmul.mubr.msk.f32.gmra.mxu1 %vm92_vm0, %v1032_v1 }
 0x61a   :  { %4818 = vmatprep.mubr.msk.f32.mxu1 %vm92_vm0, %v1033_v2 }
 0x61d   :  { %4819 = vmatmul.mubr.msk.f32.gmra.mxu1 %vm92_vm0, %v1034_v3 }
 0x61e   :  { %4821 = vmatprep.mubr.msk.f32.mxu1 %vm92_vm0, %v1035_v4 }
 0x621   :  { %4822 = vmatmul.mubr.msk.f32.gmra.mxu1 %vm92_vm0, %v1036_v5 }
 0x622   :  { %4824 = vmatprep.mubr.msk.f32.mxu1 %vm92_vm0, %v1037_v6 }
 0x625   :  { %4825 = vmatmul.mubr.msk.f32.gmra.mxu1 %vm92_vm0, %v1038_v7 }
 0x626   :  { %4827 = vmatprep.mubr.msk.f32.mxu1 %vm92_vm0, %v1039_v8 }
 0x629   :  { %4828 = vmatmul.mubr.msk.f32.gmra.mxu1 %vm92_vm0, %v1040_v9 }
 0x6d5   :  { %v4814_v15 = vpop.f32.mrf.mxu1 }
 0x6d6   :  { %v1241_v34 = vmul.f32 %v4814_v15, %v1229_v30 }
 0x6d7   :  { %v1159_v24 = vpop.f32.mrf.mxu1 }
 0x6d8   :  { %v1240_v41 = vmul.f32 %v1228_v26, %v1159_v24  ;;  %v1245_v46 = vadd.f32 %v1241_v34, %v1224_v38 }
 0x6d9   :  { %v4817_v25 = vpop.f32.mrf.mxu1 }
 0x6da   :  { %v1243_v47 = vmul.f32 %v4817_v25, %v1231_v36  ;;  %v1244_v28 = vadd.f32 %v1240_v41, %v1223_v45 }
 0x6db   :  { %v1169_v29 = vpop.f32.mrf.mxu1 }
 0x6dc   :  { %v1242_v61 = vmul.f32 %v1230_v48, %v1169_v29  ;;  %v1247_v0 = vadd.f32 %v1243_v47, %v1226_v50 }
 0x6dd   :  { %v4820_v12 = vpop.f32.mrf.mxu1 }
 0x6de   :  { %v1249_v42 = vmul.f32 %v4820_v12, %v1233_v32  ;;  %v1246_v13 = vadd.f32 %v1242_v61, %v1225_v57 }
 0x6df   :  { %v1179_v33 = vpop.f32.mrf.mxu1 }
 0x6e0   :  { %v1248_v49 = vmul.f32 %v1232_v27, %v1179_v33  ;;  %v1253_v54 = vadd.f32 %v1249_v42, %v1245_v46 }
 0x6e1   :  { %v4823_v37 = vpop.f32.mrf.mxu1 }
 0x6e2   :  { %v1251_v55 = vmul.f32 %v4823_v37, %v1235_v43  ;;  %v1252_v1 = vadd.f32 %v1248_v49, %v1244_v28 }
 0x6e3   :  { %v1189_v44 = vpop.f32.mrf.mxu1 }
 0x6e4   :  { %v1250_v4 = vmul.f32 %v1234_v59, %v1189_v44  ;;  %v1255_v6 = vadd.f32 %v1251_v55, %v1247_v0 }
 0x6e5   :  { %v4826_v51 = vpop.f32.mrf.mxu1 }
 0x6e6   :  { %v1257_v60 = vmul.f32 %v4826_v51, %v1237_v40  ;;  %v1254_v25 = vadd.f32 %v1250_v4, %v1246_v13  ;;  %v4317_v4 = vld [vmem:[%s5919_s6 + $0x2] ss:$0 sm:$0xff] }
 0x6e7   :  { %v1199_v56 = vpop.f32.mrf.mxu1 }
 0x6e8   :  { %v1261_v2 = vadd.f32 %v1257_v60, %v1253_v54  ;;  %v1256_v3 = vmul.f32 %v1236_v52, %v1199_v56 }
 0x6e9   :  { %v4829_v5 = vpop.f32.mrf.mxu1 }
 0x6ea   :  { %v1273_v7 = vadd.f32 %v4315_v62, %v1261_v2  ;;  %v1260_v8 = vadd.f32 %v1256_v3, %v1252_v1  ;;  %v1259_v9 = vmul.f32 %v4829_v5, %v1239_v63 }
 0x6eb   :  { %v1209_v11 = vpop.f32.mrf.mxu1 }
 0x6ec   :  { %v1291_v14 = vmul.f32 %v1273_v7, %v1273_v7  ;;  %v1272_v15 = vadd.f32 %v4315_v62, %v1260_v8  ;;  %v1263_v24 = vadd.f32 %v1259_v9, %v1255_v6  ;;  %v1258_v29 = vmul.f32 %v1238_v10, %v1209_v11  ;;  %v4319_v10 = vld [vmem:[%s5920_s7 + $0x2] ss:$0 sm:$0xff] }
 0x6ed   :  { %v1277_v30 = vsel %vm92_vm0, %v1273_v7, 0.0 }
 0x6ee   :  { %v1276_v12 = vsel %vm92_vm0, %v1272_v15, 0.0  ;;  %v1290_v31 = vmul.f32 %v1272_v15, %v1272_v15  ;;  %v1275_v26 = vadd.f32 %v4315_v62, %v1263_v24  ;;  %v1262_v32 = vadd.f32 %v1258_v29, %v1254_v25 }
 0x6ef   :  { %v1278_v58 = vadd.f32 %v1277_v30, %v1276_v12  ;;  %v1295_v33 = vsel %vm92_vm0, %v1291_v14, 0.0 }
 0x6f0   :  { %v1294_v34 = vsel %vm92_vm0, %v1290_v31, 0.0  ;;  %v1274_v36 = vadd.f32 %v4315_v62, %v1262_v32  ;;  %v1293_v27 = vmul.f32 %v1275_v26, %v1275_v26  ;;  %v1281_v41 = vsel %vm92_vm0, %v1275_v26, 0.0 }
 0x6f1   :  { %v1296_v35 = vadd.f32 %v1295_v33, %v1294_v34 }
 0x6f2   :  { %v1279_v37 = vsel %vm92_vm0, %v1274_v36, 0.0  ;;  %v1292_v38 = vmul.f32 %v1274_v36, %v1274_v36  ;;  %v1299_v40 = vsel %vm92_vm0, %v1293_v27, 0.0  ;;  %v1457_v27 = vld [vmem:[#allocation4 + $0x130] sm:$0xff] }
 0x6f3   :  { %v1280_v39 = vadd.f32 %v1279_v37, %v1278_v58  ;;  %v1458_v37 = vld [vmem:[#allocation4 + $0x138] sm:$0xff] }
 0x6f4   :  { %v1297_v42 = vsel %vm92_vm0, %v1292_v38, 0.0  ;;  %v1459_v38 = vld [vmem:[#allocation4 + $0x140] sm:$0xff] }
 0x6f5   :  { %v1282_v43 = vadd.f32 %v1281_v41, %v1280_v39  ;;  %v1298_v44 = vadd.f32 %v1297_v42, %v1296_v35  ;;  %v1460_v39 = vld [vmem:[#allocation4 + $0x148] sm:$0xff]  ;;  %v1461_v41 = vld [vmem:[#allocation4 + $0x150] sm:$0xff]  ;;  %v1462_v42 = vld [vmem:[#allocation4 + $0x158] sm:$0xff] }
 0x6f7   :  { %v1283_v45 = vrot.slane %v1282_v43, 4  ;;  %v1300_v46 = vadd.f32 %v1299_v40, %v1298_v44  ;;  %v1464_v44 = vld [vmem:[#allocation4 + $0x168] sm:$0xff]  ;;  %v1465_v40 = vld [vmem:[#allocation4 + $0x170] sm:$0xff] }
 0x6f9   :  { %v1284_v47 = vadd.f32 %v1283_v45, %v1282_v43  ;;  %v1301_v48 = vrot.slane %v1300_v46, 4  ;;  %v1463_v43 = vld [vmem:[#allocation4 + $0x160] sm:$0xff]  ;;  %v1466_v45 = vld [vmem:[#allocation4 + $0x178] sm:$0xff] }
 0x6fb   :  { %v1285_v49 = vrot.slane %v1284_v47, 2  ;;  %v1302_v50 = vadd.f32 %v1301_v48, %v1300_v46  ;;  %v1778_v46 = vld [vmem:[#allocation2 + $0x98] sm:$0xff]  ;;  %v1776_v48 = vld [vmem:[#allocation2 + $0x88] sm:$0xff] }
 0x6fc   :  { %4870 = vmatprep.subr.mxu1 %v1778_v46 }
 0x6fd   :  { %v1286_v51 = vadd.f32 %v1285_v49, %v1284_v47  ;;  %v1303_v52 = vrot.slane %v1302_v50, 2  ;;  %v1777_v47 = vld [vmem:[#allocation2 + $0x90] sm:$0xff]  ;;  %4871 = vmatpush3.msra.mxu1 %v1778_v46  ;;  %v1775_v49 = vld [vmem:[#allocation2 + $0x80] sm:$0xff] }
 0x6fe   :  { %4872 = vmatprep.subr.mxu1 %v1777_v47 }
 0x6ff   :  { %v1287_v53 = vrot.slane %v1286_v51, 1  ;;  %v1304_v28 = vadd.f32 %v1303_v52, %v1302_v50  ;;  %4873 = vmatpush3.msra.mxu1 %v1777_v47 }
 0x700   :  { %4874 = vmatprep.subr.mxu1 %v1776_v48 }
 0x701   :  { %v1288_v54 = vadd.f32 %v1287_v53, %v1286_v51  ;;  %v1305_v55 = vrot.slane %v1304_v28, 1  ;;  %4875 = vmatpush3.msra.mxu1 %v1776_v48 }
 0x702   :  { %4876 = vmatprep.subr.mxu1 %v1775_v49 }
 0x703   :  { %v1289_v59 = vmul.f32 0.03125, %v1288_v54  ;;  %v1306_v60 = vadd.f32 %v1305_v55, %v1304_v28  ;;  %4877 = vmatpush3.msra.mxu1 %v1775_v49  ;;  %v1655_v28 = vld [vmem:[#allocation7 + $0x128] sm:$0xff] }
 0x704   :  { %v1646_v55 = vld [vmem:[#allocation6 + $0x68] sm:$0xff] }
 0x705   :  { %v1307_v61 = vmul.f32 0.03125, %v1306_v60  ;;  %v1308_v62 = vmul.f32 %v1289_v59, %v1289_v59  ;;  %v1310_v56 = vsub.f32 %v1272_v15, %v1289_v59  ;;  %v1311_v63 = vsub.f32 %v1273_v7, %v1289_v59  ;;  %v1659_v60 = vld [vmem:[#allocation7 + $0x148] sm:$0xff] }
 0x706   :  { %v1313_v0 = vsub.f32 %v1275_v26, %v1289_v59  ;;  %v1312_v3 = vsub.f32 %v1274_v36, %v1289_v59  ;;  %v1456_v36 = vld [vmem:[#allocation4 + $0x128] sm:$0xff]  ;;  %v1654_v59 = vld [vmem:[#allocation7 + $0x120] sm:$0xff] }
 0x707   :  { %v1309_v1 = vsub.f32 %v1307_v61, %v1308_v62 }
 0x709   :  { %v1314_v2 = vadd.f32 1e-05, %v1309_v1 }
 0x70b   :  { %5121 = vrsqrt.f32 %v1314_v2 }
 0x718   :  { %v5122_v57 = vpop.eup %5121 }
 0x719   :  { %v1318_v5 = vmul.f32 %v5122_v57, %v1312_v3  ;;  %v1316_v6 = vmul.f32 %v5122_v57, %v1310_v56  ;;  %v1317_v8 = vmul.f32 %v5122_v57, %v1311_v63  ;;  %v1319_v9 = vmul.f32 %v5122_v57, %v1313_v0  ;;  %v1645_v56 = vld [vmem:[#allocation6 + $0x60] sm:$0xff]  ;;  %v1657_v63 = vld [vmem:[#allocation7 + $0x138] sm:$0xff] }
 0x71a   :  { %v1658_v0 = vld [vmem:[#allocation7 + $0x140] sm:$0xff]  ;;  %v1648_v3 = vld [vmem:[#allocation6 + $0x78] sm:$0xff] }
 0x71b   :  { %v1328_v13 = vmul.f32 %v4317_v4, %v1316_v6  ;;  %v1329_v7 = vmul.f32 %v4317_v4, %v1317_v8  ;;  %v1330_v11 = vmul.f32 %v4317_v4, %v1318_v5  ;;  %v1331_v14 = vmul.f32 %v4317_v4, %v1319_v9  ;;  %v1661_v5 = vld [vmem:[#allocation7 + $0x158] sm:$0xff]  ;;  %v1663_v8 = vld [vmem:[#allocation7 + $0x168] sm:$0xff] }
 0x71d   :  { %v1340_v15 = vadd.f32 %v4319_v10, %v1328_v13  ;;  %v1341_v24 = vadd.f32 %v4319_v10, %v1329_v7  ;;  %v1342_v25 = vadd.f32 %v4319_v10, %v1330_v11  ;;  %v1343_v29 = vadd.f32 %v4319_v10, %v1331_v14  ;;  %v1656_v7 = vld [vmem:[#allocation7 + $0x130] sm:$0xff] }
 0x71f   :  { %v1344_v30 = vmax.f32 %v1340_v15, 0.0  ;;  %v1345_v12 = vmax.f32 %v1341_v24, 0.0  ;;  %v1346_v31 = vmax.f32 %v1342_v25, 0.0  ;;  %v1347_v32 = vmax.f32 %v1343_v29, 0.0  ;;  %v1662_v24 = vld [vmem:[#allocation7 + $0x160] sm:$0xff]  ;;  %v1647_v25 = vld [vmem:[#allocation6 + $0x70] sm:$0xff] }
 0x721   :  { %v5490_v58 = vadd.f32 %v1344_v30, %v500_v19  ;;  %v5494_v26 = vadd.f32 %v1345_v12, %v501_v20  ;;  %v5500_v33 = vadd.f32 %v1346_v31, %v502_v22  ;;  %v5508_v16 = vadd.f32 %v1347_v32, %v503_v23  ;;  %v1660_v31 = vld [vmem:[#allocation7 + $0x150] sm:$0xff] }
 0x723   :  { %4838 = vmatprep.mubr.msk.f32.mxu0 %vm92_vm0, %v5490_v58 }
 0x724   :  { %4839 = vmatmul.mubr.msk.f32.vlgmr.msra.gmra.mxu0 %vm92_vm0, %v5494_v26 }
 0x725   :  { %4841 = vmatprep.mubr.msk.f32.mxu0 %vm92_vm0, %v5500_v33 }
 0x728   :  { %4842 = vmatmul.mubr.msk.f32.gmra.mxu0 %vm92_vm0, %v5508_v16 }
 0x729   :  { %4852 = vmatprep.mubr.msk.f32.mxu0 %vm92_vm0, %v1455_v17 }
 0x7e4   :  { %v5512_v19 = vpop.f32.mrf.mxu0 }
 0x7e5   :  { %v1650_v2 = vmul.f32 %v5512_v19, %v1646_v55 }
 0x7e6   :  { %v5515_v18 = vpop.f32.mrf.mxu0 }
 0x7e7   :  { %v1649_v9 = vmul.f32 %v1645_v56, %v5515_v18 }
 0x7e8   :  { %v5517_v20 = vpop.f32.mrf.mxu0 }
 0x7e9   :  { %1477 = vrot.lane.b32.xlu0 %v5517_v20, %s5227_s9  ;;  %v1652_v14 = vmul.f32 %v5517_v20, %v1648_v3 }
 0x7ea   :  { %v5521_v22 = vpop.f32.mrf.mxu0 }
 0x7eb   :  { %1475 = vrot.lane.b32.xlu1 %v5521_v22, %s5227_s9  ;;  %v1651_v20 = vmul.f32 %v1647_v25, %v5521_v22 }
 0x7ed   :  { %1473 = vrot.lane.b32.xlu0 %v5512_v19, %s5227_s9  ;;  %v4337_v19 = vld [vmem:[%s5918_s5 + $0x3] ss:$0 sm:$0xff] }
 0x7ef   :  { %1471 = vrot.lane.b32.xlu1 %v5515_v18, %s5227_s9 }
 0x85b   :  { %v1478_v21 = vpop.permute.xlu0 %1477 }
 0x85c   :  { %4844 = vmatprep.subr.mxu0 %v1478_v21 }
 0x85d   :  { %4845 = vmatpush3.msra.mxu0 %v1478_v21  ;;  %v1476_v23 = vpop.permute.xlu1 %1475  ;;  %v1665_v21 = vld [vmem:[#allocation7 + $0x178] sm:$0xff] }
 0x85e   :  { %4846 = vmatprep.subr.mxu0 %v1476_v23 }
 0x85f   :  { %v1474_v34 = vpop.permute.xlu0 %1473  ;;  %4847 = vmatpush3.msra.mxu0 %v1476_v23 }
 0x860   :  { %4848 = vmatprep.subr.mxu0 %v1474_v34 }
 0x861   :  { %4849 = vmatpush3.msra.mxu0 %v1474_v34  ;;  %v1472_v35 = vpop.permute.xlu1 %1471 }
 0x862   :  { %4850 = vmatprep.subr.mxu0 %v1472_v35 }
 0x863   :  { %4851 = vmatpush3.msra.mxu0 %v1472_v35 }
 0x864   :  { %4853 = vmatmul.mubr.msk.f32.vlgmr.msra.gmra.mxu0 %vm92_vm0, %v1456_v36 }
 0x865   :  { %4855 = vmatprep.mubr.msk.f32.mxu0 %vm92_vm0, %v1457_v27 }
 0x868   :  { %4856 = vmatmul.mubr.msk.f32.gmra.mxu0 %vm92_vm0, %v1458_v37 }
 0x869   :  { %4858 = vmatprep.mubr.msk.f32.mxu0 %vm92_vm0, %v1459_v38 }
 0x86c   :  { %4859 = vmatmul.mubr.msk.f32.gmra.mxu0 %vm92_vm0, %v1460_v39 }
 0x86d   :  { %4861 = vmatprep.mubr.msk.f32.mxu0 %vm92_vm0, %v1461_v41 }
 0x870   :  { %4862 = vmatmul.mubr.msk.f32.gmra.mxu0 %vm92_vm0, %v1462_v42 }
 0x871   :  { %4864 = vmatprep.mubr.msk.f32.mxu0 %vm92_vm0, %v1463_v43  ;;  %v1664_v43 = vld [vmem:[#allocation7 + $0x170] sm:$0xff] }
 0x874   :  { %4865 = vmatmul.mubr.msk.f32.gmra.mxu0 %vm92_vm0, %v1464_v44 }
 0x875   :  { %4867 = vmatprep.mubr.msk.f32.mxu0 %vm92_vm0, %v1465_v40 }
 0x878   :  { %4868 = vmatmul.mubr.msk.f32.gmra.mxu0 %vm92_vm0, %v1466_v45 }
 0x924   :  { %v4854_v50 = vpop.f32.mrf.mxu0 }
 0x925   :  { %v1667_v62 = vmul.f32 %v4854_v50, %v1655_v28 }
 0x926   :  { %v1585_v51 = vpop.f32.mrf.mxu0 }
 0x927   :  { %v1666_v57 = vmul.f32 %v1654_v59, %v1585_v51  ;;  %v1671_v10 = vadd.f32 %v1667_v62, %v1650_v2 }
 0x928   :  { %v4857_v52 = vpop.f32.mrf.mxu0 }
 0x929   :  { %v1669_v13 = vmul.f32 %v4857_v52, %v1657_v63  ;;  %v1670_v29 = vadd.f32 %v1666_v57, %v1649_v9 }
 0x92a   :  { %v1595_v53 = vpop.f32.mrf.mxu0 }
 0x92b   :  { %v1668_v17 = vmul.f32 %v1656_v7, %v1595_v53  ;;  %v1673_v23 = vadd.f32 %v1669_v13, %v1652_v14 }
 0x92c   :  { %v4860_v54 = vpop.f32.mrf.mxu0 }
 0x92d   :  { %v1675_v4 = vmul.f32 %v4860_v54, %v1659_v60  ;;  %v1672_v44 = vadd.f32 %v1668_v17, %v1651_v20 }
 0x92e   :  { %v1605_v61 = vpop.f32.mrf.mxu0 }
 0x92f   :  { %v1674_v11 = vmul.f32 %v1658_v0, %v1605_v61  ;;  %v1679_v30 = vadd.f32 %v1675_v4, %v1671_v10 }
 0x930   :  { %v4863_v1 = vpop.f32.mrf.mxu0 }
 0x931   :  { %v1677_v12 = vmul.f32 %v4863_v1, %v1661_v5  ;;  %v1678_v34 = vadd.f32 %v1674_v11, %v1670_v29 }
 0x932   :  { %v1615_v6 = vpop.f32.mrf.mxu0 }
 0x933   :  { %v1676_v27 = vmul.f32 %v1660_v31, %v1615_v6  ;;  %v1681_v38 = vadd.f32 %v1677_v12, %v1673_v23 }
 0x934   :  { %v4866_v15 = vpop.f32.mrf.mxu0 }
 0x935   :  { %v1683_v32 = vmul.f32 %v4866_v15, %v1663_v8  ;;  %v1680_v48 = vadd.f32 %v1676_v27, %v1672_v44 }
 0x936   :  { %v1625_v18 = vpop.f32.mrf.mxu0 }
 0x937   :  { %v1687_v35 = vadd.f32 %v1683_v32, %v1679_v30  ;;  %v1682_v36 = vmul.f32 %v1662_v24, %v1625_v18 }
 0x938   :  { %v4869_v37 = vpop.f32.mrf.mxu0 }
 0x939   :  { %v1699_v39 = vadd.f32 %v4337_v19, %v1687_v35  ;;  %v1686_v41 = vadd.f32 %v1682_v36, %v1678_v34  ;;  %v1685_v42 = vmul.f32 %v4869_v37, %v1665_v21  ;;  %v4339_v34 = vld [vmem:[%s5919_s6 + $0x3] ss:$0 sm:$0xff] }
 0x93a   :  { %v1635_v40 = vpop.f32.mrf.mxu0  ;;  %v4341_v37 = vld [vmem:[%s5920_s7 + $0x3] ss:$0 sm:$0xff] }
 0x93b   :  { %v1717_v45 = vmul.f32 %v1699_v39, %v1699_v39  ;;  %v1698_v46 = vadd.f32 %v4337_v19, %v1686_v41  ;;  %v1689_v47 = vadd.f32 %v1685_v42, %v1681_v38  ;;  %v1684_v49 = vmul.f32 %v1664_v43, %v1635_v40 }
 0x93c   :  { %v1703_v50 = vsel %vm92_vm0, %v1699_v39, 0.0 }
 0x93d   :  { %v1702_v51 = vsel %vm92_vm0, %v1698_v46, 0.0  ;;  %v1716_v52 = vmul.f32 %v1698_v46, %v1698_v46  ;;  %v1701_v53 = vadd.f32 %v4337_v19, %v1689_v47  ;;  %v1688_v28 = vadd.f32 %v1684_v49, %v1680_v48 }
 0x93e   :  { %v1704_v22 = vadd.f32 %v1703_v50, %v1702_v51  ;;  %v1721_v54 = vsel %vm92_vm0, %v1717_v45, 0.0  ;;  %v1877_v50 = vld [vmem:[#allocation4 + $0x180] sm:$0xff] }
 0x93f   :  { %v1720_v55 = vsel %vm92_vm0, %v1716_v52, 0.0  ;;  %v1700_v60 = vadd.f32 %v4337_v19, %v1688_v28  ;;  %v1719_v61 = vmul.f32 %v1701_v53, %v1701_v53  ;;  %v1707_v0 = vsel %vm92_vm0, %v1701_v53, 0.0 }
 0x940   :  { %v1722_v59 = vadd.f32 %v1721_v54, %v1720_v55 }
 0x941   :  { %v1705_v62 = vsel %vm92_vm0, %v1700_v60, 0.0  ;;  %v1718_v56 = vmul.f32 %v1700_v60, %v1700_v60  ;;  %v1725_v57 = vsel %vm92_vm0, %v1719_v61, 0.0  ;;  %v1879_v61 = vld [vmem:[#allocation4 + $0x190] sm:$0xff] }
 0x942   :  { %v1706_v63 = vadd.f32 %v1705_v62, %v1704_v22  ;;  %v1880_v62 = vld [vmem:[#allocation4 + $0x198] sm:$0xff] }
 0x943   :  { %v1723_v1 = vsel %vm92_vm0, %v1718_v56, 0.0  ;;  %v1881_v56 = vld [vmem:[#allocation4 + $0x1a0] sm:$0xff] }
 0x944   :  { %v1708_v2 = vadd.f32 %v1707_v0, %v1706_v63  ;;  %v1724_v3 = vadd.f32 %v1723_v1, %v1722_v59  ;;  %v1882_v63 = vld [vmem:[#allocation4 + $0x1a8] sm:$0xff]  ;;  %v1883_v0 = vld [vmem:[#allocation4 + $0x1b0] sm:$0xff]  ;;  %v1884_v1 = vld [vmem:[#allocation4 + $0x1b8] sm:$0xff] }
 0x946   :  { %v1709_v4 = vrot.slane %v1708_v2, 4  ;;  %v1726_v5 = vadd.f32 %v1725_v57, %v1724_v3  ;;  %v1886_v3 = vld [vmem:[#allocation4 + $0x1c8] sm:$0xff]  ;;  %v1887_v57 = vld [vmem:[#allocation4 + $0x1d0] sm:$0xff] }
 0x948   :  { %v1710_v6 = vadd.f32 %v1709_v4, %v1708_v2  ;;  %v1727_v8 = vrot.slane %v1726_v5, 4  ;;  %v1885_v2 = vld [vmem:[#allocation4 + $0x1c0] sm:$0xff]  ;;  %v1888_v4 = vld [vmem:[#allocation4 + $0x1d8] sm:$0xff] }
 0x94a   :  { %v1711_v9 = vrot.slane %v1710_v6, 2  ;;  %v1728_v10 = vadd.f32 %v1727_v8, %v1726_v5  ;;  %v2204_v5 = vld [vmem:[#allocation2 + $0xb8] sm:$0xff]  ;;  %v2202_v8 = vld [vmem:[#allocation2 + $0xa8] sm:$0xff] }
 0x94b   :  { %4910 = vmatprep.subr.mxu0 %v2204_v5 }
 0x94c   :  { %v1712_v13 = vadd.f32 %v1711_v9, %v1710_v6  ;;  %v1729_v7 = vrot.slane %v1728_v10, 2  ;;  %v2203_v6 = vld [vmem:[#allocation2 + $0xb0] sm:$0xff]  ;;  %4911 = vmatpush3.msra.mxu0 %v2204_v5  ;;  %v2201_v9 = vld [vmem:[#allocation2 + $0xa0] sm:$0xff] }
 0x94d   :  { %4912 = vmatprep.subr.mxu0 %v2203_v6 }
 0x94e   :  { %v1713_v11 = vrot.slane %v1712_v13, 1  ;;  %v1730_v14 = vadd.f32 %v1729_v7, %v1728_v10  ;;  %4913 = vmatpush3.msra.mxu0 %v2203_v6 }
 0x94f   :  { %4914 = vmatprep.subr.mxu0 %v2202_v8 }
 0x950   :  { %v1714_v15 = vadd.f32 %v1713_v11, %v1712_v13  ;;  %v1731_v24 = vrot.slane %v1730_v14, 1  ;;  %4915 = vmatpush3.msra.mxu0 %v2202_v8 }
 0x951   :  { %4916 = vmatprep.subr.mxu0 %v2201_v9 }
 0x952   :  { %v1715_v25 = vmul.f32 0.03125, %v1714_v15  ;;  %v1732_v29 = vadd.f32 %v1731_v24, %v1730_v14  ;;  %4917 = vmatpush3.msra.mxu0 %v2201_v9  ;;  %v2077_v14 = vld [vmem:[#allocation7 + $0x188] sm:$0xff] }
 0x953   :  { %v2068_v24 = vld [vmem:[#allocation6 + $0x88] sm:$0xff] }
 0x954   :  { %v1733_v30 = vmul.f32 0.03125, %v1732_v29  ;;  %v1734_v12 = vmul.f32 %v1715_v25, %v1715_v25  ;;  %v1736_v31 = vsub.f32 %v1698_v46, %v1715_v25  ;;  %v1737_v32 = vsub.f32 %v1699_v39, %v1715_v25  ;;  %v2081_v29 = vld [vmem:[#allocation7 + $0x1a8] sm:$0xff] }
 0x955   :  { %v1739_v17 = vsub.f32 %v1701_v53, %v1715_v25  ;;  %v1738_v21 = vsub.f32 %v1700_v60, %v1715_v25  ;;  %v1878_v60 = vld [vmem:[#allocation4 + $0x188] sm:$0xff]  ;;  %v2076_v25 = vld [vmem:[#allocation7 + $0x180] sm:$0xff] }
 0x956   :  { %v1735_v19 = vsub.f32 %v1733_v30, %v1734_v12 }
 0x958   :  { %v1740_v18 = vadd.f32 1e-05, %v1735_v19 }
 0x95a   :  { %5123 = vrsqrt.f32 %v1740_v18 }
 0x967   :  { %v5124_v23 = vpop.eup %5123 }
 0x968   :  { %v1744_v35 = vmul.f32 %v5124_v23, %v1738_v21  ;;  %v1742_v36 = vmul.f32 %v5124_v23, %v1736_v31  ;;  %v1743_v20 = vmul.f32 %v5124_v23, %v1737_v32  ;;  %v1745_v27 = vmul.f32 %v5124_v23, %v1739_v17  ;;  %v2067_v31 = vld [vmem:[#allocation6 + $0x80] sm:$0xff]  ;;  %v2079_v32 = vld [vmem:[#allocation7 + $0x198] sm:$0xff] }
 0x969   :  { %v2080_v17 = vld [vmem:[#allocation7 + $0x1a0] sm:$0xff]  ;;  %v2070_v21 = vld [vmem:[#allocation6 + $0x98] sm:$0xff] }
 0x96a   :  { %v1754_v38 = vmul.f32 %v4339_v34, %v1742_v36  ;;  %v1755_v39 = vmul.f32 %v4339_v34, %v1743_v20  ;;  %v1756_v41 = vmul.f32 %v4339_v34, %v1744_v35  ;;  %v1757_v42 = vmul.f32 %v4339_v34, %v1745_v27  ;;  %v2083_v35 = vld [vmem:[#allocation7 + $0x1b8] sm:$0xff]  ;;  %v2085_v20 = vld [vmem:[#allocation7 + $0x1c8] sm:$0xff] }
 0x96c   :  { %v1766_v43 = vadd.f32 %v4341_v37, %v1754_v38  ;;  %v1767_v44 = vadd.f32 %v4341_v37, %v1755_v39  ;;  %v1768_v40 = vadd.f32 %v4341_v37, %v1756_v41  ;;  %v1769_v47 = vadd.f32 %v4341_v37, %v1757_v42  ;;  %v2078_v39 = vld [vmem:[#allocation7 + $0x190] sm:$0xff] }
 0x96e   :  { %v1770_v45 = vmax.f32 %v1766_v43, 0.0  ;;  %v1771_v46 = vmax.f32 %v1767_v44, 0.0  ;;  %v1772_v48 = vmax.f32 %v1768_v40, 0.0  ;;  %v1773_v49 = vmax.f32 %v1769_v47, 0.0  ;;  %v2084_v44 = vld [vmem:[#allocation7 + $0x1c0] sm:$0xff]  ;;  %v2069_v40 = vld [vmem:[#allocation6 + $0x90] sm:$0xff] }
 0x970   :  { %4878 = vmatprep.mubr.msk.f32.mxu1 %vm92_vm0, %v1770_v45 }
 0x971   :  { %4879 = vmatmul.mubr.msk.f32.vlgmr.msra.gmra.mxu1 %vm92_vm0, %v1771_v46 }
 0x972   :  { %4881 = vmatprep.mubr.msk.f32.mxu1 %vm92_vm0, %v1772_v48  ;;  %v2082_v48 = vld [vmem:[#allocation7 + $0x1b0] sm:$0xff] }
 0x975   :  { %4882 = vmatmul.mubr.msk.f32.gmra.mxu1 %vm92_vm0, %v1773_v49 }
 0x976   :  { %4892 = vmatprep.mubr.msk.f32.mxu1 %vm92_vm0, %v1877_v50 }
 0xa31   :  { %v5565_v51 = vpop.f32.mrf.mxu1 }
 0xa32   :  { %v2072_v18 = vmul.f32 %v5565_v51, %v2068_v24 }
 0xa33   :  { %v5568_v52 = vpop.f32.mrf.mxu1 }
 0xa34   :  { %v2071_v27 = vmul.f32 %v2067_v31, %v5568_v52 }
 0xa35   :  { %v5570_v22 = vpop.f32.mrf.mxu1 }
 0xa36   :  { %1899 = vrot.lane.b32.xlu0 %v5570_v22, %s5227_s9  ;;  %v2074_v42 = vmul.f32 %v5570_v22, %v2070_v21 }
 0xa37   :  { %v5574_v53 = vpop.f32.mrf.mxu1 }
 0xa38   :  { %1897 = vrot.lane.b32.xlu1 %v5574_v53, %s5227_s9  ;;  %v2073_v22 = vmul.f32 %v2069_v40, %v5574_v53 }
 0xa3a   :  { %1895 = vrot.lane.b32.xlu0 %v5565_v51, %s5227_s9  ;;  %v4359_v51 = vld [vmem:[%s5918_s5 + $0x4] ss:$0 sm:$0xff] }
 0xa3c   :  { %1893 = vrot.lane.b32.xlu1 %v5568_v52, %s5227_s9 }
 0xaa8   :  { %v1900_v28 = vpop.permute.xlu0 %1899 }
 0xaa9   :  { %4884 = vmatprep.subr.mxu1 %v1900_v28 }
 0xaaa   :  { %4885 = vmatpush3.msra.mxu1 %v1900_v28  ;;  %v1898_v54 = vpop.permute.xlu1 %1897  ;;  %v2087_v28 = vld [vmem:[#allocation7 + $0x1d8] sm:$0xff] }
 0xaab   :  { %4886 = vmatprep.subr.mxu1 %v1898_v54 }
 0xaac   :  { %v1896_v55 = vpop.permute.xlu0 %1895  ;;  %4887 = vmatpush3.msra.mxu1 %v1898_v54 }
 0xaad   :  { %4888 = vmatprep.subr.mxu1 %v1896_v55 }
 0xaae   :  { %4889 = vmatpush3.msra.mxu1 %v1896_v55  ;;  %v1894_v59 = vpop.permute.xlu1 %1893 }
 0xaaf   :  { %4890 = vmatprep.subr.mxu1 %v1894_v59 }
 0xab0   :  { %4891 = vmatpush3.msra.mxu1 %v1894_v59 }
 0xab1   :  { %4893 = vmatmul.mubr.msk.f32.vlgmr.msra.gmra.mxu1 %vm92_vm0, %v1878_v60 }
 0xab2   :  { %4895 = vmatprep.mubr.msk.f32.mxu1 %vm92_vm0, %v1879_v61 }
 0xab5   :  { %4896 = vmatmul.mubr.msk.f32.gmra.mxu1 %vm92_vm0, %v1880_v62 }
 0xab6   :  { %4898 = vmatprep.mubr.msk.f32.mxu1 %vm92_vm0, %v1881_v56 }
 0xab9   :  { %4899 = vmatmul.mubr.msk.f32.gmra.mxu1 %vm92_vm0, %v1882_v63 }
 0xaba   :  { %4901 = vmatprep.mubr.msk.f32.mxu1 %vm92_vm0, %v1883_v0 }
 0xabd   :  { %4902 = vmatmul.mubr.msk.f32.gmra.mxu1 %vm92_vm0, %v1884_v1 }
 0xabe   :  { %4904 = vmatprep.mubr.msk.f32.mxu1 %vm92_vm0, %v1885_v2  ;;  %v2086_v2 = vld [vmem:[#allocation7 + $0x1d0] sm:$0xff] }
 0xac1   :  { %4905 = vmatmul.mubr.msk.f32.gmra.mxu1 %vm92_vm0, %v1886_v3 }
 0xac2   :  { %4907 = vmatprep.mubr.msk.f32.mxu1 %vm92_vm0, %v1887_v57 }
 0xac5   :  { %4908 = vmatmul.mubr.msk.f32.gmra.mxu1 %vm92_vm0, %v1888_v4 }
 0xb71   :  { %v4894_v10 = vpop.f32.mrf.mxu1 }
 0xb72   :  { %v2089_v12 = vmul.f32 %v4894_v10, %v2077_v14 }
 0xb73   :  { %v2007_v13 = vpop.f32.mrf.mxu1 }
 0xb74   :  { %v2088_v23 = vmul.f32 %v2076_v25, %v2007_v13  ;;  %v2093_v37 = vadd.f32 %v2089_v12, %v2072_v18 }
 0xb75   :  { %v4897_v7 = vpop.f32.mrf.mxu1 }
 0xb76   :  { %v2091_v38 = vmul.f32 %v4897_v7, %v2079_v32  ;;  %v2092_v45 = vadd.f32 %v2088_v23, %v2071_v27 }
 0xb77   :  { %v2017_v11 = vpop.f32.mrf.mxu1 }
 0xb78   :  { %v2090_v50 = vmul.f32 %v2078_v39, %v2017_v11  ;;  %v2095_v54 = vadd.f32 %v2091_v38, %v2074_v42 }
 0xb79   :  { %v4900_v15 = vpop.f32.mrf.mxu1 }
 0xb7a   :  { %v2097_v34 = vmul.f32 %v4900_v15, %v2081_v29  ;;  %v2094_v3 = vadd.f32 %v2090_v50, %v2073_v22 }
 0xb7b   :  { %v2027_v30 = vpop.f32.mrf.mxu1 }
 0xb7c   :  { %v2096_v41 = vmul.f32 %v2080_v17, %v2027_v30  ;;  %v2101_v46 = vadd.f32 %v2097_v34, %v2093_v37 }
 0xb7d   :  { %v4903_v19 = vpop.f32.mrf.mxu1 }
 0xb7e   :  { %v2099_v47 = vmul.f32 %v4903_v19, %v2083_v35  ;;  %v2100_v55 = vadd.f32 %v2096_v41, %v2092_v45 }
 0xb7f   :  { %v2037_v36 = vpop.f32.mrf.mxu1 }
 0xb80   :  { %v2098_v61 = vmul.f32 %v2082_v48, %v2037_v36  ;;  %v2103_v56 = vadd.f32 %v2099_v47, %v2095_v54 }
 0xb81   :  { %v4906_v43 = vpop.f32.mrf.mxu1 }
 0xb82   :  { %v2105_v49 = vmul.f32 %v4906_v43, %v2085_v20  ;;  %v2102_v8 = vadd.f32 %v2098_v61, %v2094_v3 }
 0xb83   :  { %v2047_v52 = vpop.f32.mrf.mxu1 }
 0xb84   :  { %v2109_v59 = vadd.f32 %v2105_v49, %v2101_v46  ;;  %v2104_v60 = vmul.f32 %v2084_v44, %v2047_v52 }
 0xb85   :  { %v4909_v62 = vpop.f32.mrf.mxu1 }
 0xb86   :  { %v2121_v63 = vadd.f32 %v4359_v51, %v2109_v59  ;;  %v2108_v0 = vadd.f32 %v2104_v60, %v2100_v55  ;;  %v2107_v1 = vmul.f32 %v4909_v62, %v2087_v28  ;;  %v4361_v55 = vld [vmem:[%s5919_s6 + $0x4] ss:$0 sm:$0xff] }
 0xb87   :  { %v2057_v57 = vpop.f32.mrf.mxu1  ;;  %v4363_v62 = vld [vmem:[%s5920_s7 + $0x4] ss:$0 sm:$0xff] }
 0xb88   :  { %v2139_v4 = vmul.f32 %v2121_v63, %v2121_v63  ;;  %v2120_v5 = vadd.f32 %v4359_v51, %v2108_v0  ;;  %v2111_v6 = vadd.f32 %v2107_v1, %v2103_v56  ;;  %v2106_v9 = vmul.f32 %v2086_v2, %v2057_v57 }
 0xb89   :  { %v2125_v10 = vsel %vm92_vm0, %v2121_v63, 0.0 }
 0xb8a   :  { %v2124_v13 = vsel %vm92_vm0, %v2120_v5, 0.0  ;;  %v2138_v7 = vmul.f32 %v2120_v5, %v2120_v5  ;;  %v2123_v11 = vadd.f32 %v4359_v51, %v2111_v6  ;;  %v2110_v14 = vadd.f32 %v2106_v9, %v2102_v8 }
 0xb8b   :  { %v2126_v53 = vadd.f32 %v2125_v10, %v2124_v13  ;;  %v2143_v15 = vsel %vm92_vm0, %v2139_v4, 0.0 }
 0xb8c   :  { %v2142_v24 = vsel %vm92_vm0, %v2138_v7, 0.0  ;;  %v2122_v29 = vadd.f32 %v4359_v51, %v2110_v14  ;;  %v2141_v30 = vmul.f32 %v2123_v11, %v2123_v11  ;;  %v2129_v17 = vsel %vm92_vm0, %v2123_v11, 0.0 }
 0xb8d   :  { %v2144_v25 = vadd.f32 %v2143_v15, %v2142_v24 }
 0xb8e   :  { %v2127_v12 = vsel %vm92_vm0, %v2122_v29, 0.0  ;;  %v2140_v31 = vmul.f32 %v2122_v29, %v2122_v29  ;;  %v2147_v23 = vsel %vm92_vm0, %v2141_v30, 0.0  ;;  %v2305_v30 = vld [vmem:[#allocation4 + $0x1f0] sm:$0xff] }
 0xb8f   :  { %v2128_v32 = vadd.f32 %v2127_v12, %v2126_v53  ;;  %v2306_v12 = vld [vmem:[#allocation4 + $0x1f8] sm:$0xff] }
 0xb90   :  { %v2145_v19 = vsel %vm92_vm0, %v2140_v31, 0.0  ;;  %v2307_v31 = vld [vmem:[#allocation4 + $0x200] sm:$0xff] }
 0xb91   :  { %v2130_v18 = vadd.f32 %v2129_v17, %v2128_v32  ;;  %v2146_v21 = vadd.f32 %v2145_v19, %v2144_v25  ;;  %v2308_v32 = vld [vmem:[#allocation4 + $0x208] sm:$0xff]  ;;  %v2309_v17 = vld [vmem:[#allocation4 + $0x210] sm:$0xff]  ;;  %v2310_v19 = vld [vmem:[#allocation4 + $0x218] sm:$0xff] }
 0xb93   :  { %v2131_v34 = vrot.slane %v2130_v18, 4  ;;  %v2148_v35 = vadd.f32 %v2147_v23, %v2146_v21  ;;  %v2312_v21 = vld [vmem:[#allocation4 + $0x228] sm:$0xff]  ;;  %v2313_v23 = vld [vmem:[#allocation4 + $0x230] sm:$0xff] }
 0xb95   :  { %v2132_v36 = vadd.f32 %v2131_v34, %v2130_v18  ;;  %v2149_v20 = vrot.slane %v2148_v35, 4  ;;  %v2311_v18 = vld [vmem:[#allocation4 + $0x220] sm:$0xff]  ;;  %v2314_v34 = vld [vmem:[#allocation4 + $0x238] sm:$0xff] }
 0xb97   :  { %v2133_v27 = vrot.slane %v2132_v36, 2  ;;  %v2150_v37 = vadd.f32 %v2149_v20, %v2148_v35  ;;  %v2626_v35 = vld [vmem:[#allocation2 + $0xd8] sm:$0xff]  ;;  %v2624_v20 = vld [vmem:[#allocation2 + $0xc8] sm:$0xff] }
 0xb98   :  { %4950 = vmatprep.subr.mxu1 %v2626_v35 }
 0xb99   :  { %v2134_v38 = vadd.f32 %v2133_v27, %v2132_v36  ;;  %v2151_v39 = vrot.slane %v2150_v37, 2  ;;  %v2625_v36 = vld [vmem:[#allocation2 + $0xd0] sm:$0xff]  ;;  %4951 = vmatpush3.msra.mxu1 %v2626_v35  ;;  %v2623_v27 = vld [vmem:[#allocation2 + $0xc0] sm:$0xff] }
 0xb9a   :  { %4952 = vmatprep.subr.mxu1 %v2625_v36 }
 0xb9b   :  { %v2135_v41 = vrot.slane %v2134_v38, 1  ;;  %v2152_v42 = vadd.f32 %v2151_v39, %v2150_v37  ;;  %4953 = vmatpush3.msra.mxu1 %v2625_v36 }
 0xb9c   :  { %4954 = vmatprep.subr.mxu1 %v2624_v20 }
 0xb9d   :  { %v2136_v43 = vadd.f32 %v2135_v41, %v2134_v38  ;;  %v2153_v44 = vrot.slane %v2152_v42, 1  ;;  %4955 = vmatpush3.msra.mxu1 %v2624_v20 }
 0xb9e   :  { %4956 = vmatprep.subr.mxu1 %v2623_v27 }
 0xb9f   :  { %v2137_v40 = vmul.f32 0.03125, %v2136_v43  ;;  %v2154_v45 = vadd.f32 %v2153_v44, %v2152_v42  ;;  %4957 = vmatpush3.msra.mxu1 %v2623_v27  ;;  %v2503_v42 = vld [vmem:[#allocation7 + $0x1e8] sm:$0xff] }
 0xba0   :  { %v2494_v44 = vld [vmem:[#allocation6 + $0xa8] sm:$0xff] }
 0xba1   :  { %v2155_v46 = vmul.f32 0.03125, %v2154_v45  ;;  %v2156_v47 = vmul.f32 %v2137_v40, %v2137_v40  ;;  %v2158_v48 = vsub.f32 %v2120_v5, %v2137_v40  ;;  %v2159_v49 = vsub.f32 %v2121_v63, %v2137_v40  ;;  %v2507_v45 = vld [vmem:[#allocation7 + $0x208] sm:$0xff] }
 0xba2   :  { %v2161_v50 = vsub.f32 %v2123_v11, %v2137_v40  ;;  %v2160_v28 = vsub.f32 %v2122_v29, %v2137_v40  ;;  %v2304_v29 = vld [vmem:[#allocation4 + $0x1e8] sm:$0xff]  ;;  %v2502_v40 = vld [vmem:[#allocation7 + $0x1e0] sm:$0xff] }
 0xba3   :  { %v2157_v51 = vsub.f32 %v2155_v46, %v2156_v47 }
 0xba5   :  { %v2162_v52 = vadd.f32 1e-05, %v2157_v51 }
 0xba7   :  { %5125 = vrsqrt.f32 %v2162_v52 }
 0xbb4   :  { %v5126_v54 = vpop.eup %5125 }
 0xbb5   :  { %v2166_v59 = vmul.f32 %v5126_v54, %v2160_v28  ;;  %v2164_v60 = vmul.f32 %v5126_v54, %v2158_v48  ;;  %v2165_v22 = vmul.f32 %v5126_v54, %v2159_v49  ;;  %v2167_v61 = vmul.f32 %v5126_v54, %v2161_v50  ;;  %v2493_v48 = vld [vmem:[#allocation6 + $0xa0] sm:$0xff]  ;;  %v2505_v49 = vld [vmem:[#allocation7 + $0x1f8] sm:$0xff] }
 0xbb6   :  { %v2506_v50 = vld [vmem:[#allocation7 + $0x200] sm:$0xff]  ;;  %v2496_v28 = vld [vmem:[#allocation6 + $0xb8] sm:$0xff] }
 0xbb7   :  { %v2176_v56 = vmul.f32 %v4361_v55, %v2164_v60  ;;  %v2177_v63 = vmul.f32 %v4361_v55, %v2165_v22  ;;  %v2178_v0 = vmul.f32 %v4361_v55, %v2166_v59  ;;  %v2179_v1 = vmul.f32 %v4361_v55, %v2167_v61  ;;  %v2509_v59 = vld [vmem:[#allocation7 + $0x218] sm:$0xff]  ;;  %v2511_v22 = vld [vmem:[#allocation7 + $0x228] sm:$0xff] }
 0xbb9   :  { %v2188_v2 = vadd.f32 %v4363_v62, %v2176_v56  ;;  %v2189_v3 = vadd.f32 %v4363_v62, %v2177_v63  ;;  %v2190_v57 = vadd.f32 %v4363_v62, %v2178_v0  ;;  %v2191_v4 = vadd.f32 %v4363_v62, %v2179_v1  ;;  %v2504_v63 = vld [vmem:[#allocation7 + $0x1f0] sm:$0xff] }
 0xbbb   :  { %v2192_v5 = vmax.f32 %v2188_v2, 0.0  ;;  %v2193_v6 = vmax.f32 %v2189_v3, 0.0  ;;  %v2194_v8 = vmax.f32 %v2190_v57, 0.0  ;;  %v2195_v13 = vmax.f32 %v2191_v4, 0.0  ;;  %v2510_v3 = vld [vmem:[#allocation7 + $0x220] sm:$0xff]  ;;  %v2495_v57 = vld [vmem:[#allocation6 + $0xb0] sm:$0xff] }
 0xbbd   :  { %v5615_v9 = vadd.f32 %v2192_v5, %v5490_v58  ;;  %v5618_v10 = vadd.f32 %v2193_v6, %v5494_v26  ;;  %v5623_v7 = vadd.f32 %v2194_v8, %v5500_v33  ;;  %v5630_v53 = vadd.f32 %v2195_v13, %v5508_v16  ;;  %v2303_v58 = vld [vmem:[#allocation4 + $0x1e0] sm:$0xff]  ;;  %v2508_v8 = vld [vmem:[#allocation7 + $0x210] sm:$0xff] }
 0xbbf   :  { %4918 = vmatprep.mubr.msk.f32.mxu0 %vm92_vm0, %v5615_v9 }
 0xbc0   :  { %4919 = vmatmul.mubr.msk.f32.vlgmr.msra.gmra.mxu0 %vm92_vm0, %v5618_v10 }
 0xbc1   :  { %4921 = vmatprep.mubr.msk.f32.mxu0 %vm92_vm0, %v5623_v7 }
 0xbc4   :  { %4922 = vmatmul.mubr.msk.f32.gmra.mxu0 %vm92_vm0, %v5630_v53 }
 0xbc5   :  { %4932 = vmatprep.mubr.msk.f32.mxu0 %vm92_vm0, %v2303_v58 }
 0xc80   :  { %v5634_v26 = vpop.f32.mrf.mxu0 }
 0xc81   :  { %v2498_v52 = vmul.f32 %v5634_v26, %v2494_v44 }
 0xc82   :  { %v5637_v11 = vpop.f32.mrf.mxu0 }
 0xc83   :  { %v2497_v61 = vmul.f32 %v2493_v48, %v5637_v11 }
 0xc84   :  { %v5639_v33 = vpop.f32.mrf.mxu0 }
 0xc85   :  { %2325 = vrot.lane.b32.xlu0 %v5639_v33, %s5227_s9  ;;  %v2500_v1 = vmul.f32 %v5639_v33, %v2496_v28 }
 0xc86   :  { %v5643_v14 = vpop.f32.mrf.mxu0 }
 0xc87   :  { %2323 = vrot.lane.b32.xlu1 %v5643_v14, %s5227_s9  ;;  %v2499_v33 = vmul.f32 %v2495_v57, %v5643_v14 }
 0xc89   :  { %2321 = vrot.lane.b32.xlu0 %v5634_v26, %s5227_s9  ;;  %v4381_v26 = vld [vmem:[%s5918_s5 + $0x5] ss:$0 sm:$0xff] }
 0xc8b   :  { %2319 = vrot.lane.b32.xlu1 %v5637_v11, %s5227_s9 }
 0xcf7   :  { %v2326_v16 = vpop.permute.xlu0 %2325 }
 0xcf8   :  { %4924 = vmatprep.subr.mxu0 %v2326_v16 }
 0xcf9   :  { %4925 = vmatpush3.msra.mxu0 %v2326_v16  ;;  %v2324_v15 = vpop.permute.xlu1 %2323  ;;  %v2513_v16 = vld [vmem:[#allocation7 + $0x238] sm:$0xff] }
 0xcfa   :  { %4926 = vmatprep.subr.mxu0 %v2324_v15 }
 0xcfb   :  { %v2322_v24 = vpop.permute.xlu0 %2321  ;;  %4927 = vmatpush3.msra.mxu0 %v2324_v15 }
 0xcfc   :  { %4928 = vmatprep.subr.mxu0 %v2322_v24 }
 0xcfd   :  { %4929 = vmatpush3.msra.mxu0 %v2322_v24  ;;  %v2320_v25 = vpop.permute.xlu1 %2319 }
 0xcfe   :  { %4930 = vmatprep.subr.mxu0 %v2320_v25 }
 0xcff   :  { %4931 = vmatpush3.msra.mxu0 %v2320_v25 }
 0xd00   :  { %4933 = vmatmul.mubr.msk.f32.vlgmr.msra.gmra.mxu0 %vm92_vm0, %v2304_v29 }
 0xd01   :  { %4935 = vmatprep.mubr.msk.f32.mxu0 %vm92_vm0, %v2305_v30 }
 0xd04   :  { %4936 = vmatmul.mubr.msk.f32.gmra.mxu0 %vm92_vm0, %v2306_v12 }
 0xd05   :  { %4938 = vmatprep.mubr.msk.f32.mxu0 %vm92_vm0, %v2307_v31 }
 0xd08   :  { %4939 = vmatmul.mubr.msk.f32.gmra.mxu0 %vm92_vm0, %v2308_v32 }
 0xd09   :  { %4941 = vmatprep.mubr.msk.f32.mxu0 %vm92_vm0, %v2309_v17 }
 0xd0c   :  { %4942 = vmatmul.mubr.msk.f32.gmra.mxu0 %vm92_vm0, %v2310_v19 }
 0xd0d   :  { %4944 = vmatprep.mubr.msk.f32.mxu0 %vm92_vm0, %v2311_v18  ;;  %v2512_v18 = vld [vmem:[#allocation7 + $0x230] sm:$0xff] }
 0xd10   :  { %4945 = vmatmul.mubr.msk.f32.gmra.mxu0 %vm92_vm0, %v2312_v21 }
 0xd11   :  { %4947 = vmatprep.mubr.msk.f32.mxu0 %vm92_vm0, %v2313_v23 }
 0xd14   :  { %4948 = vmatmul.mubr.msk.f32.gmra.mxu0 %vm92_vm0, %v2314_v34 }
 0xdc0   :  { %v4934_v37 = vpop.f32.mrf.mxu0 }
 0xdc1   :  { %v2515_v47 = vmul.f32 %v4934_v37, %v2503_v42 }
 0xdc2   :  { %v2433_v38 = vpop.f32.mrf.mxu0 }
 0xdc3   :  { %v2514_v54 = vmul.f32 %v2502_v40, %v2433_v38  ;;  %v2519_v62 = vadd.f32 %v2515_v47, %v2498_v52 }
 0xdc4   :  { %v4937_v39 = vpop.f32.mrf.mxu0 }
 0xdc5   :  { %v2517_v56 = vmul.f32 %v4937_v39, %v2505_v49  ;;  %v2518_v4 = vadd.f32 %v2514_v54, %v2497_v61 }
 0xdc6   :  { %v2443_v41 = vpop.f32.mrf.mxu0 }
 0xdc7   :  { %v2516_v58 = vmul.f32 %v2504_v63, %v2443_v41  ;;  %v2521_v15 = vadd.f32 %v2517_v56, %v2500_v1 }
 0xdc8   :  { %v4940_v43 = vpop.f32.mrf.mxu0 }
 0xdc9   :  { %v2523_v55 = vmul.f32 %v4940_v43, %v2507_v45  ;;  %v2520_v21 = vadd.f32 %v2516_v58, %v2499_v33 }
 0xdca   :  { %v2453_v46 = vpop.f32.mrf.mxu0 }
 0xdcb   :  { %v2522_v0 = vmul.f32 %v2506_v50, %v2453_v46  ;;  %v2527_v5 = vadd.f32 %v2523_v55, %v2519_v62 }
 0xdcc   :  { %v4943_v51 = vpop.f32.mrf.mxu0 }
 0xdcd   :  { %v2525_v6 = vmul.f32 %v4943_v51, %v2509_v59  ;;  %v2526_v24 = vadd.f32 %v2522_v0, %v2518_v4 }
 0xdce   :  { %v2463_v60 = vpop.f32.mrf.mxu0 }
 0xdcf   :  { %v2524_v30 = vmul.f32 %v2508_v8, %v2463_v60  ;;  %v2529_v31 = vadd.f32 %v2525_v6, %v2521_v15 }
 0xdd0   :  { %v4946_v2 = vpop.f32.mrf.mxu0 }
 0xdd1   :  { %v2531_v13 = vmul.f32 %v4946_v2, %v2511_v22  ;;  %v2528_v20 = vadd.f32 %v2524_v30, %v2520_v21 }
 0xdd2   :  { %v2473_v11 = vpop.f32.mrf.mxu0 }
 0xdd3   :  { %v2535_v25 = vadd.f32 %v2531_v13, %v2527_v5  ;;  %v2530_v29 = vmul.f32 %v2510_v3, %v2473_v11 }
 0xdd4   :  { %v4949_v12 = vpop.f32.mrf.mxu0 }
 0xdd5   :  { %v2547_v32 = vadd.f32 %v4381_v26, %v2535_v25  ;;  %v2534_v17 = vadd.f32 %v2530_v29, %v2526_v24  ;;  %v2533_v19 = vmul.f32 %v4949_v12, %v2513_v16  ;;  %v4383_v24 = vld [vmem:[%s5919_s6 + $0x5] ss:$0 sm:$0xff] }
 0xdd6   :  { %v2483_v23 = vpop.f32.mrf.mxu0  ;;  %v4385_v12 = vld [vmem:[%s5920_s7 + $0x5] ss:$0 sm:$0xff] }
 0xdd7   :  { %v2565_v34 = vmul.f32 %v2547_v32, %v2547_v32  ;;  %v2546_v35 = vadd.f32 %v4381_v26, %v2534_v17  ;;  %v2537_v36 = vadd.f32 %v2533_v19, %v2529_v31  ;;  %v2532_v27 = vmul.f32 %v2512_v18, %v2483_v23 }
 0xdd8   :  { %v2551_v37 = vsel %vm92_vm0, %v2547_v32, 0.0 }
 0xdd9   :  { %v2550_v38 = vsel %vm92_vm0, %v2546_v35, 0.0  ;;  %v2564_v39 = vmul.f32 %v2546_v35, %v2546_v35  ;;  %v2549_v41 = vadd.f32 %v4381_v26, %v2537_v36  ;;  %v2536_v42 = vadd.f32 %v2532_v27, %v2528_v20 }
 0xdda   :  { %v2552_v14 = vadd.f32 %v2551_v37, %v2550_v38  ;;  %v2569_v43 = vsel %vm92_vm0, %v2565_v34, 0.0  ;;  %v2725_v37 = vld [vmem:[#allocation4 + $0x240] sm:$0xff] }
 0xddb   :  { %v2568_v44 = vsel %vm92_vm0, %v2564_v39, 0.0  ;;  %v2548_v45 = vadd.f32 %v4381_v26, %v2536_v42  ;;  %v2567_v46 = vmul.f32 %v2549_v41, %v2549_v41  ;;  %v2555_v50 = vsel %vm92_vm0, %v2549_v41, 0.0 }
 0xddc   :  { %v2570_v40 = vadd.f32 %v2569_v43, %v2568_v44 }
 0xddd   :  { %v2553_v47 = vsel %vm92_vm0, %v2548_v45, 0.0  ;;  %v2566_v48 = vmul.f32 %v2548_v45, %v2548_v45  ;;  %v2573_v54 = vsel %vm92_vm0, %v2567_v46, 0.0  ;;  %v2727_v46 = vld [vmem:[#allocation4 + $0x250] sm:$0xff] }
 0xdde   :  { %v2554_v49 = vadd.f32 %v2553_v47, %v2552_v14  ;;  %v2728_v47 = vld [vmem:[#allocation4 + $0x258] sm:$0xff] }
 0xddf   :  { %v2571_v51 = vsel %vm92_vm0, %v2566_v48, 0.0  ;;  %v2729_v48 = vld [vmem:[#allocation4 + $0x260] sm:$0xff] }
 0xde0   :  { %v2556_v52 = vadd.f32 %v2555_v50, %v2554_v49  ;;  %v2572_v28 = vadd.f32 %v2571_v51, %v2570_v40  ;;  %v2730_v49 = vld [vmem:[#allocation4 + $0x268] sm:$0xff]  ;;  %v2731_v50 = vld [vmem:[#allocation4 + $0x270] sm:$0xff]  ;;  %v2732_v51 = vld [vmem:[#allocation4 + $0x278] sm:$0xff] }
 0xde2   :  { %v2557_v55 = vrot.slane %v2556_v52, 4  ;;  %v2574_v59 = vadd.f32 %v2573_v54, %v2572_v28  ;;  %v2734_v28 = vld [vmem:[#allocation4 + $0x288] sm:$0xff]  ;;  %v2735_v54 = vld [vmem:[#allocation4 + $0x290] sm:$0xff] }
 0xde4   :  { %v2558_v60 = vadd.f32 %v2557_v55, %v2556_v52  ;;  %v2575_v22 = vrot.slane %v2574_v59, 4  ;;  %v2733_v52 = vld [vmem:[#allocation4 + $0x280] sm:$0xff]  ;;  %v2736_v55 = vld [vmem:[#allocation4 + $0x298] sm:$0xff] }
 0xde6   :  { %v2559_v61 = vrot.slane %v2558_v60, 2  ;;  %v2576_v62 = vadd.f32 %v2575_v22, %v2574_v59  ;;  %v3052_v59 = vld [vmem:[#allocation2 + $0xf8] sm:$0xff]  ;;  %v3050_v22 = vld [vmem:[#allocation2 + $0xe8] sm:$0xff] }
 0xde7   :  { %4990 = vmatprep.subr.mxu0 %v3052_v59 }
 0xde8   :  { %v2560_v56 = vadd.f32 %v2559_v61, %v2558_v60  ;;  %v2577_v63 = vrot.slane %v2576_v62, 2  ;;  %v3051_v60 = vld [vmem:[#allocation2 + $0xf0] sm:$0xff]  ;;  %4991 = vmatpush3.msra.mxu0 %v3052_v59  ;;  %v3049_v61 = vld [vmem:[#allocation2 + $0xe0] sm:$0xff] }
 0xde9   :  { %4992 = vmatprep.subr.mxu0 %v3051_v60 }
 0xdea   :  { %v2561_v0 = vrot.slane %v2560_v56, 1  ;;  %v2578_v1 = vadd.f32 %v2577_v63, %v2576_v62  ;;  %4993 = vmatpush3.msra.mxu0 %v3051_v60 }
 0xdeb   :  { %4994 = vmatprep.subr.mxu0 %v3050_v22 }
 0xdec   :  { %v2562_v2 = vadd.f32 %v2561_v0, %v2560_v56  ;;  %v2579_v3 = vrot.slane %v2578_v1, 1  ;;  %4995 = vmatpush3.msra.mxu0 %v3050_v22 }
 0xded   :  { %4996 = vmatprep.subr.mxu0 %v3049_v61 }
 0xdee   :  { %v2563_v57 = vmul.f32 0.03125, %v2562_v2  ;;  %v2580_v4 = vadd.f32 %v2579_v3, %v2578_v1  ;;  %4997 = vmatpush3.msra.mxu0 %v3049_v61  ;;  %v2925_v1 = vld [vmem:[#allocation7 + $0x248] sm:$0xff] }
 0xdef   :  { %v2916_v3 = vld [vmem:[#allocation6 + $0xc8] sm:$0xff] }
 0xdf0   :  { %v2581_v5 = vmul.f32 0.03125, %v2580_v4  ;;  %v2582_v6 = vmul.f32 %v2563_v57, %v2563_v57  ;;  %v2584_v8 = vsub.f32 %v2546_v35, %v2563_v57  ;;  %v2585_v13 = vsub.f32 %v2547_v32, %v2563_v57  ;;  %v2929_v4 = vld [vmem:[#allocation7 + $0x268] sm:$0xff] }
 0xdf1   :  { %v2587_v58 = vsub.f32 %v2549_v41, %v2563_v57  ;;  %v2586_v16 = vsub.f32 %v2548_v45, %v2563_v57  ;;  %v2726_v45 = vld [vmem:[#allocation4 + $0x248] sm:$0xff]  ;;  %v2924_v57 = vld [vmem:[#allocation7 + $0x240] sm:$0xff] }
 0xdf2   :  { %v2583_v26 = vsub.f32 %v2581_v5, %v2582_v6 }
 0xdf4   :  { %v2588_v11 = vadd.f32 1e-05, %v2583_v26 }
 0xdf6   :  { %5127 = vrsqrt.f32 %v2588_v11 }
 0xe03   :  { %v5128_v15 = vpop.eup %5127 }
 0xe04   :  { %v2592_v25 = vmul.f32 %v5128_v15, %v2586_v16  ;;  %v2590_v29 = vmul.f32 %v5128_v15, %v2584_v8  ;;  %v2591_v33 = vmul.f32 %v5128_v15, %v2585_v13  ;;  %v2593_v30 = vmul.f32 %v5128_v15, %v2587_v58  ;;  %v2915_v8 = vld [vmem:[#allocation6 + $0xc0] sm:$0xff]  ;;  %v2927_v13 = vld [vmem:[#allocation7 + $0x258] sm:$0xff] }
 0xe05   :  { %v2928_v58 = vld [vmem:[#allocation7 + $0x260] sm:$0xff]  ;;  %v2918_v16 = vld [vmem:[#allocation6 + $0xd8] sm:$0xff] }
 0xe06   :  { %v2602_v31 = vmul.f32 %v4383_v24, %v2590_v29  ;;  %v2603_v32 = vmul.f32 %v4383_v24, %v2591_v33  ;;  %v2604_v17 = vmul.f32 %v4383_v24, %v2592_v25  ;;  %v2605_v19 = vmul.f32 %v4383_v24, %v2593_v30  ;;  %v2931_v25 = vld [vmem:[#allocation7 + $0x278] sm:$0xff]  ;;  %v2933_v33 = vld [vmem:[#allocation7 + $0x288] sm:$0xff] }
 0xe08   :  { %v2614_v18 = vadd.f32 %v4385_v12, %v2602_v31  ;;  %v2615_v21 = vadd.f32 %v4385_v12, %v2603_v32  ;;  %v2616_v23 = vadd.f32 %v4385_v12, %v2604_v17  ;;  %v2617_v36 = vadd.f32 %v4385_v12, %v2605_v19  ;;  %v2926_v32 = vld [vmem:[#allocation7 + $0x250] sm:$0xff] }
 0xe0a   :  { %v2618_v34 = vmax.f32 %v2614_v18, 0.0  ;;  %v2619_v35 = vmax.f32 %v2615_v21, 0.0  ;;  %v2620_v20 = vmax.f32 %v2616_v23, 0.0  ;;  %v2621_v27 = vmax.f32 %v2617_v36, 0.0  ;;  %v2932_v21 = vld [vmem:[#allocation7 + $0x280] sm:$0xff]  ;;  %v2917_v23 = vld [vmem:[#allocation6 + $0xd0] sm:$0xff] }
 0xe0c   :  { %4958 = vmatprep.mubr.msk.f32.mxu1 %vm92_vm0, %v2618_v34 }
 0xe0d   :  { %4959 = vmatmul.mubr.msk.f32.vlgmr.msra.gmra.mxu1 %vm92_vm0, %v2619_v35 }
 0xe0e   :  { %4961 = vmatprep.mubr.msk.f32.mxu1 %vm92_vm0, %v2620_v20  ;;  %v2930_v20 = vld [vmem:[#allocation7 + $0x270] sm:$0xff] }
 0xe11   :  { %4962 = vmatmul.mubr.msk.f32.gmra.mxu1 %vm92_vm0, %v2621_v27 }
 0xe12   :  { %4972 = vmatprep.mubr.msk.f32.mxu1 %vm92_vm0, %v2725_v37 }
 0xecd   :  { %v5687_v38 = vpop.f32.mrf.mxu1 }
 0xece   :  { %v2920_v11 = vmul.f32 %v5687_v38, %v2916_v3 }
 0xecf   :  { %v5690_v39 = vpop.f32.mrf.mxu1 }
 0xed0   :  { %v2919_v30 = vmul.f32 %v2915_v8, %v5690_v39 }
 0xed1   :  { %v5692_v14 = vpop.f32.mrf.mxu1 }
 0xed2   :  { %2747 = vrot.lane.b32.xlu0 %v5692_v14, %s5227_s9  ;;  %v2922_v19 = vmul.f32 %v5692_v14, %v2918_v16 }
 0xed3   :  { %v5696_v41 = vpop.f32.mrf.mxu1 }
 0xed4   :  { %2745 = vrot.lane.b32.xlu1 %v5696_v41, %s5227_s9  ;;  %v2921_v14 = vmul.f32 %v2917_v23, %v5696_v41 }
 0xed6   :  { %2743 = vrot.lane.b32.xlu0 %v5687_v38, %s5227_s9  ;;  %v4403_v38 = vld [vmem:[%s5918_s5 + $0x6] ss:$0 sm:$0xff] }
 0xed8   :  { %2741 = vrot.lane.b32.xlu1 %v5690_v39, %s5227_s9 }
 0xf44   :  { %v2748_v42 = vpop.permute.xlu0 %2747 }
 0xf45   :  { %4964 = vmatprep.subr.mxu1 %v2748_v42 }
 0xf46   :  { %4965 = vmatpush3.msra.mxu1 %v2748_v42  ;;  %v2746_v43 = vpop.permute.xlu1 %2745  ;;  %v2935_v42 = vld [vmem:[#allocation7 + $0x298] sm:$0xff] }
 0xf47   :  { %4966 = vmatprep.subr.mxu1 %v2746_v43 }
 0xf48   :  { %v2744_v44 = vpop.permute.xlu0 %2743  ;;  %4967 = vmatpush3.msra.mxu1 %v2746_v43 }
 0xf49   :  { %4968 = vmatprep.subr.mxu1 %v2744_v44 }
 0xf4a   :  { %4969 = vmatpush3.msra.mxu1 %v2744_v44  ;;  %v2742_v40 = vpop.permute.xlu1 %2741 }
 0xf4b   :  { %4970 = vmatprep.subr.mxu1 %v2742_v40 }
 0xf4c   :  { %4971 = vmatpush3.msra.mxu1 %v2742_v40 }
 0xf4d   :  { %4973 = vmatmul.mubr.msk.f32.vlgmr.msra.gmra.mxu1 %vm92_vm0, %v2726_v45 }
 0xf4e   :  { %4975 = vmatprep.mubr.msk.f32.mxu1 %vm92_vm0, %v2727_v46 }
 0xf51   :  { %4976 = vmatmul.mubr.msk.f32.gmra.mxu1 %vm92_vm0, %v2728_v47 }
 0xf52   :  { %4978 = vmatprep.mubr.msk.f32.mxu1 %vm92_vm0, %v2729_v48 }
 0xf55   :  { %4979 = vmatmul.mubr.msk.f32.gmra.mxu1 %vm92_vm0, %v2730_v49 }
 0xf56   :  { %4981 = vmatprep.mubr.msk.f32.mxu1 %vm92_vm0, %v2731_v50 }
 0xf59   :  { %4982 = vmatmul.mubr.msk.f32.gmra.mxu1 %vm92_vm0, %v2732_v51 }
 0xf5a   :  { %4984 = vmatprep.mubr.msk.f32.mxu1 %vm92_vm0, %v2733_v52  ;;  %v2934_v52 = vld [vmem:[#allocation7 + $0x290] sm:$0xff] }
 0xf5d   :  { %4985 = vmatmul.mubr.msk.f32.gmra.mxu1 %vm92_vm0, %v2734_v28 }
 0xf5e   :  { %4987 = vmatprep.mubr.msk.f32.mxu1 %vm92_vm0, %v2735_v54 }
 0xf61   :  { %4988 = vmatmul.mubr.msk.f32.gmra.mxu1 %vm92_vm0, %v2736_v55 }
0x100d   :  { %v4974_v62 = vpop.f32.mrf.mxu1 }
0x100e   :  { %v2937_v6 = vmul.f32 %v4974_v62, %v2925_v1 }
0x100f   :  { %v2855_v56 = vpop.f32.mrf.mxu1 }
0x1010   :  { %v2936_v15 = vmul.f32 %v2924_v57, %v2855_v56  ;;  %v2941_v12 = vadd.f32 %v2937_v6, %v2920_v11 }
0x1011   :  { %v4977_v63 = vpop.f32.mrf.mxu1 }
0x1012   :  { %v2939_v31 = vmul.f32 %v4977_v63, %v2927_v13  ;;  %v2940_v34 = vadd.f32 %v2936_v15, %v2919_v30 }
0x1013   :  { %v2865_v0 = vpop.f32.mrf.mxu1 }
0x1014   :  { %v2938_v37 = vmul.f32 %v2926_v32, %v2865_v0  ;;  %v2943_v43 = vadd.f32 %v2939_v31, %v2922_v19 }
0x1015   :  { %v4980_v2 = vpop.f32.mrf.mxu1 }
0x1016   :  { %v2945_v24 = vmul.f32 %v4980_v2, %v2929_v4  ;;  %v2942_v28 = vadd.f32 %v2938_v37, %v2921_v14 }
0x1017   :  { %v2875_v5 = vpop.f32.mrf.mxu1 }
0x1018   :  { %v2944_v17 = vmul.f32 %v2928_v58, %v2875_v5  ;;  %v2949_v35 = vadd.f32 %v2945_v24, %v2941_v12 }
0x1019   :  { %v4983_v26 = vpop.f32.mrf.mxu1 }
0x101a   :  { %v2947_v36 = vmul.f32 %v4983_v26, %v2931_v25  ;;  %v2948_v44 = vadd.f32 %v2944_v17, %v2940_v34 }
0x101b   :  { %v2885_v29 = vpop.f32.mrf.mxu1 }
0x101c   :  { %v2946_v46 = vmul.f32 %v2930_v20, %v2885_v29  ;;  %v2951_v48 = vadd.f32 %v2947_v36, %v2943_v43 }
0x101d   :  { %v4986_v18 = vpop.f32.mrf.mxu1 }
0x101e   :  { %v2953_v27 = vmul.f32 %v4986_v18, %v2933_v33  ;;  %v2950_v22 = vadd.f32 %v2946_v46, %v2942_v28 }
0x101f   :  { %v2895_v39 = vpop.f32.mrf.mxu1 }
0x1020   :  { %v2957_v40 = vadd.f32 %v2953_v27, %v2949_v35  ;;  %v2952_v45 = vmul.f32 %v2932_v21, %v2895_v39 }
0x1021   :  { %v4989_v47 = vpop.f32.mrf.mxu1 }
0x1022   :  { %v2969_v49 = vadd.f32 %v4403_v38, %v2957_v40  ;;  %v2956_v50 = vadd.f32 %v2952_v45, %v2948_v44  ;;  %v2955_v51 = vmul.f32 %v4989_v47, %v2935_v42  ;;  %v4405_v44 = vld [vmem:[%s5919_s6 + $0x6] ss:$0 sm:$0xff] }
0x1023   :  { %v2905_v54 = vpop.f32.mrf.mxu1  ;;  %v4407_v47 = vld [vmem:[%s5920_s7 + $0x6] ss:$0 sm:$0xff] }
0x1024   :  { %v2987_v55 = vmul.f32 %v2969_v49, %v2969_v49  ;;  %v2968_v59 = vadd.f32 %v4403_v38, %v2956_v50  ;;  %v2959_v60 = vadd.f32 %v2955_v51, %v2951_v48  ;;  %v2954_v61 = vmul.f32 %v2934_v52, %v2905_v54 }
0x1025   :  { %v2973_v62 = vsel %vm92_vm0, %v2969_v49, 0.0 }
0x1026   :  { %v2972_v56 = vsel %vm92_vm0, %v2968_v59, 0.0  ;;  %v2986_v63 = vmul.f32 %v2968_v59, %v2968_v59  ;;  %v2971_v0 = vadd.f32 %v4403_v38, %v2959_v60  ;;  %v2958_v1 = vadd.f32 %v2954_v61, %v2950_v22 }
0x1027   :  { %v2974_v41 = vadd.f32 %v2973_v62, %v2972_v56  ;;  %v2991_v2 = vsel %vm92_vm0, %v2987_v55, 0.0 }
0x1028   :  { %v2990_v3 = vsel %vm92_vm0, %v2986_v63, 0.0  ;;  %v2970_v4 = vadd.f32 %v4403_v38, %v2958_v1  ;;  %v2989_v5 = vmul.f32 %v2971_v0, %v2971_v0  ;;  %v2977_v58 = vsel %vm92_vm0, %v2971_v0, 0.0 }
0x1029   :  { %v2992_v57 = vadd.f32 %v2991_v2, %v2990_v3 }
0x102a   :  { %v2975_v6 = vsel %vm92_vm0, %v2970_v4, 0.0  ;;  %v2988_v8 = vmul.f32 %v2970_v4, %v2970_v4  ;;  %v2995_v15 = vsel %vm92_vm0, %v2989_v5, 0.0  ;;  %v3153_v5 = vld [vmem:[#allocation4 + $0x2b0] sm:$0xff] }
0x102b   :  { %v2976_v13 = vadd.f32 %v2975_v6, %v2974_v41  ;;  %v3154_v6 = vld [vmem:[#allocation4 + $0x2b8] sm:$0xff] }
0x102c   :  { %v2993_v26 = vsel %vm92_vm0, %v2988_v8, 0.0  ;;  %v3155_v8 = vld [vmem:[#allocation4 + $0x2c0] sm:$0xff] }
0x102d   :  { %v2978_v11 = vadd.f32 %v2977_v58, %v2976_v13  ;;  %v2994_v16 = vadd.f32 %v2993_v26, %v2992_v57  ;;  %v3156_v13 = vld [vmem:[#allocation4 + $0x2c8] sm:$0xff]  ;;  %v3157_v58 = vld [vmem:[#allocation4 + $0x2d0] sm:$0xff]  ;;  %v3158_v26 = vld [vmem:[#allocation4 + $0x2d8] sm:$0xff] }
0x102f   :  { %v2979_v24 = vrot.slane %v2978_v11, 4  ;;  %v2996_v25 = vadd.f32 %v2995_v15, %v2994_v16  ;;  %v3160_v16 = vld [vmem:[#allocation4 + $0x2e8] sm:$0xff]  ;;  %v3161_v15 = vld [vmem:[#allocation4 + $0x2f0] sm:$0xff] }
0x1031   :  { %v2980_v29 = vadd.f32 %v2979_v24, %v2978_v11  ;;  %v2997_v33 = vrot.slane %v2996_v25, 4  ;;  %v3159_v11 = vld [vmem:[#allocation4 + $0x2e0] sm:$0xff]  ;;  %v3162_v24 = vld [vmem:[#allocation4 + $0x2f8] sm:$0xff] }
0x1033   :  { %v2981_v30 = vrot.slane %v2980_v29, 2  ;;  %v2998_v12 = vadd.f32 %v2997_v33, %v2996_v25  ;;  %v3474_v25 = vld [vmem:[#allocation2 + $0x118] sm:$0xff]  ;;  %v3472_v33 = vld [vmem:[#allocation2 + $0x108] sm:$0xff] }
0x1034   :  { %5030 = vmatprep.subr.mxu1 %v3474_v25 }
0x1035   :  { %v2982_v31 = vadd.f32 %v2981_v30, %v2980_v29  ;;  %v2999_v32 = vrot.slane %v2998_v12, 2  ;;  %v3473_v29 = vld [vmem:[#allocation2 + $0x110] sm:$0xff]  ;;  %5031 = vmatpush3.msra.mxu1 %v3474_v25  ;;  %v3471_v30 = vld [vmem:[#allocation2 + $0x100] sm:$0xff] }
0x1036   :  { %5032 = vmatprep.subr.mxu1 %v3473_v29 }
0x1037   :  { %v2983_v17 = vrot.slane %v2982_v31, 1  ;;  %v3000_v19 = vadd.f32 %v2999_v32, %v2998_v12  ;;  %5033 = vmatpush3.msra.mxu1 %v3473_v29 }
0x1038   :  { %5034 = vmatprep.subr.mxu1 %v3472_v33 }
0x1039   :  { %v2984_v18 = vadd.f32 %v2983_v17, %v2982_v31  ;;  %v3001_v21 = vrot.slane %v3000_v19, 1  ;;  %5035 = vmatpush3.msra.mxu1 %v3472_v33 }
0x103a   :  { %5036 = vmatprep.subr.mxu1 %v3471_v30 }
0x103b   :  { %v2985_v23 = vmul.f32 0.03125, %v2984_v18  ;;  %v3002_v34 = vadd.f32 %v3001_v21, %v3000_v19  ;;  %5037 = vmatpush3.msra.mxu1 %v3471_v30  ;;  %v3351_v19 = vld [vmem:[#allocation7 + $0x2a8] sm:$0xff] }
0x103c   :  { %v3342_v21 = vld [vmem:[#allocation6 + $0xe8] sm:$0xff] }
0x103d   :  { %v3003_v35 = vmul.f32 0.03125, %v3002_v34  ;;  %v3004_v36 = vmul.f32 %v2985_v23, %v2985_v23  ;;  %v3006_v20 = vsub.f32 %v2968_v59, %v2985_v23  ;;  %v3007_v27 = vsub.f32 %v2969_v49, %v2985_v23  ;;  %v3355_v34 = vld [vmem:[#allocation7 + $0x2c8] sm:$0xff] }
0x103e   :  { %v3009_v37 = vsub.f32 %v2971_v0, %v2985_v23  ;;  %v3008_v42 = vsub.f32 %v2970_v4, %v2985_v23  ;;  %v3152_v4 = vld [vmem:[#allocation4 + $0x2a8] sm:$0xff]  ;;  %v3350_v23 = vld [vmem:[#allocation7 + $0x2a0] sm:$0xff] }
0x103f   :  { %v3005_v38 = vsub.f32 %v3003_v35, %v3004_v36 }
0x1041   :  { %v3010_v39 = vadd.f32 1e-05, %v3005_v38 }
0x1043   :  { %5129 = vrsqrt.f32 %v3010_v39 }
0x1050   :  { %v5130_v43 = vpop.eup %5129 }
0x1051   :  { %v3014_v40 = vmul.f32 %v5130_v43, %v3008_v42  ;;  %v3012_v45 = vmul.f32 %v5130_v43, %v3006_v20  ;;  %v3013_v14 = vmul.f32 %v5130_v43, %v3007_v27  ;;  %v3015_v46 = vmul.f32 %v5130_v43, %v3009_v37  ;;  %v3341_v20 = vld [vmem:[#allocation6 + $0xe0] sm:$0xff]  ;;  %v3353_v27 = vld [vmem:[#allocation7 + $0x2b8] sm:$0xff] }
0x1052   :  { %v3354_v37 = vld [vmem:[#allocation7 + $0x2c0] sm:$0xff]  ;;  %v3344_v42 = vld [vmem:[#allocation6 + $0xf8] sm:$0xff] }
0x1053   :  { %v3024_v48 = vmul.f32 %v4405_v44, %v3012_v45  ;;  %v3025_v49 = vmul.f32 %v4405_v44, %v3013_v14  ;;  %v3026_v50 = vmul.f32 %v4405_v44, %v3014_v40  ;;  %v3027_v51 = vmul.f32 %v4405_v44, %v3015_v46  ;;  %v3357_v40 = vld [vmem:[#allocation7 + $0x2d8] sm:$0xff]  ;;  %v3359_v14 = vld [vmem:[#allocation7 + $0x2e8] sm:$0xff] }
0x1055   :  { %v3036_v52 = vadd.f32 %v4407_v47, %v3024_v48  ;;  %v3037_v28 = vadd.f32 %v4407_v47, %v3025_v49  ;;  %v3038_v54 = vadd.f32 %v4407_v47, %v3026_v50  ;;  %v3039_v55 = vadd.f32 %v4407_v47, %v3027_v51  ;;  %v3352_v49 = vld [vmem:[#allocation7 + $0x2b0] sm:$0xff] }
0x1057   :  { %v3040_v59 = vmax.f32 %v3036_v52, 0.0  ;;  %v3041_v60 = vmax.f32 %v3037_v28, 0.0  ;;  %v3042_v22 = vmax.f32 %v3038_v54, 0.0  ;;  %v3043_v56 = vmax.f32 %v3039_v55, 0.0  ;;  %v3358_v28 = vld [vmem:[#allocation7 + $0x2e0] sm:$0xff]  ;;  %v3343_v54 = vld [vmem:[#allocation6 + $0xf0] sm:$0xff] }
0x1059   :  { %v5737_v61 = vadd.f32 %v3040_v59, %v5615_v9  ;;  %v5740_v62 = vadd.f32 %v3041_v60, %v5618_v10  ;;  %v5745_v63 = vadd.f32 %v3042_v22, %v5623_v7  ;;  %v5752_v41 = vadd.f32 %v3043_v56, %v5630_v53  ;;  %v3151_v9 = vld [vmem:[#allocation4 + $0x2a0] sm:$0xff]  ;;  %v3356_v22 = vld [vmem:[#allocation7 + $0x2d0] sm:$0xff] }
0x105b   :  { %4998 = vmatprep.mubr.msk.f32.mxu0 %vm92_vm0, %v5737_v61 }
0x105c   :  { %4999 = vmatmul.mubr.msk.f32.vlgmr.msra.gmra.mxu0 %vm92_vm0, %v5740_v62 }
0x105d   :  { %5001 = vmatprep.mubr.msk.f32.mxu0 %vm92_vm0, %v5745_v63 }
0x1060   :  { %5002 = vmatmul.mubr.msk.f32.gmra.mxu0 %vm92_vm0, %v5752_v41 }
0x1061   :  { %5012 = vmatprep.mubr.msk.f32.mxu0 %vm92_vm0, %v3151_v9 }
0x111c   :  { %v5756_v10 = vpop.f32.mrf.mxu0 }
0x111d   :  { %v3346_v39 = vmul.f32 %v5756_v10, %v3342_v21 }
0x111e   :  { %v5759_v0 = vpop.f32.mrf.mxu0 }
0x111f   :  { %v3345_v46 = vmul.f32 %v3341_v20, %v5759_v0 }
0x1120   :  { %v5761_v7 = vpop.f32.mrf.mxu0 }
0x1121   :  { %3173 = vrot.lane.b32.xlu0 %v5761_v7, %s5227_s9  ;;  %v3348_v51 = vmul.f32 %v5761_v7, %v3344_v42 }
0x1122   :  { %v5765_v1 = vpop.f32.mrf.mxu0 }
0x1123   :  { %3171 = vrot.lane.b32.xlu1 %v5765_v1, %s5227_s9  ;;  %v3347_v7 = vmul.f32 %v3343_v54, %v5765_v1 }
0x1125   :  { %3169 = vrot.lane.b32.xlu0 %v5756_v10, %s5227_s9  ;;  %v4425_v10 = vld [vmem:[%s5918_s5 + $0x7] ss:$0 sm:$0xff] }
0x1127   :  { %3167 = vrot.lane.b32.xlu1 %v5759_v0, %s5227_s9 }
0x1193   :  { %v3174_v53 = vpop.permute.xlu0 %3173 }
0x1194   :  { %5004 = vmatprep.subr.mxu0 %v3174_v53 }
0x1195   :  { %5005 = vmatpush3.msra.mxu0 %v3174_v53  ;;  %v3172_v2 = vpop.permute.xlu1 %3171  ;;  %v3361_v53 = vld [vmem:[#allocation7 + $0x2f8] sm:$0xff] }
0x1196   :  { %5006 = vmatprep.subr.mxu0 %v3172_v2 }
0x1197   :  { %v3170_v3 = vpop.permute.xlu0 %3169  ;;  %5007 = vmatpush3.msra.mxu0 %v3172_v2 }
0x1198   :  { %5008 = vmatprep.subr.mxu0 %v3170_v3 }
0x1199   :  { %5009 = vmatpush3.msra.mxu0 %v3170_v3  ;;  %v3168_v57 = vpop.permute.xlu1 %3167 }
0x119a   :  { %5010 = vmatprep.subr.mxu0 %v3168_v57 }
0x119b   :  { %5011 = vmatpush3.msra.mxu0 %v3168_v57 }
0x119c   :  { %5013 = vmatmul.mubr.msk.f32.vlgmr.msra.gmra.mxu0 %vm92_vm0, %v3152_v4 }
0x119d   :  { %5015 = vmatprep.mubr.msk.f32.mxu0 %vm92_vm0, %v3153_v5 }
0x11a0   :  { %5016 = vmatmul.mubr.msk.f32.gmra.mxu0 %vm92_vm0, %v3154_v6 }
0x11a1   :  { %5018 = vmatprep.mubr.msk.f32.mxu0 %vm92_vm0, %v3155_v8 }
0x11a4   :  { %5019 = vmatmul.mubr.msk.f32.gmra.mxu0 %vm92_vm0, %v3156_v13 }
0x11a5   :  { %5021 = vmatprep.mubr.msk.f32.mxu0 %vm92_vm0, %v3157_v58 }
0x11a8   :  { %5022 = vmatmul.mubr.msk.f32.gmra.mxu0 %vm92_vm0, %v3158_v26 }
0x11a9   :  { %5024 = vmatprep.mubr.msk.f32.mxu0 %vm92_vm0, %v3159_v11  ;;  %v3360_v11 = vld [vmem:[#allocation7 + $0x2f0] sm:$0xff] }
0x11ac   :  { %5025 = vmatmul.mubr.msk.f32.gmra.mxu0 %vm92_vm0, %v3160_v16 }
0x11ad   :  { %5027 = vmatprep.mubr.msk.f32.mxu0 %vm92_vm0, %v3161_v15 }
0x11b0   :  { %5028 = vmatmul.mubr.msk.f32.gmra.mxu0 %vm92_vm0, %v3162_v24 }
0x125c   :  { %v5014_v12 = vpop.f32.mrf.mxu0 }
0x125d   :  { %v3363_v36 = vmul.f32 %v5014_v12, %v3351_v19 }
0x125e   :  { %v3281_v31 = vpop.f32.mrf.mxu0 }
0x125f   :  { %v3362_v43 = vmul.f32 %v3350_v23, %v3281_v31  ;;  %v3367_v47 = vadd.f32 %v3363_v36, %v3346_v39 }
0x1260   :  { %v5017_v32 = vpop.f32.mrf.mxu0 }
0x1261   :  { %v3365_v48 = vmul.f32 %v5017_v32, %v3353_v27  ;;  %v3366_v55 = vadd.f32 %v3362_v43, %v3345_v46 }
0x1262   :  { %v3291_v17 = vpop.f32.mrf.mxu0 }
0x1263   :  { %v3364_v9 = vmul.f32 %v3352_v49, %v3291_v17  ;;  %v3369_v2 = vadd.f32 %v3365_v48, %v3348_v51 }
0x1264   :  { %v5020_v18 = vpop.f32.mrf.mxu0 }
0x1265   :  { %v3371_v44 = vmul.f32 %v5020_v18, %v3355_v34  ;;  %v3368_v16 = vadd.f32 %v3364_v9, %v3347_v7 }
0x1266   :  { %v3301_v35 = vpop.f32.mrf.mxu0 }
0x1267   :  { %v3370_v50 = vmul.f32 %v3354_v37, %v3301_v35  ;;  %v3375_v59 = vadd.f32 %v3371_v44, %v3367_v47 }
0x1268   :  { %v5023_v38 = vpop.f32.mrf.mxu0 }
0x1269   :  { %v3373_v60 = vmul.f32 %v5023_v38, %v3357_v40  ;;  %v3374_v3 = vadd.f32 %v3370_v50, %v3366_v55 }
0x126a   :  { %v3311_v45 = vpop.f32.mrf.mxu0 }
0x126b   :  { %v3372_v5 = vmul.f32 %v3356_v22, %v3311_v45  ;;  %v3377_v8 = vadd.f32 %v3373_v60, %v3369_v2 }
0x126c   :  { %v5026_v52 = vpop.f32.mrf.mxu0 }
0x126d   :  { %v3379_v56 = vmul.f32 %v5026_v52, %v3359_v14  ;;  %v3376_v33 = vadd.f32 %v3372_v5, %v3368_v16 }
0x126e   :  { %v3321_v0 = vpop.f32.mrf.mxu0 }
0x126f   :  { %v3383_v57 = vadd.f32 %v3379_v56, %v3375_v59  ;;  %v3378_v4 = vmul.f32 %v3358_v28, %v3321_v0 }
0x1270   :  { %v5029_v6 = vpop.f32.mrf.mxu0 }
0x1271   :  { %v3395_v13 = vadd.f32 %v4425_v10, %v3383_v57  ;;  %v3382_v58 = vadd.f32 %v3378_v4, %v3374_v3  ;;  %v3381_v26 = vmul.f32 %v5029_v6, %v3361_v53  ;;  %v4427_v3 = vld [vmem:[%s5919_s6 + $0x7] ss:$0 sm:$0xff] }
0x1272   :  { %v3331_v15 = vpop.f32.mrf.mxu0  ;;  %v4429_v6 = vld [vmem:[%s5920_s7 + $0x7] ss:$0 sm:$0xff] }
0x1273   :  { %v3413_v24 = vmul.f32 %v3395_v13, %v3395_v13  ;;  %v3394_v25 = vadd.f32 %v4425_v10, %v3382_v58  ;;  %v3385_v29 = vadd.f32 %v3381_v26, %v3377_v8  ;;  %v3380_v30 = vmul.f32 %v3360_v11, %v3331_v15 }
0x1274   :  { %v3399_v12 = vsel %vm92_vm0, %v3395_v13, 0.0 }
0x1275   :  { %v3398_v31 = vsel %vm92_vm0, %v3394_v25, 0.0  ;;  %v3412_v32 = vmul.f32 %v3394_v25, %v3394_v25  ;;  %v3397_v17 = vadd.f32 %v4425_v10, %v3385_v29  ;;  %v3384_v19 = vadd.f32 %v3380_v30, %v3376_v33 }
0x1276   :  { %v3400_v1 = vadd.f32 %v3399_v12, %v3398_v31  ;;  %v3417_v18 = vsel %vm92_vm0, %v3413_v24, 0.0  ;;  %v3573_v12 = vld [vmem:[#allocation4 + $0x300] sm:$0xff] }
0x1277   :  { %v3416_v21 = vsel %vm92_vm0, %v3412_v32, 0.0  ;;  %v3396_v34 = vadd.f32 %v4425_v10, %v3384_v19  ;;  %v3415_v35 = vmul.f32 %v3397_v17, %v3397_v17  ;;  %v3403_v37 = vsel %vm92_vm0, %v3397_v17, 0.0 }
0x1278   :  { %v3418_v23 = vadd.f32 %v3417_v18, %v3416_v21 }
0x1279   :  { %v3401_v36 = vsel %vm92_vm0, %v3396_v34, 0.0  ;;  %v3414_v20 = vmul.f32 %v3396_v34, %v3396_v34  ;;  %v3421_v43 = vsel %vm92_vm0, %v3415_v35, 0.0  ;;  %v3575_v35 = vld [vmem:[#allocation4 + $0x310] sm:$0xff] }
0x127a   :  { %v3402_v27 = vadd.f32 %v3401_v36, %v3400_v1  ;;  %v3576_v36 = vld [vmem:[#allocation4 + $0x318] sm:$0xff] }
0x127b   :  { %v3419_v38 = vsel %vm92_vm0, %v3414_v20, 0.0  ;;  %v3577_v20 = vld [vmem:[#allocation4 + $0x320] sm:$0xff] }
0x127c   :  { %v3404_v39 = vadd.f32 %v3403_v37, %v3402_v27  ;;  %v3420_v42 = vadd.f32 %v3419_v38, %v3418_v23  ;;  %v3578_v27 = vld [vmem:[#allocation4 + $0x328] sm:$0xff]  ;;  %v3579_v37 = vld [vmem:[#allocation4 + $0x330] sm:$0xff]  ;;  %v3580_v38 = vld [vmem:[#allocation4 + $0x338] sm:$0xff] }
0x127e   :  { %v3405_v44 = vrot.slane %v3404_v39, 4  ;;  %v3422_v40 = vadd.f32 %v3421_v43, %v3420_v42  ;;  %v3582_v42 = vld [vmem:[#allocation4 + $0x348] sm:$0xff]  ;;  %v3583_v43 = vld [vmem:[#allocation4 + $0x350] sm:$0xff] }
0x1280   :  { %v3406_v45 = vadd.f32 %v3405_v44, %v3404_v39  ;;  %v3423_v14 = vrot.slane %v3422_v40, 4  ;;  %v3581_v39 = vld [vmem:[#allocation4 + $0x340] sm:$0xff]  ;;  %v3584_v44 = vld [vmem:[#allocation4 + $0x358] sm:$0xff] }
0x1282   :  { %v3407_v46 = vrot.slane %v3406_v45, 2  ;;  %v3424_v47 = vadd.f32 %v3423_v14, %v3422_v40  ;;  %v3900_v40 = vld [vmem:[#allocation2 + $0x138] sm:$0xff]  ;;  %v3898_v14 = vld [vmem:[#allocation2 + $0x128] sm:$0xff] }
0x1283   :  { %5070 = vmatprep.subr.mxu0 %v3900_v40 }
0x1284   :  { %v3408_v48 = vadd.f32 %v3407_v46, %v3406_v45  ;;  %v3425_v49 = vrot.slane %v3424_v47, 2  ;;  %v3899_v45 = vld [vmem:[#allocation2 + $0x130] sm:$0xff]  ;;  %5071 = vmatpush3.msra.mxu0 %v3900_v40  ;;  %v3897_v46 = vld [vmem:[#allocation2 + $0x120] sm:$0xff] }
0x1285   :  { %5072 = vmatprep.subr.mxu0 %v3899_v45 }
0x1286   :  { %v3409_v50 = vrot.slane %v3408_v48, 1  ;;  %v3426_v51 = vadd.f32 %v3425_v49, %v3424_v47  ;;  %5073 = vmatpush3.msra.mxu0 %v3899_v45 }
0x1287   :  { %5074 = vmatprep.subr.mxu0 %v3898_v14 }
0x1288   :  { %v3410_v52 = vadd.f32 %v3409_v50, %v3408_v48  ;;  %v3427_v28 = vrot.slane %v3426_v51, 1  ;;  %5075 = vmatpush3.msra.mxu0 %v3898_v14 }
0x1289   :  { %5076 = vmatprep.subr.mxu0 %v3897_v46 }
0x128a   :  { %v3411_v54 = vmul.f32 0.03125, %v3410_v52  ;;  %v3428_v55 = vadd.f32 %v3427_v28, %v3426_v51  ;;  %5077 = vmatpush3.msra.mxu0 %v3897_v46  ;;  %v3773_v51 = vld [vmem:[#allocation7 + $0x308] sm:$0xff] }
0x128b   :  { %v3764_v28 = vld [vmem:[#allocation6 + $0x108] sm:$0xff] }
0x128c   :  { %v3429_v59 = vmul.f32 0.03125, %v3428_v55  ;;  %v3430_v60 = vmul.f32 %v3411_v54, %v3411_v54  ;;  %v3432_v22 = vsub.f32 %v3394_v25, %v3411_v54  ;;  %v3433_v56 = vsub.f32 %v3395_v13, %v3411_v54  ;;  %v3777_v55 = vld [vmem:[#allocation7 + $0x328] sm:$0xff] }
0x128d   :  { %v3435_v9 = vsub.f32 %v3397_v17, %v3411_v54  ;;  %v3434_v53 = vsub.f32 %v3396_v34, %v3411_v54  ;;  %v3574_v34 = vld [vmem:[#allocation4 + $0x308] sm:$0xff]  ;;  %v3772_v54 = vld [vmem:[#allocation7 + $0x300] sm:$0xff] }
0x128e   :  { %v3431_v10 = vsub.f32 %v3429_v59, %v3430_v60 }
0x1290   :  { %v3436_v0 = vadd.f32 1e-05, %v3431_v10 }
0x1292   :  { %5131 = vrsqrt.f32 %v3436_v0 }
0x129f   :  { %v5132_v2 = vpop.eup %5131 }
0x12a0   :  { %v3440_v57 = vmul.f32 %v5132_v2, %v3434_v53  ;;  %v3438_v4 = vmul.f32 %v5132_v2, %v3432_v22  ;;  %v3439_v7 = vmul.f32 %v5132_v2, %v3433_v56  ;;  %v3441_v5 = vmul.f32 %v5132_v2, %v3435_v9  ;;  %v3763_v22 = vld [vmem:[#allocation6 + $0x100] sm:$0xff]  ;;  %v3775_v56 = vld [vmem:[#allocation7 + $0x318] sm:$0xff] }
0x12a1   :  { %v3776_v9 = vld [vmem:[#allocation7 + $0x320] sm:$0xff]  ;;  %v3766_v53 = vld [vmem:[#allocation6 + $0x118] sm:$0xff] }
0x12a2   :  { %v3450_v8 = vmul.f32 %v4427_v3, %v3438_v4  ;;  %v3451_v13 = vmul.f32 %v4427_v3, %v3439_v7  ;;  %v3452_v58 = vmul.f32 %v4427_v3, %v3440_v57  ;;  %v3453_v26 = vmul.f32 %v4427_v3, %v3441_v5  ;;  %v3779_v57 = vld [vmem:[#allocation7 + $0x338] sm:$0xff]  ;;  %v3781_v7 = vld [vmem:[#allocation7 + $0x348] sm:$0xff] }
0x12a4   :  { %v3462_v11 = vadd.f32 %v4429_v6, %v3450_v8  ;;  %v3463_v16 = vadd.f32 %v4429_v6, %v3451_v13  ;;  %v3464_v15 = vadd.f32 %v4429_v6, %v3452_v58  ;;  %v3465_v29 = vadd.f32 %v4429_v6, %v3453_v26  ;;  %v3774_v13 = vld [vmem:[#allocation7 + $0x310] sm:$0xff] }
0x12a6   :  { %v3466_v24 = vmax.f32 %v3462_v11, 0.0  ;;  %v3467_v25 = vmax.f32 %v3463_v16, 0.0  ;;  %v3468_v33 = vmax.f32 %v3464_v15, 0.0  ;;  %v3469_v30 = vmax.f32 %v3465_v29, 0.0  ;;  %v3780_v16 = vld [vmem:[#allocation7 + $0x340] sm:$0xff]  ;;  %v3765_v15 = vld [vmem:[#allocation6 + $0x110] sm:$0xff] }
0x12a8   :  { %5038 = vmatprep.mubr.msk.f32.mxu1 %vm92_vm0, %v3466_v24 }
0x12a9   :  { %5039 = vmatmul.mubr.msk.f32.vlgmr.msra.gmra.mxu1 %vm92_vm0, %v3467_v25 }
0x12aa   :  { %5041 = vmatprep.mubr.msk.f32.mxu1 %vm92_vm0, %v3468_v33  ;;  %v3778_v33 = vld [vmem:[#allocation7 + $0x330] sm:$0xff] }
0x12ad   :  { %5042 = vmatmul.mubr.msk.f32.gmra.mxu1 %vm92_vm0, %v3469_v30 }
0x12ae   :  { %5052 = vmatprep.mubr.msk.f32.mxu1 %vm92_vm0, %v3573_v12 }
0x1369   :  { %v5809_v31 = vpop.f32.mrf.mxu1 }
0x136a   :  { %v3768_v0 = vmul.f32 %v5809_v31, %v3764_v28 }
0x136b   :  { %v5812_v32 = vpop.f32.mrf.mxu1 }
0x136c   :  { %v3767_v5 = vmul.f32 %v3763_v22, %v5812_v32 }
0x136d   :  { %v5814_v1 = vpop.f32.mrf.mxu1 }
0x136e   :  { %3595 = vrot.lane.b32.xlu0 %v5814_v1, %s5227_s9  ;;  %v3770_v26 = vmul.f32 %v5814_v1, %v3766_v53 }
0x136f   :  { %v5818_v17 = vpop.f32.mrf.mxu1 }
0x1370   :  { %3593 = vrot.lane.b32.xlu1 %v5818_v17, %s5227_s9  ;;  %v3769_v1 = vmul.f32 %v3765_v15, %v5818_v17 }
0x1372   :  { %3591 = vrot.lane.b32.xlu0 %v5809_v31, %s5227_s9  ;;  %v4447_v31 = vld [vmem:[%s5918_s5 + $0x8] ss:$0 sm:$0xff] }
0x1374   :  { %3589 = vrot.lane.b32.xlu1 %v5812_v32, %s5227_s9 }
0x13e0   :  { %v3596_v19 = vpop.permute.xlu0 %3595 }
0x13e1   :  { %5044 = vmatprep.subr.mxu1 %v3596_v19 }
0x13e2   :  { %5045 = vmatpush3.msra.mxu1 %v3596_v19  ;;  %v3594_v18 = vpop.permute.xlu1 %3593  ;;  %v3783_v19 = vld [vmem:[#allocation7 + $0x358] sm:$0xff] }
0x13e3   :  { %5046 = vmatprep.subr.mxu1 %v3594_v18 }
0x13e4   :  { %v3592_v21 = vpop.permute.xlu0 %3591  ;;  %5047 = vmatpush3.msra.mxu1 %v3594_v18 }
0x13e5   :  { %5048 = vmatprep.subr.mxu1 %v3592_v21 }
0x13e6   :  { %5049 = vmatpush3.msra.mxu1 %v3592_v21  ;;  %v3590_v23 = vpop.permute.xlu1 %3589 }
0x13e7   :  { %5050 = vmatprep.subr.mxu1 %v3590_v23 }
0x13e8   :  { %5051 = vmatpush3.msra.mxu1 %v3590_v23 }
0x13e9   :  { %5053 = vmatmul.mubr.msk.f32.vlgmr.msra.gmra.mxu1 %vm92_vm0, %v3574_v34 }
0x13ea   :  { %5055 = vmatprep.mubr.msk.f32.mxu1 %vm92_vm0, %v3575_v35 }
0x13ed   :  { %5056 = vmatmul.mubr.msk.f32.gmra.mxu1 %vm92_vm0, %v3576_v36 }
0x13ee   :  { %5058 = vmatprep.mubr.msk.f32.mxu1 %vm92_vm0, %v3577_v20 }
0x13f1   :  { %5059 = vmatmul.mubr.msk.f32.gmra.mxu1 %vm92_vm0, %v3578_v27 }
0x13f2   :  { %5061 = vmatprep.mubr.msk.f32.mxu1 %vm92_vm0, %v3579_v37 }
0x13f5   :  { %5062 = vmatmul.mubr.msk.f32.gmra.mxu1 %vm92_vm0, %v3580_v38 }
0x13f6   :  { %5064 = vmatprep.mubr.msk.f32.mxu1 %vm92_vm0, %v3581_v39  ;;  %v3782_v39 = vld [vmem:[#allocation7 + $0x350] sm:$0xff] }
0x13f9   :  { %5065 = vmatmul.mubr.msk.f32.gmra.mxu1 %vm92_vm0, %v3582_v42 }
0x13fa   :  { %5067 = vmatprep.mubr.msk.f32.mxu1 %vm92_vm0, %v3583_v43 }
0x13fd   :  { %5068 = vmatmul.mubr.msk.f32.gmra.mxu1 %vm92_vm0, %v3584_v44 }
0x14a9   :  { %v5054_v47 = vpop.f32.mrf.mxu1 }
0x14aa   :  { %v3785_v60 = vmul.f32 %v5054_v47, %v3773_v51 }
0x14ab   :  { %v3703_v48 = vpop.f32.mrf.mxu1 }
0x14ac   :  { %v3784_v2 = vmul.f32 %v3772_v54, %v3703_v48  ;;  %v3789_v6 = vadd.f32 %v3785_v60, %v3768_v0 }
0x14ad   :  { %v5057_v49 = vpop.f32.mrf.mxu1 }
0x14ae   :  { %v3787_v8 = vmul.f32 %v5057_v49, %v3775_v56  ;;  %v3788_v24 = vadd.f32 %v3784_v2, %v3767_v5 }
0x14af   :  { %v3713_v50 = vpop.f32.mrf.mxu1 }
0x14b0   :  { %v3786_v12 = vmul.f32 %v3774_v13, %v3713_v50  ;;  %v3791_v18 = vadd.f32 %v3787_v8, %v3770_v26 }
0x14b1   :  { %v5060_v52 = vpop.f32.mrf.mxu1 }
0x14b2   :  { %v3793_v3 = vmul.f32 %v5060_v52, %v3777_v55  ;;  %v3790_v42 = vadd.f32 %v3786_v12, %v3769_v1 }
0x14b3   :  { %v3723_v59 = vpop.f32.mrf.mxu1 }
0x14b4   :  { %v3792_v58 = vmul.f32 %v3776_v9, %v3723_v59  ;;  %v3797_v25 = vadd.f32 %v3793_v3, %v3789_v6 }
0x14b5   :  { %v5063_v10 = vpop.f32.mrf.mxu1 }
0x14b6   :  { %v3795_v29 = vmul.f32 %v5063_v10, %v3779_v57  ;;  %v3796_v21 = vadd.f32 %v3792_v58, %v3788_v24 }
0x14b7   :  { %v3733_v4 = vpop.f32.mrf.mxu1 }
0x14b8   :  { %v3794_v35 = vmul.f32 %v3778_v33, %v3733_v4  ;;  %v3799_v20 = vadd.f32 %v3795_v29, %v3791_v18 }
0x14b9   :  { %v5066_v11 = vpop.f32.mrf.mxu1 }
0x14ba   :  { %v3801_v30 = vmul.f32 %v5066_v11, %v3781_v7  ;;  %v3798_v14 = vadd.f32 %v3794_v35, %v3790_v42 }
0x14bb   :  { %v3743_v32 = vpop.f32.mrf.mxu1 }
0x14bc   :  { %v3805_v23 = vadd.f32 %v3801_v30, %v3797_v25  ;;  %v3800_v34 = vmul.f32 %v3780_v16, %v3743_v32 }
0x14bd   :  { %v5069_v36 = vpop.f32.mrf.mxu1 }
0x14be   :  { %v3817_v27 = vadd.f32 %v4447_v31, %v3805_v23  ;;  %v3804_v37 = vadd.f32 %v3800_v34, %v3796_v21  ;;  %v3803_v38 = vmul.f32 %v5069_v36, %v3783_v19  ;;  %v4449_v21 = vld [vmem:[%s5919_s6 + $0x8] ss:$0 sm:$0xff] }
0x14bf   :  { %v3753_v43 = vpop.f32.mrf.mxu1  ;;  %v4451_v36 = vld [vmem:[%s5920_s7 + $0x8] ss:$0 sm:$0xff] }
0x14c0   :  { %v3835_v44 = vmul.f32 %v3817_v27, %v3817_v27  ;;  %v3816_v40 = vadd.f32 %v4447_v31, %v3804_v37  ;;  %v3807_v45 = vadd.f32 %v3803_v38, %v3799_v20  ;;  %v3802_v46 = vmul.f32 %v3782_v39, %v3753_v43 }
0x14c1   :  { %v3821_v47 = vsel %vm92_vm0, %v3817_v27, 0.0 }
0x14c2   :  { %v3820_v48 = vsel %vm92_vm0, %v3816_v40, 0.0  ;;  %v3834_v49 = vmul.f32 %v3816_v40, %v3816_v40  ;;  %v3819_v50 = vadd.f32 %v4447_v31, %v3807_v45  ;;  %v3806_v51 = vadd.f32 %v3802_v46, %v3798_v14 }
0x14c3   :  { %v3822_v17 = vadd.f32 %v3821_v47, %v3820_v48  ;;  %v3839_v52 = vsel %vm92_vm0, %v3835_v44, 0.0 }
0x14c4   :  { %v3838_v28 = vsel %vm92_vm0, %v3834_v49, 0.0  ;;  %v3818_v55 = vadd.f32 %v4447_v31, %v3806_v51  ;;  %v3837_v59 = vmul.f32 %v3819_v50, %v3819_v50  ;;  %v3825_v9 = vsel %vm92_vm0, %v3819_v50, 0.0 }
0x14c5   :  { %v3840_v54 = vadd.f32 %v3839_v52, %v3838_v28 }
0x14c6   :  { %v3823_v60 = vsel %vm92_vm0, %v3818_v55, 0.0  ;;  %v3836_v22 = vmul.f32 %v3818_v55, %v3818_v55  ;;  %v3843_v2 = vsel %vm92_vm0, %v3837_v59, 0.0  ;;  %v4001_v59 = vld [vmem:[#allocation4 + $0x370] sm:$0xff] }
0x14c7   :  { %v3824_v56 = vadd.f32 %v3823_v60, %v3822_v17  ;;  %v4002_v60 = vld [vmem:[#allocation4 + $0x378] sm:$0xff] }
0x14c8   :  { %v3841_v10 = vsel %vm92_vm0, %v3836_v22, 0.0  ;;  %v4003_v22 = vld [vmem:[#allocation4 + $0x380] sm:$0xff] }
0x14c9   :  { %v3826_v0 = vadd.f32 %v3825_v9, %v3824_v56  ;;  %v3842_v53 = vadd.f32 %v3841_v10, %v3840_v54  ;;  %v4004_v56 = vld [vmem:[#allocation4 + $0x388] sm:$0xff]  ;;  %v4005_v9 = vld [vmem:[#allocation4 + $0x390] sm:$0xff]  ;;  %v4006_v10 = vld [vmem:[#allocation4 + $0x398] sm:$0xff] }
0x14cb   :  { %v3827_v3 = vrot.slane %v3826_v0, 4  ;;  %v3844_v57 = vadd.f32 %v3843_v2, %v3842_v53  ;;  %v4008_v53 = vld [vmem:[#allocation4 + $0x3a8] sm:$0xff]  ;;  %v4009_v2 = vld [vmem:[#allocation4 + $0x3b0] sm:$0xff] }
0x14cd   :  { %v3828_v4 = vadd.f32 %v3827_v3, %v3826_v0  ;;  %v3845_v7 = vrot.slane %v3844_v57, 4  ;;  %v4007_v0 = vld [vmem:[#allocation4 + $0x3a0] sm:$0xff]  ;;  %v4010_v3 = vld [vmem:[#allocation4 + $0x3b8] sm:$0xff] }
0x14cf   :  { %v3829_v5 = vrot.slane %v3828_v4, 2  ;;  %v3846_v6 = vadd.f32 %v3845_v7, %v3844_v57 }
0x14d1   :  { %v3830_v8 = vadd.f32 %v3829_v5, %v3828_v4  ;;  %v3847_v13 = vrot.slane %v3846_v6, 2 }
0x14d3   :  { %v3831_v58 = vrot.slane %v3830_v8, 1  ;;  %v3848_v26 = vadd.f32 %v3847_v13, %v3846_v6  ;;  %v4199_v6 = vld [vmem:[#allocation7 + $0x368] sm:$0xff] }
0x14d4   :  { %v4190_v13 = vld [vmem:[#allocation6 + $0x128] sm:$0xff] }
0x14d5   :  { %v3832_v11 = vadd.f32 %v3831_v58, %v3830_v8  ;;  %v3849_v16 = vrot.slane %v3848_v26, 1  ;;  %v4198_v58 = vld [vmem:[#allocation7 + $0x360] sm:$0xff] }
0x14d7   :  { %v3833_v15 = vmul.f32 0.03125, %v3832_v11  ;;  %v3850_v24 = vadd.f32 %v3849_v16, %v3848_v26  ;;  %v4203_v26 = vld [vmem:[#allocation7 + $0x388] sm:$0xff] }
0x14d9   :  { %v3851_v25 = vmul.f32 0.03125, %v3850_v24  ;;  %v3852_v29 = vmul.f32 %v3833_v15, %v3833_v15  ;;  %v3854_v33 = vsub.f32 %v3816_v40, %v3833_v15  ;;  %v3855_v30 = vsub.f32 %v3817_v27, %v3833_v15  ;;  %v4189_v24 = vld [vmem:[#allocation6 + $0x120] sm:$0xff] }
0x14da   :  { %v3857_v12 = vsub.f32 %v3819_v50, %v3833_v15  ;;  %v3856_v19 = vsub.f32 %v3818_v55, %v3833_v15  ;;  %v3999_v50 = vld [vmem:[#allocation4 + $0x360] sm:$0xff]  ;;  %v4000_v55 = vld [vmem:[#allocation4 + $0x368] sm:$0xff]  ;;  %v4201_v15 = vld [vmem:[#allocation7 + $0x378] sm:$0xff] }
0x14db   :  { %v3853_v31 = vsub.f32 %v3851_v25, %v3852_v29  ;;  %v4202_v25 = vld [vmem:[#allocation7 + $0x380] sm:$0xff] }
0x14dd   :  { %v3858_v32 = vadd.f32 1e-05, %v3853_v31  ;;  %v4200_v31 = vld [vmem:[#allocation7 + $0x370] sm:$0xff] }
0x14df   :  { %5133 = vrsqrt.f32 %v3858_v32 }
0x14ec   :  { %v5134_v18 = vpop.eup %5133 }
0x14ed   :  { %v3862_v23 = vmul.f32 %v5134_v18, %v3856_v19  ;;  %v3860_v34 = vmul.f32 %v5134_v18, %v3854_v33  ;;  %v3861_v1 = vmul.f32 %v5134_v18, %v3855_v30  ;;  %v3863_v35 = vmul.f32 %v5134_v18, %v3857_v12  ;;  %v4192_v30 = vld [vmem:[#allocation6 + $0x138] sm:$0xff] }
0x14ee   :  { %v4205_v18 = vld [vmem:[#allocation7 + $0x398] sm:$0xff] }
0x14ef   :  { %v3872_v20 = vmul.f32 %v4449_v21, %v3860_v34  ;;  %v3873_v27 = vmul.f32 %v4449_v21, %v3861_v1  ;;  %v3874_v37 = vmul.f32 %v4449_v21, %v3862_v23  ;;  %v3875_v38 = vmul.f32 %v4449_v21, %v3863_v35  ;;  %v4207_v23 = vld [vmem:[#allocation7 + $0x3a8] sm:$0xff]  ;;  %v4191_v1 = vld [vmem:[#allocation6 + $0x130] sm:$0xff] }
0x14f1   :  { %v3884_v39 = vadd.f32 %v4451_v36, %v3872_v20  ;;  %v3885_v42 = vadd.f32 %v4451_v36, %v3873_v27  ;;  %v3886_v43 = vadd.f32 %v4451_v36, %v3874_v37  ;;  %v3887_v44 = vadd.f32 %v4451_v36, %v3875_v38  ;;  %v4204_v37 = vld [vmem:[#allocation7 + $0x390] sm:$0xff] }
0x14f3   :  { %v3888_v40 = vmax.f32 %v3884_v39, 0.0  ;;  %v3889_v45 = vmax.f32 %v3885_v42, 0.0  ;;  %v3890_v14 = vmax.f32 %v3886_v43, 0.0  ;;  %v3891_v48 = vmax.f32 %v3887_v44, 0.0  ;;  %v4206_v39 = vld [vmem:[#allocation7 + $0x3a0] sm:$0xff] }
0x14f5   :  { %v3892_v46 = vadd.f32 %v3888_v40, %v5737_v61  ;;  %v3893_v47 = vadd.f32 %v3889_v45, %v5740_v62  ;;  %v3894_v49 = vadd.f32 %v3890_v14, %v5745_v63  ;;  %v3895_v17 = vadd.f32 %v3891_v48, %v5752_v41  ;;  %v4209_v48 = vld [vmem:[#allocation7 + $0x3b8] sm:$0xff] }
0x14f7   :  { %5078 = vmatprep.mubr.msk.f32.mxu0 %vm92_vm0, %v3892_v46  ;;  %v4469_v46 = vld [vmem:[%s5918_s5 + $0x9] ss:$0 sm:$0xff] }
0x14f8   :  { %5079 = vmatmul.mubr.msk.f32.vlgmr.msra.gmra.mxu0 %vm92_vm0, %v3893_v47 }
0x14f9   :  { %5081 = vmatprep.mubr.msk.f32.mxu0 %vm92_vm0, %v3894_v49 }
0x14fc   :  { %5082 = vmatmul.mubr.msk.f32.gmra.mxu0 %vm92_vm0, %v3895_v17 }
0x14fd   :  { %5092 = vmatprep.mubr.msk.f32.mxu0 %vm92_vm0, %v3999_v50 }
0x15b8   :  { %v5080_v51 = vpop.f32.mrf.mxu0 }
0x15b9   :  { %v4194_v33 = vmul.f32 %v5080_v51, %v4190_v13 }
0x15ba   :  { %v5867_v61 = vpop.f32.mrf.mxu0 }
0x15bb   :  { %v4193_v34 = vmul.f32 %v4189_v24, %v5867_v61 }
0x15bc   :  { %v5869_v62 = vpop.f32.mrf.mxu0 }
0x15bd   :  { %4021 = vrot.lane.b32.xlu0 %v5869_v62, %s5227_s9  ;;  %v4196_v20 = vmul.f32 %v5869_v62, %v4192_v30 }
0x15be   :  { %v5873_v63 = vpop.f32.mrf.mxu0 }
0x15bf   :  { %4019 = vrot.lane.b32.xlu1 %v5873_v63, %s5227_s9  ;;  %v4195_v45 = vmul.f32 %v4191_v1, %v5873_v63 }
0x15c1   :  { %4017 = vrot.lane.b32.xlu0 %v5080_v51, %s5227_s9 }
0x15c3   :  { %4015 = vrot.lane.b32.xlu1 %v5867_v61, %s5227_s9 }
0x162f   :  { %v4022_v41 = vpop.permute.xlu0 %4021 }
0x1630   :  { %5084 = vmatprep.subr.mxu0 %v4022_v41 }
0x1631   :  { %5085 = vmatpush3.msra.mxu0 %v4022_v41  ;;  %v4020_v52 = vpop.permute.xlu1 %4019  ;;  %v4208_v41 = vld [vmem:[#allocation7 + $0x3b0] sm:$0xff] }
0x1632   :  { %5086 = vmatprep.subr.mxu0 %v4020_v52 }
0x1633   :  { %v4018_v28 = vpop.permute.xlu0 %4017  ;;  %5087 = vmatpush3.msra.mxu0 %v4020_v52 }
0x1634   :  { %5088 = vmatprep.subr.mxu0 %v4018_v28 }
0x1635   :  { %5089 = vmatpush3.msra.mxu0 %v4018_v28  ;;  %v4016_v54 = vpop.permute.xlu1 %4015 }
0x1636   :  { %5090 = vmatprep.subr.mxu0 %v4016_v54 }
0x1637   :  { %5091 = vmatpush3.msra.mxu0 %v4016_v54 }
0x1638   :  { %5093 = vmatmul.mubr.msk.f32.vlgmr.msra.gmra.mxu0 %vm92_vm0, %v4000_v55 }
0x1639   :  { %5095 = vmatprep.mubr.msk.f32.mxu0 %vm92_vm0, %v4001_v59 }
0x163c   :  { %5096 = vmatmul.mubr.msk.f32.gmra.mxu0 %vm92_vm0, %v4002_v60 }
0x163d   :  { %5098 = vmatprep.mubr.msk.f32.mxu0 %vm92_vm0, %v4003_v22 }
0x1640   :  { %5099 = vmatmul.mubr.msk.f32.gmra.mxu0 %vm92_vm0, %v4004_v56 }
0x1641   :  { %5101 = vmatprep.mubr.msk.f32.mxu0 %vm92_vm0, %v4005_v9 }
0x1644   :  { %5102 = vmatmul.mubr.msk.f32.gmra.mxu0 %vm92_vm0, %v4006_v10 }
0x1645   :  { %5104 = vmatprep.mubr.msk.f32.mxu0 %vm92_vm0, %v4007_v0 }
0x1648   :  { %5105 = vmatmul.mubr.msk.f32.gmra.mxu0 %vm92_vm0, %v4008_v53 }
0x1649   :  { %5107 = vmatprep.mubr.msk.f32.mxu0 %vm92_vm0, %v4009_v2 }
0x164c   :  { %5108 = vmatmul.mubr.msk.f32.gmra.mxu0 %vm92_vm0, %v4010_v3 }
0x16f8   :  { %v5094_v57 = vpop.f32.mrf.mxu0 }
0x16f9   :  { %v4211_v16 = vmul.f32 %v5094_v57, %v4199_v6 }
0x16fa   :  { %v4129_v4 = vpop.f32.mrf.mxu0 }
0x16fb   :  { %v4210_v12 = vmul.f32 %v4198_v58, %v4129_v4  ;;  %v4215_v35 = vadd.f32 %v4211_v16, %v4194_v33 }
0x16fc   :  { %v5097_v7 = vpop.f32.mrf.mxu0 }
0x16fd   :  { %v4213_v19 = vmul.f32 %v5097_v7, %v4201_v15  ;;  %v4214_v42 = vadd.f32 %v4210_v12, %v4193_v34 }
0x16fe   :  { %v4139_v5 = vpop.f32.mrf.mxu0 }
0x16ff   :  { %v4212_v27 = vmul.f32 %v4200_v31, %v4139_v5  ;;  %v4217_v14 = vadd.f32 %v4213_v19, %v4196_v20 }
0x1700   :  { %v5100_v8 = vpop.f32.mrf.mxu0 }
0x1701   :  { %v4219_v32 = vmul.f32 %v5100_v8, %v4203_v26  ;;  %v4216_v61 = vadd.f32 %v4212_v27, %v4195_v45 }
0x1702   :  { %v4149_v11 = vpop.f32.mrf.mxu0 }
0x1703   :  { %v4218_v36 = vmul.f32 %v4202_v25, %v4149_v11  ;;  %v4223_v43 = vadd.f32 %v4219_v32, %v4215_v35 }
0x1704   :  { %v5103_v29 = vpop.f32.mrf.mxu0 }
0x1705   :  { %v4221_v44 = vmul.f32 %v5103_v29, %v4205_v18  ;;  %v4222_v49 = vadd.f32 %v4218_v36, %v4214_v42 }
0x1706   :  { %v4159_v21 = vpop.f32.mrf.mxu0 }
0x1707   :  { %v4220_v17 = vmul.f32 %v4204_v37, %v4159_v21  ;;  %v4225_v52 = vadd.f32 %v4221_v44, %v4217_v14 }
0x1708   :  { %v5106_v38 = vpop.f32.mrf.mxu0 }
0x1709   :  { %v4227_v40 = vmul.f32 %v5106_v38, %v4207_v23  ;;  %v4224_v63 = vadd.f32 %v4220_v17, %v4216_v61 }
0x170a   :  { %v4169_v47 = vpop.f32.mrf.mxu0 }
0x170b   :  { %v4231_v50 = vadd.f32 %v4227_v40, %v4223_v43  ;;  %v4226_v51 = vmul.f32 %v4206_v39, %v4169_v47 }
0x170c   :  { %v5109_v62 = vpop.f32.mrf.mxu0 }
0x170d   :  { %v4243_v28 = vadd.f32 %v4469_v46, %v4231_v50  ;;  %v4230_v54 = vadd.f32 %v4226_v51, %v4222_v49  ;;  %v4229_v55 = vmul.f32 %v5109_v62, %v4209_v48 }
0x170e   :  { %v4179_v59 = vpop.f32.mrf.mxu0 }
0x170f   :  { %4247 = vst.msk [vmem:[%s5921_s8 + $0x8] sm:$0xff] %vm92_vm0, %v4243_v28  ;;  %v4242_v60 = vadd.f32 %v4469_v46, %v4230_v54  ;;  %v4233_v22 = vadd.f32 %v4229_v55, %v4225_v52  ;;  %v4228_v56 = vmul.f32 %v4208_v41, %v4179_v59 }
0x1711   :  { %4246 = vst.msk [vmem:[%s5921_s8] sm:$0xff] %vm92_vm0, %v4242_v60  ;;  %v4245_v9 = vadd.f32 %v4469_v46, %v4233_v22  ;;  %v4232_v10 = vadd.f32 %v4228_v56, %v4224_v63 }
0x1713   :  { %4249 = vst.msk [vmem:[%s5921_s8 + $0x18] sm:$0xff] %vm92_vm0, %v4245_v9  ;;  %v4244_v0 = vadd.f32 %v4469_v46, %v4232_v10 }
0x1715   :  { %4248 = vst.msk [vmem:[%s5921_s8 + $0x10] sm:$0xff] %vm92_vm0, %v4244_v0 }
0x1716   :  { %4254 = vsyncpa [#allocation3], 1 }
0x1717   :  { %4255 = vsyncpa [#allocation5], 1 }
0x1718   :  { %4256 = vsyncpa [#allocation8], 1 }

</bundles_post_ra>
